<compile_context>
chip_gen: v6e
topology: v6e:2x2x1
jax: 0.10.0
libtpu: 0.0.40
codegen_flags: <defaults>
</compile_context>

<pallas_src>
import functools

import jax
import jax.numpy as jnp
from jax.experimental import pallas as pl
from jax.experimental.pallas import tpu as pltpu


def _vmem_specs(n):
    return [pl.BlockSpec(memory_space=pltpu.MemorySpace.VMEM) for _ in range(n)]


def _vmem_spec():
    return pl.BlockSpec(memory_space=pltpu.MemorySpace.VMEM)


# ----------------------------------------------------------------------------
# Kernel 1: edge network (computed once; edge features never change).
#   ew = relu(edge_x @ W1 + b1) @ W2 + b2        -> (E, D*D)
# Kept as a separate call because the (E, D*D) -> (E, D, D) reshape is a free
# HBM-view change in JAX but would be a lane-relayout inside a kernel.
# ----------------------------------------------------------------------------
def _edge_net_kernel(x_ref, w1_ref, b1_ref, w2_ref, b2_ref, o_ref):
    f32 = jnp.float32
    h = jnp.maximum(
        jnp.dot(x_ref[...], w1_ref[...], preferred_element_type=f32) + b1_ref[...], 0.0)
    o_ref[...] = jnp.dot(h, w2_ref[...], preferred_element_type=f32) + b2_ref[...]


# ----------------------------------------------------------------------------
# Kernel 2: fused MPNNGNN + Set2Set readout.
#   h = relu(node_x @ Wp + bp)
#   repeat num_mp_steps:
#     m = relu(scatter_sum(dst, per_edge_msg(gather(src, h), W_e)) + b_conv)
#     h = GRU(m, h)
#   feat = h
#   lh = lc = r = 0
#   repeat set2set_iters:
#     lh, lc = LSTMCell(q_star=[lh, r], (lh, lc))
#     r      = softmax-attention(lh, feat, per-graph) @ feat
# Everything (h, w_edges, one-hots, membership, all RNN weights, q_star halves)
# stays VMEM-resident for the whole pass.
# ----------------------------------------------------------------------------
def _mpnn_fused_kernel(node_x_ref, proj_w_ref, proj_b_ref, w_edges_ref,
                       src_ref, dstT_ref, nnconv_b_ref,
                       gru_wi_ref, gru_wh_ref, gru_bi_ref, gru_bh_ref,
                       mem_ref, ls_wlh_ref, ls_wr_ref, ls_b_ref,
                       lh_out_ref, r_out_ref, *, num_mp_steps, set2set_iters):
    f32 = jnp.float32

    # ---- project_node_feats = Linear + ReLU ----
    h = jnp.maximum(
        jnp.dot(node_x_ref[...], proj_w_ref[...], preferred_element_type=f32)
        + proj_b_ref[...], 0.0)                                     # (V, D)

    # ---- VMEM-resident loop invariants ----
    w_edges = w_edges_ref[...]                                      # (E, D, D)
    src = src_ref[...].astype(f32)                                  # (E, V)  bf16 -> exact f32
    dstT = dstT_ref[...].astype(f32)                                # (V, E)
    nnconv_b = nnconv_b_ref[...]                                    # (1, D)
    wi = gru_wi_ref[...]                                            # (3, D, D)  [r, z, n]
    wh = gru_wh_ref[...]                                            # (3, D, D)
    bi = gru_bi_ref[...]                                            # (3, D)
    bh = gru_bh_ref[...]                                            # (3, D)

    # ---- message passing: num_mp_steps x [NNConv -> ReLU -> GRU] ----
    for _ in range(num_mp_steps):
        # NNConv (sum aggregation) + ReLU
        h_src = jnp.dot(src, h, preferred_element_type=f32)         # (E, D) MXU gather
        # per-edge message: h_src[e] @ W_e  (VPU broadcast + XLU sublane reduce)
        # TODO(synk): switch to a batched MXU contraction / index gather at large E.
        msgs = jnp.sum(h_src[:, :, None] * w_edges, axis=1)         # (E, D)
        m = jnp.maximum(
            jnp.dot(dstT, msgs, preferred_element_type=f32) + nnconv_b, 0.0)  # (V, D)

        # GRU cell (per-gate weights: no unaligned lane slicing)
        r_g = jax.nn.sigmoid(
            jnp.dot(m, wi[0], preferred_element_type=f32) + bi[0:1]
            + jnp.dot(h, wh[0], preferred_element_type=f32) + bh[0:1])
        z_g = jax.nn.sigmoid(
            jnp.dot(m, wi[1], preferred_element_type=f32) + bi[1:2]
            + jnp.dot(h, wh[1], preferred_element_type=f32) + bh[1:2])
        n_g = jnp.tanh(
            jnp.dot(m, wi[2], preferred_element_type=f32) + bi[2:3]
            + r_g * (jnp.dot(h, wh[2], preferred_element_type=f32) + bh[2:3]))
        h = (1.0 - z_g) * n_g + z_g * h

    feat = h                                                        # (V, D)

    # ---- Set2Set readout (n_layers=1), q_star kept as two halves [lh, r] ----
    mem = mem_ref[...].astype(f32)                                  # (B, V)
    in_graph = mem > 0.0
    B = mem.shape[0]
    D = feat.shape[1]

    wlh = ls_wlh_ref[...]                                           # (4, D, D)  (w_ih[:D] + w_hh) per gate
    wr = ls_wr_ref[...]                                             # (4, D, D)  w_ih[D:] per gate
    b = ls_b_ref[...]                                               # (4, D)     b_ih + b_hh

    lh = jnp.zeros((B, D), f32)
    lc = jnp.zeros((B, D), f32)
    r_att = jnp.zeros((B, D), f32)                                  # q_star == [lh, r_att], zero at t=0

    for _ in range(set2set_iters):
        # LSTM cell on q_star = [lh, r_att]; lh-path input & hidden weights pre-summed.
        def gate(g):
            return (jnp.dot(lh, wlh[g], preferred_element_type=f32)
                    + jnp.dot(r_att, wr[g], preferred_element_type=f32)
                    + b[g:g + 1])

        i_g = jax.nn.sigmoid(gate(0))
        f_g = jax.nn.sigmoid(gate(1))
        g_g = jnp.tanh(gate(2))
        o_g = jax.nn.sigmoid(gate(3))
        lc = f_g * lc + i_g * g_g
        lh = o_g * jnp.tanh(lc)

        # per-graph softmax attention + weighted node-feature sum
        scores = jax.lax.dot_general(lh, feat, (((1,), (1,)), ((), ())),
                                     preferred_element_type=f32)    # (B, V)
        e = jnp.where(in_graph, scores, jnp.float32(-1e30))
        seg_max = jnp.max(e, axis=1, keepdims=True)
        exp_e = jnp.where(in_graph, jnp.exp(e - seg_max), 0.0)
        denom = jnp.maximum(jnp.sum(exp_e, axis=1, keepdims=True), 1e-30)  # guard empty graphs
        alpha = exp_e * pl.reciprocal(denom, approx=True)           # EUP slot, nearly free
        r_att = jnp.dot(alpha, feat, preferred_element_type=f32)    # (B, D)

    lh_out_ref[...] = lh
    r_out_ref[...] = r_att


# ----------------------------------------------------------------------------
# Full MPNNMolEmbedder forward pass: 2 pallas_calls total.
# ----------------------------------------------------------------------------
def mpnn_mol_embedder(params, node_x, edge_x, src_onehot, dst_scatter, member,
                      num_mp_steps=3, set2set_iters=3):
    D = params["proj_w"].shape[1]
    V = node_x.shape[0]
    E = edge_x.shape[0]
    B = member.shape[0]

    # ---- edge network (once; edge feats are step-invariant) ----
    ew = pl.pallas_call(
        _edge_net_kernel,
        out_shape=jax.ShapeDtypeStruct((E, D * D), jnp.float32),
        in_specs=_vmem_specs(5),
        out_specs=_vmem_spec(),
    )(edge_x, params["en_w1"], params["en_b1"].reshape(1, -1),
      params["en_w2"], params["en_b2"].reshape(1, -1))
    w_edges = ew.reshape(E, D, D)                                   # free HBM view change

    # ---- pack GRU gate weights: (D, 3D) -> (3, D, D) [r, z, n] ----
    gp = params["gru"]
    gru_wi = jnp.stack([gp["w_ih"][:, g * D:(g + 1) * D] for g in range(3)])
    gru_wh = jnp.stack([gp["w_hh"][:, g * D:(g + 1) * D] for g in range(3)])
    gru_bi = gp["b_ih"].reshape(3, D)
    gru_bh = gp["b_hh"].reshape(3, D)

    # ---- pack LSTM gate weights [i, f, g, o]; q_star[:, :D] == LSTM hidden h, so the
    #      lh-path input weights and the hidden weights are summed ahead of time ----
    lp = params["lstm"]
    wi, wh = lp["w_ih"], lp["w_hh"]
    ls_wlh = jnp.stack([wi[:D, g * D:(g + 1) * D] + wh[:, g * D:(g + 1) * D]
                        for g in range(4)])
    ls_wr = jnp.stack([wi[D:, g * D:(g + 1) * D] for g in range(4)])
    ls_b = (lp["b_ih"] + lp["b_hh"]).reshape(4, D)

    # 0/1 structural matrices -> bf16 (exactly representable; halves their DMA)
    src_bf = src_onehot.astype(jnp.bfloat16)
    dstT_bf = dst_scatter.astype(jnp.bfloat16)
    mem_bf = member.astype(jnp.bfloat16)

    # ---- fused MPNNGNN + Set2Set ----
    lh, r = pl.pallas_call(
        functools.partial(_mpnn_fused_kernel,
                          num_mp_steps=num_mp_steps, set2set_iters=set2set_iters),
        out_shape=(jax.ShapeDtypeStruct((B, D), jnp.float32),
                   jax.ShapeDtypeStruct((B, D), jnp.float32)),
        in_specs=_vmem_specs(15),
        out_specs=(_vmem_spec(), _vmem_spec()),
    )(node_x, params["proj_w"], params["proj_b"].reshape(1, -1), w_edges,
      src_bf, dstT_bf, params["nnconv_b"].reshape(1, -1),
      gru_wi, gru_wh, gru_bi, gru_bh,
      mem_bf, ls_wlh, ls_wr, ls_b)

    return jnp.concatenate([lh, r], axis=-1)                        # q_star (B, 2D)


# ----------------------------------------------------------------------------
# Pure-JAX reference (same math) for a sanity check.
# ----------------------------------------------------------------------------
def reference(params, node_x, edge_x, src_onehot, dst_scatter, member,
              num_mp_steps=3, set2set_iters=3):
    D = params["proj_w"].shape[1]
    h = jnp.maximum(node_x @ params["proj_w"] + params["proj_b"], 0.0)
    hidden = h
    ew = jnp.maximum(edge_x @ params["en_w1"] + params["en_b1"], 0.0)
    ew = ew @ params["en_w2"] + params["en_b2"]
    w_edges = ew.reshape(-1, D, D)
    gp = params["gru"]
    for _ in range(num_mp_steps):
        h_src = src_onehot @ h
        msgs = jnp.einsum("ed,edk->ek", h_src, w_edges)
        m = jnp.maximum(dst_scatter @ msgs + params["nnconv_b"], 0.0)
        gi = m @ gp["w_ih"] + gp["b_ih"]
        gh = hidden @ gp["w_hh"] + gp["b_hh"]
        r = jax.nn.sigmoid(gi[:, :D] + gh[:, :D])
        z = jax.nn.sigmoid(gi[:, D:2 * D] + gh[:, D:2 * D])
        n = jnp.tanh(gi[:, 2 * D:] + r * gh[:, 2 * D:])
        h = (1 - z) * n + z * hidden
        hidden = h
    feat = h
    B = member.shape[0]
    lp = params["lstm"]
    q_star = jnp.zeros((B, 2 * D))
    lh = jnp.zeros((B, D))
    lc = jnp.zeros((B, D))
    for _ in range(set2set_iters):
        g = q_star @ lp["w_ih"] + lp["b_ih"] + lh @ lp["w_hh"] + lp["b_hh"]
        i = jax.nn.sigmoid(g[:, :D])
        f = jax.nn.sigmoid(g[:, D:2 * D])
        gg = jnp.tanh(g[:, 2 * D:3 * D])
        o = jax.nn.sigmoid(g[:, 3 * D:])
        lc = f * lc + i * gg
        lh = o * jnp.tanh(lc)
        scores = lh @ feat.T
        e = jnp.where(member > 0, scores, -1e30)
        seg_max = jnp.max(e, axis=1, keepdims=True)
        exp_e = jnp.where(member > 0, jnp.exp(e - seg_max), 0.0)
        alpha = exp_e / jnp.sum(exp_e, axis=1, keepdims=True)
        r = alpha @ feat
        q_star = jnp.concatenate([lh, r], axis=-1)
    return q_star


def init_params(key, f_node, f_edge, d, e_hidden):
    ks = jax.random.split(key, 16)
    scale = 0.1

    def rn(k, shape):
        return (scale * jax.random.normal(k, shape)).astype(jnp.float32)

    return {
        "proj_w": rn(ks[0], (f_node, d)), "proj_b": rn(ks[1], (d,)),
        "en_w1": rn(ks[2], (f_edge, e_hidden)), "en_b1": rn(ks[3], (e_hidden,)),
        "en_w2": rn(ks[4], (e_hidden, d * d)), "en_b2": rn(ks[5], (d * d,)),
        "nnconv_b": rn(ks[6], (d,)),
        "gru": {"w_ih": rn(ks[7], (d, 3 * d)), "w_hh": rn(ks[8], (d, 3 * d)),
                "b_ih": rn(ks[9], (3 * d,)), "b_hh": rn(ks[10], (3 * d,))},
        "lstm": {"w_ih": rn(ks[11], (2 * d, 4 * d)), "w_hh": rn(ks[12], (d, 4 * d)),
                 "b_ih": rn(ks[13], (4 * d,)), "b_hh": rn(ks[14], (4 * d,))},
    }


if __name__ == "__main__":
    # Small synthetic batched graph: B=2 molecules, 5 + 3 atoms, bidirected bonds.
    F_NODE, F_EDGE, D, E_HIDDEN = 16, 8, 32, 32
    V, E, B = 8, 12, 2
    src = jnp.array([0, 1, 1, 2, 2, 3, 3, 4, 5, 6, 6, 7], dtype=jnp.int32)
    dst = jnp.array([1, 0, 2, 1, 3, 2, 4, 3, 6, 5, 7, 6], dtype=jnp.int32)
    graph_id = jnp.array([0, 0, 0, 0, 0, 1, 1, 1], dtype=jnp.int32)

    src_onehot = jax.nn.one_hot(src, V, dtype=jnp.float32)          # (E, V)
    dst_scatter = jax.nn.one_hot(dst, V, dtype=jnp.float32).T       # (V, E)
    member = jax.nn.one_hot(graph_id, B, dtype=jnp.float32).T       # (B, V)

    key = jax.random.PRNGKey(0)
    k_node, k_edge, k_param = jax.random.split(key, 3)
    node_x = jax.random.normal(k_node, (V, F_NODE), dtype=jnp.float32)
    edge_x = jax.random.normal(k_edge, (E, F_EDGE), dtype=jnp.float32)
    params = init_params(k_param, F_NODE, F_EDGE, D, E_HIDDEN)

    fwd = jax.jit(mpnn_mol_embedder)
    out = fwd(params, node_x, edge_x, src_onehot, dst_scatter, member)
    out = jax.block_until_ready(out)
    assert out.shape == (B, 2 * D), out.shape

    ref = jax.block_until_ready(
        reference(params, node_x, edge_x, src_onehot, dst_scatter, member))
    if not jnp.allclose(out, ref, atol=5e-2, rtol=5e-2):
        raise AssertionError("Pallas output does not match JAX reference")

    print("KERNEL_OK")
</pallas_src>

<mosaic_0001>
module attributes {stable_mosaic.version = 11 : i64} {
  func.func @_edge_net_kernel(%arg0: memref<12x8xf32, #tpu.memory_space<vmem>>, %arg1: memref<8x32xf32, #tpu.memory_space<vmem>>, %arg2: memref<1x32xf32, #tpu.memory_space<vmem>>, %arg3: memref<32x1024xf32, #tpu.memory_space<vmem>>, %arg4: memref<1x1024xf32, #tpu.memory_space<vmem>>, %arg5: memref<12x1024xf32, #tpu.memory_space<vmem>>) attributes {dimension_semantics = [], scalar_prefetch = 0 : i64, scratch_operands = 0 : i64, tpu.core_type = #tpu.core_type<tc>} {
    %c0 = arith.constant 0 : index
    %c0_0 = arith.constant 0 : index
    %0 = vector.load %arg0[%c0, %c0_0] : memref<12x8xf32, #tpu.memory_space<vmem>>, vector<12x8xf32>
    %c0_1 = arith.constant 0 : index
    %c0_2 = arith.constant 0 : index
    %1 = vector.load %arg1[%c0_1, %c0_2] : memref<8x32xf32, #tpu.memory_space<vmem>>, vector<8x32xf32>
    %cst = arith.constant dense<0.000000e+00> : vector<12x32xf32>
    %2 = tpu.matmul %0, %1, %cst {dimension_numbers = #tpu.dot_dimension_numbers<[1], [0], [0], [1], [0, 0, 1, 1], [], []>} : vector<12x8xf32>, vector<8x32xf32>, vector<12x32xf32> -> vector<12x32xf32>
    %c0_3 = arith.constant 0 : index
    %c0_4 = arith.constant 0 : index
    %3 = vector.load %arg2[%c0_3, %c0_4] : memref<1x32xf32, #tpu.memory_space<vmem>>, vector<1x32xf32>
    %4 = vector.broadcast %3 : vector<1x32xf32> to vector<12x32xf32>
    %5 = arith.addf %2, %4 : vector<12x32xf32>
    %cst_5 = arith.constant 0.000000e+00 : f32
    %6 = vector.broadcast %cst_5 : f32 to vector<12x32xf32>
    %7 = arith.maximumf %5, %6 : vector<12x32xf32>
    %c0_6 = arith.constant 0 : index
    %c0_7 = arith.constant 0 : index
    %8 = vector.load %arg3[%c0_6, %c0_7] : memref<32x1024xf32, #tpu.memory_space<vmem>>, vector<32x1024xf32>
    %cst_8 = arith.constant dense<0.000000e+00> : vector<12x1024xf32>
    %9 = tpu.matmul %7, %8, %cst_8 {dimension_numbers = #tpu.dot_dimension_numbers<[1], [0], [0], [1], [0, 0, 1, 1], [], []>} : vector<12x32xf32>, vector<32x1024xf32>, vector<12x1024xf32> -> vector<12x1024xf32>
    %c0_9 = arith.constant 0 : index
    %c0_10 = arith.constant 0 : index
    %10 = vector.load %arg4[%c0_9, %c0_10] : memref<1x1024xf32, #tpu.memory_space<vmem>>, vector<1x1024xf32>
    %11 = vector.broadcast %10 : vector<1x1024xf32> to vector<12x1024xf32>
    %12 = arith.addf %9, %11 : vector<12x1024xf32>
    %c0_11 = arith.constant 0 : index
    %c0_12 = arith.constant 0 : index
    %13 = vector.load %arg5[%c0_11, %c0_12] : memref<12x1024xf32, #tpu.memory_space<vmem>>, vector<12x1024xf32>
    tpu.vector_store %arg5[%c0_11, %c0_12], %12 {strides = array<i32>} : memref<12x1024xf32, #tpu.memory_space<vmem>>, vector<12x1024xf32>,
    return
  }
}

module attributes {stable_mosaic.version = 11 : i64} {
  func.func @_mpnn_fused_kernel(%arg0: memref<8x16xf32, #tpu.memory_space<vmem>>, %arg1: memref<16x32xf32, #tpu.memory_space<vmem>>, %arg2: memref<1x32xf32, #tpu.memory_space<vmem>>, %arg3: memref<12x32x32xf32, #tpu.memory_space<vmem>>, %arg4: memref<12x8xbf16, #tpu.memory_space<vmem>>, %arg5: memref<8x12xbf16, #tpu.memory_space<vmem>>, %arg6: memref<1x32xf32, #tpu.memory_space<vmem>>, %arg7: memref<3x32x32xf32, #tpu.memory_space<vmem>>, %arg8: memref<3x32x32xf32, #tpu.memory_space<vmem>>, %arg9: memref<3x32xf32, #tpu.memory_space<vmem>>, %arg10: memref<3x32xf32, #tpu.memory_space<vmem>>, %arg11: memref<2x8xbf16, #tpu.memory_space<vmem>>, %arg12: memref<4x32x32xf32, #tpu.memory_space<vmem>>, %arg13: memref<4x32x32xf32, #tpu.memory_space<vmem>>, %arg14: memref<4x32xf32, #tpu.memory_space<vmem>>, %arg15: memref<2x32xf32, #tpu.memory_space<vmem>>, %arg16: memref<2x32xf32, #tpu.memory_space<vmem>>) attributes {dimension_semantics = [], scalar_prefetch = 0 : i64, scratch_operands = 0 : i64, tpu.core_type = #tpu.core_type<tc>} {
    %c0 = arith.constant 0 : index
    %c0_0 = arith.constant 0 : index
    %0 = vector.load %arg0[%c0, %c0_0] : memref<8x16xf32, #tpu.memory_space<vmem>>, vector<8x16xf32>
    %c0_1 = arith.constant 0 : index
    %c0_2 = arith.constant 0 : index
    %1 = vector.load %arg1[%c0_1, %c0_2] : memref<16x32xf32, #tpu.memory_space<vmem>>, vector<16x32xf32>
    %cst = arith.constant dense<0.000000e+00> : vector<8x32xf32>
    %2 = tpu.matmul %0, %1, %cst {dimension_numbers = #tpu.dot_dimension_numbers<[1], [0], [0], [1], [0, 0, 1, 1], [], []>} : vector<8x16xf32>, vector<16x32xf32>, vector<8x32xf32> -> vector<8x32xf32>
    %c0_3 = arith.constant 0 : index
    %c0_4 = arith.constant 0 : index
    %3 = vector.load %arg2[%c0_3, %c0_4] : memref<1x32xf32, #tpu.memory_space<vmem>>, vector<1x32xf32>
    %4 = vector.broadcast %3 : vector<1x32xf32> to vector<8x32xf32>
    %5 = arith.addf %2, %4 : vector<8x32xf32>
    %cst_5 = arith.constant 0.000000e+00 : f32
    %6 = vector.broadcast %cst_5 : f32 to vector<8x32xf32>
    %7 = arith.maximumf %5, %6 : vector<8x32xf32>
    %c0_6 = arith.constant 0 : index
    %c0_7 = arith.constant 0 : index
    %c0_8 = arith.constant 0 : index
    %8 = vector.load %arg3[%c0_6, %c0_7, %c0_8] : memref<12x32x32xf32, #tpu.memory_space<vmem>>, vector<12x32x32xf32>
    %c0_9 = arith.constant 0 : index
    %c0_10 = arith.constant 0 : index
    %9 = vector.load %arg4[%c0_9, %c0_10] : memref<12x8xbf16, #tpu.memory_space<vmem>>, vector<12x8xbf16>
    %10 = arith.extf %9 : vector<12x8xbf16> to vector<12x8xf32>
    %c0_11 = arith.constant 0 : index
    %c0_12 = arith.constant 0 : index
    %11 = vector.load %arg5[%c0_11, %c0_12] : memref<8x12xbf16, #tpu.memory_space<vmem>>, vector<8x12xbf16>
    %12 = arith.extf %11 : vector<8x12xbf16> to vector<8x12xf32>
    %c0_13 = arith.constant 0 : index
    %c0_14 = arith.constant 0 : index
    %13 = vector.load %arg6[%c0_13, %c0_14] : memref<1x32xf32, #tpu.memory_space<vmem>>, vector<1x32xf32>
    %c0_15 = arith.constant 0 : index
    %c0_16 = arith.constant 0 : index
    %c0_17 = arith.constant 0 : index
    %14 = vector.load %arg7[%c0_15, %c0_16, %c0_17] : memref<3x32x32xf32, #tpu.memory_space<vmem>>, vector<3x32x32xf32>
    %c0_18 = arith.constant 0 : index
    %c0_19 = arith.constant 0 : index
    %c0_20 = arith.constant 0 : index
    %15 = vector.load %arg8[%c0_18, %c0_19, %c0_20] : memref<3x32x32xf32, #tpu.memory_space<vmem>>, vector<3x32x32xf32>
    %c0_21 = arith.constant 0 : index
    %c0_22 = arith.constant 0 : index
    %16 = vector.load %arg9[%c0_21, %c0_22] : memref<3x32xf32, #tpu.memory_space<vmem>>, vector<3x32xf32>
    %c0_23 = arith.constant 0 : index
    %c0_24 = arith.constant 0 : index
    %17 = vector.load %arg10[%c0_23, %c0_24] : memref<3x32xf32, #tpu.memory_space<vmem>>, vector<3x32xf32>
    %cst_25 = arith.constant dense<0.000000e+00> : vector<12x32xf32>
    %18 = tpu.matmul %10, %7, %cst_25 {dimension_numbers = #tpu.dot_dimension_numbers<[1], [0], [0], [1], [0, 0, 1, 1], [], []>} : vector<12x8xf32>, vector<8x32xf32>, vector<12x32xf32> -> vector<12x32xf32>
    %19 = vector.shape_cast %18 : vector<12x32xf32> to vector<12x32x1xf32>
    %20 = vector.broadcast %19 : vector<12x32x1xf32> to vector<12x32x32xf32>
    %21 = arith.mulf %20, %8 : vector<12x32x32xf32>
    %cst_26 = arith.constant dense<0.000000e+00> : vector<12x32xf32>
    %22 = vector.multi_reduction <add>, %21, %cst_26 [1] : vector<12x32x32xf32> to vector<12x32xf32>
    %cst_27 = arith.constant dense<0.000000e+00> : vector<8x32xf32>
    %23 = tpu.matmul %12, %22, %cst_27 {dimension_numbers = #tpu.dot_dimension_numbers<[1], [0], [0], [1], [0, 0, 1, 1], [], []>} : vector<8x12xf32>, vector<12x32xf32>, vector<8x32xf32> -> vector<8x32xf32>
    %24 = vector.broadcast %13 : vector<1x32xf32> to vector<8x32xf32>
    %25 = arith.addf %23, %24 : vector<8x32xf32>
    %cst_28 = arith.constant 0.000000e+00 : f32
    %26 = vector.broadcast %cst_28 : f32 to vector<8x32xf32>
    %27 = arith.maximumf %25, %26 : vector<8x32xf32>
    %28 = vector.extract_strided_slice %14 {offsets = [0, 0, 0], sizes = [1, 32, 32], strides = [1, 1, 1]} : vector<3x32x32xf32> to vector<1x32x32xf32>
    %29 = vector.shape_cast %28 : vector<1x32x32xf32> to vector<32x32xf32>
    %cst_29 = arith.constant dense<0.000000e+00> : vector<8x32xf32>
    %30 = tpu.matmul %27, %29, %cst_29 {dimension_numbers = #tpu.dot_dimension_numbers<[1], [0], [0], [1], [0, 0, 1, 1], [], []>} : vector<8x32xf32>, vector<32x32xf32>, vector<8x32xf32> -> vector<8x32xf32>
    %31 = vector.extract_strided_slice %16 {offsets = [0, 0], sizes = [1, 32], strides = [1, 1]} : vector<3x32xf32> to vector<1x32xf32>
    %32 = vector.broadcast %31 : vector<1x32xf32> to vector<8x32xf32>
    %33 = arith.addf %30, %32 : vector<8x32xf32>
    %34 = vector.extract_strided_slice %15 {offsets = [0, 0, 0], sizes = [1, 32, 32], strides = [1, 1, 1]} : vector<3x32x32xf32> to vector<1x32x32xf32>
    %35 = vector.shape_cast %34 : vector<1x32x32xf32> to vector<32x32xf32>
    %cst_30 = arith.constant dense<0.000000e+00> : vector<8x32xf32>
    %36 = tpu.matmul %7, %35, %cst_30 {dimension_numbers = #tpu.dot_dimension_numbers<[1], [0], [0], [1], [0, 0, 1, 1], [], []>} : vector<8x32xf32>, vector<32x32xf32>, vector<8x32xf32> -> vector<8x32xf32>
    %37 = arith.addf %33, %36 : vector<8x32xf32>
    %38 = vector.extract_strided_slice %17 {offsets = [0, 0], sizes = [1, 32], strides = [1, 1]} : vector<3x32xf32> to vector<1x32xf32>
    %39 = vector.broadcast %38 : vector<1x32xf32> to vector<8x32xf32>
    %40 = arith.addf %37, %39 : vector<8x32xf32>
    %41 = arith.negf %40 : vector<8x32xf32>
    %42 = math.exp %41 : vector<8x32xf32>
    %cst_31 = arith.constant 1.000000e+00 : f32
    %43 = vector.broadcast %cst_31 : f32 to vector<8x32xf32>
    %44 = arith.addf %43, %42 : vector<8x32xf32>
    %45 = arith.divf %43, %44 : vector<8x32xf32>
    %46 = vector.extract_strided_slice %14 {offsets = [1, 0, 0], sizes = [1, 32, 32], strides = [1, 1, 1]} : vector<3x32x32xf32> to vector<1x32x32xf32>
    %47 = vector.shape_cast %46 : vector<1x32x32xf32> to vector<32x32xf32>
    %cst_32 = arith.constant dense<0.000000e+00> : vector<8x32xf32>
    %48 = tpu.matmul %27, %47, %cst_32 {dimension_numbers = #tpu.dot_dimension_numbers<[1], [0], [0], [1], [0, 0, 1, 1], [], []>} : vector<8x32xf32>, vector<32x32xf32>, vector<8x32xf32> -> vector<8x32xf32>
    %49 = vector.extract_strided_slice %16 {offsets = [1, 0], sizes = [1, 32], strides = [1, 1]} : vector<3x32xf32> to vector<1x32xf32>
    %50 = vector.broadcast %49 : vector<1x32xf32> to vector<8x32xf32>
    %51 = arith.addf %48, %50 : vector<8x32xf32>
    %52 = vector.extract_strided_slice %15 {offsets = [1, 0, 0], sizes = [1, 32, 32], strides = [1, 1, 1]} : vector<3x32x32xf32> to vector<1x32x32xf32>
    %53 = vector.shape_cast %52 : vector<1x32x32xf32> to vector<32x32xf32>
    %cst_33 = arith.constant dense<0.000000e+00> : vector<8x32xf32>
    %54 = tpu.matmul %7, %53, %cst_33 {dimension_numbers = #tpu.dot_dimension_numbers<[1], [0], [0], [1], [0, 0, 1, 1], [], []>} : vector<8x32xf32>, vector<32x32xf32>, vector<8x32xf32> -> vector<8x32xf32>
    %55 = arith.addf %51, %54 : vector<8x32xf32>
    %56 = vector.extract_strided_slice %17 {offsets = [1, 0], sizes = [1, 32], strides = [1, 1]} : vector<3x32xf32> to vector<1x32xf32>
    %57 = vector.broadcast %56 : vector<1x32xf32> to vector<8x32xf32>
    %58 = arith.addf %55, %57 : vector<8x32xf32>
    %59 = arith.negf %58 : vector<8x32xf32>
    %60 = math.exp %59 : vector<8x32xf32>
    %cst_34 = arith.constant 1.000000e+00 : f32
    %61 = vector.broadcast %cst_34 : f32 to vector<8x32xf32>
    %62 = arith.addf %61, %60 : vector<8x32xf32>
    %63 = arith.divf %61, %62 : vector<8x32xf32>
    %64 = vector.extract_strided_slice %14 {offsets = [2, 0, 0], sizes = [1, 32, 32], strides = [1, 1, 1]} : vector<3x32x32xf32> to vector<1x32x32xf32>
    %65 = vector.shape_cast %64 : vector<1x32x32xf32> to vector<32x32xf32>
    %cst_35 = arith.constant dense<0.000000e+00> : vector<8x32xf32>
    %66 = tpu.matmul %27, %65, %cst_35 {dimension_numbers = #tpu.dot_dimension_numbers<[1], [0], [0], [1], [0, 0, 1, 1], [], []>} : vector<8x32xf32>, vector<32x32xf32>, vector<8x32xf32> -> vector<8x32xf32>
    %67 = vector.extract_strided_slice %16 {offsets = [2, 0], sizes = [1, 32], strides = [1, 1]} : vector<3x32xf32> to vector<1x32xf32>
    %68 = vector.broadcast %67 : vector<1x32xf32> to vector<8x32xf32>
    %69 = arith.addf %66, %68 : vector<8x32xf32>
    %70 = vector.extract_strided_slice %15 {offsets = [2, 0, 0], sizes = [1, 32, 32], strides = [1, 1, 1]} : vector<3x32x32xf32> to vector<1x32x32xf32>
    %71 = vector.shape_cast %70 : vector<1x32x32xf32> to vector<32x32xf32>
    %cst_36 = arith.constant dense<0.000000e+00> : vector<8x32xf32>
    %72 = tpu.matmul %7, %71, %cst_36 {dimension_numbers = #tpu.dot_dimension_numbers<[1], [0], [0], [1], [0, 0, 1, 1], [], []>} : vector<8x32xf32>, vector<32x32xf32>, vector<8x32xf32> -> vector<8x32xf32>
    %73 = vector.extract_strided_slice %17 {offsets = [2, 0], sizes = [1, 32], strides = [1, 1]} : vector<3x32xf32> to vector<1x32xf32>
    %74 = vector.broadcast %73 : vector<1x32xf32> to vector<8x32xf32>
    %75 = arith.addf %72, %74 : vector<8x32xf32>
    %76 = arith.mulf %45, %75 : vector<8x32xf32>
    %77 = arith.addf %69, %76 : vector<8x32xf32>
    %78 = math.tanh %77 : vector<8x32xf32>
    %cst_37 = arith.constant 1.000000e+00 : f32
    %79 = vector.broadcast %cst_37 : f32 to vector<8x32xf32>
    %80 = arith.subf %79, %63 : vector<8x32xf32>
    %81 = arith.mulf %80, %78 : vector<8x32xf32>
    %82 = arith.mulf %63, %7 : vector<8x32xf32>
    %83 = arith.addf %81, %82 : vector<8x32xf32>
    %cst_38 = arith.constant dense<0.000000e+00> : vector<12x32xf32>
    %84 = tpu.matmul %10, %83, %cst_38 {dimension_numbers = #tpu.dot_dimension_numbers<[1], [0], [0], [1], [0, 0, 1, 1], [], []>} : vector<12x8xf32>, vector<8x32xf32>, vector<12x32xf32> -> vector<12x32xf32>
    %85 = vector.shape_cast %84 : vector<12x32xf32> to vector<12x32x1xf32>
    %86 = vector.broadcast %85 : vector<12x32x1xf32> to vector<12x32x32xf32>
    %87 = arith.mulf %86, %8 : vector<12x32x32xf32>
    %cst_39 = arith.constant dense<0.000000e+00> : vector<12x32xf32>
    %88 = vector.multi_reduction <add>, %87, %cst_39 [1] : vector<12x32x32xf32> to vector<12x32xf32>
    %cst_40 = arith.constant dense<0.000000e+00> : vector<8x32xf32>
    %89 = tpu.matmul %12, %88, %cst_40 {dimension_numbers = #tpu.dot_dimension_numbers<[1], [0], [0], [1], [0, 0, 1, 1], [], []>} : vector<8x12xf32>, vector<12x32xf32>, vector<8x32xf32> -> vector<8x32xf32>
    %90 = vector.broadcast %13 : vector<1x32xf32> to vector<8x32xf32>
    %91 = arith.addf %89, %90 : vector<8x32xf32>
    %cst_41 = arith.constant 0.000000e+00 : f32
    %92 = vector.broadcast %cst_41 : f32 to vector<8x32xf32>
    %93 = arith.maximumf %91, %92 : vector<8x32xf32>
    %94 = vector.extract_strided_slice %14 {offsets = [0, 0, 0], sizes = [1, 32, 32], strides = [1, 1, 1]} : vector<3x32x32xf32> to vector<1x32x32xf32>
    %95 = vector.shape_cast %94 : vector<1x32x32xf32> to vector<32x32xf32>
    %cst_42 = arith.constant dense<0.000000e+00> : vector<8x32xf32>
    %96 = tpu.matmul %93, %95, %cst_42 {dimension_numbers = #tpu.dot_dimension_numbers<[1], [0], [0], [1], [0, 0, 1, 1], [], []>} : vector<8x32xf32>, vector<32x32xf32>, vector<8x32xf32> -> vector<8x32xf32>
    %97 = vector.extract_strided_slice %16 {offsets = [0, 0], sizes = [1, 32], strides = [1, 1]} : vector<3x32xf32> to vector<1x32xf32>
    %98 = vector.broadcast %97 : vector<1x32xf32> to vector<8x32xf32>
    %99 = arith.addf %96, %98 : vector<8x32xf32>
    %100 = vector.extract_strided_slice %15 {offsets = [0, 0, 0], sizes = [1, 32, 32], strides = [1, 1, 1]} : vector<3x32x32xf32> to vector<1x32x32xf32>
    %101 = vector.shape_cast %100 : vector<1x32x32xf32> to vector<32x32xf32>
    %cst_43 = arith.constant dense<0.000000e+00> : vector<8x32xf32>
    %102 = tpu.matmul %83, %101, %cst_43 {dimension_numbers = #tpu.dot_dimension_numbers<[1], [0], [0], [1], [0, 0, 1, 1], [], []>} : vector<8x32xf32>, vector<32x32xf32>, vector<8x32xf32> -> vector<8x32xf32>
    %103 = arith.addf %99, %102 : vector<8x32xf32>
    %104 = vector.extract_strided_slice %17 {offsets = [0, 0], sizes = [1, 32], strides = [1, 1]} : vector<3x32xf32> to vector<1x32xf32>
    %105 = vector.broadcast %104 : vector<1x32xf32> to vector<8x32xf32>
    %106 = arith.addf %103, %105 : vector<8x32xf32>
    %107 = arith.negf %106 : vector<8x32xf32>
    %108 = math.exp %107 : vector<8x32xf32>
    %cst_44 = arith.constant 1.000000e+00 : f32
    %109 = vector.broadcast %cst_44 : f32 to vector<8x32xf32>
    %110 = arith.addf %109, %108 : vector<8x32xf32>
    %111 = arith.divf %109, %110 : vector<8x32xf32>
    %112 = vector.extract_strided_slice %14 {offsets = [1, 0, 0], sizes = [1, 32, 32], strides = [1, 1, 1]} : vector<3x32x32xf32> to vector<1x32x32xf32>
    %113 = vector.shape_cast %112 : vector<1x32x32xf32> to vector<32x32xf32>
    %cst_45 = arith.constant dense<0.000000e+00> : vector<8x32xf32>
    %114 = tpu.matmul %93, %113, %cst_45 {dimension_numbers = #tpu.dot_dimension_numbers<[1], [0], [0], [1], [0, 0, 1, 1], [], []>} : vector<8x32xf32>, vector<32x32xf32>, vector<8x32xf32> -> vector<8x32xf32>
    %115 = vector.extract_strided_slice %16 {offsets = [1, 0], sizes = [1, 32], strides = [1, 1]} : vector<3x32xf32> to vector<1x32xf32>
    %116 = vector.broadcast %115 : vector<1x32xf32> to vector<8x32xf32>
    %117 = arith.addf %114, %116 : vector<8x32xf32>
    %118 = vector.extract_strided_slice %15 {offsets = [1, 0, 0], sizes = [1, 32, 32], strides = [1, 1, 1]} : vector<3x32x32xf32> to vector<1x32x32xf32>
    %119 = vector.shape_cast %118 : vector<1x32x32xf32> to vector<32x32xf32>
    %cst_46 = arith.constant dense<0.000000e+00> : vector<8x32xf32>
    %120 = tpu.matmul %83, %119, %cst_46 {dimension_numbers = #tpu.dot_dimension_numbers<[1], [0], [0], [1], [0, 0, 1, 1], [], []>} : vector<8x32xf32>, vector<32x32xf32>, vector<8x32xf32> -> vector<8x32xf32>
    %121 = arith.addf %117, %120 : vector<8x32xf32>
    %122 = vector.extract_strided_slice %17 {offsets = [1, 0], sizes = [1, 32], strides = [1, 1]} : vector<3x32xf32> to vector<1x32xf32>
    %123 = vector.broadcast %122 : vector<1x32xf32> to vector<8x32xf32>
    %124 = arith.addf %121, %123 : vector<8x32xf32>
    %125 = arith.negf %124 : vector<8x32xf32>
    %126 = math.exp %125 : vector<8x32xf32>
    %cst_47 = arith.constant 1.000000e+00 : f32
    %127 = vector.broadcast %cst_47 : f32 to vector<8x32xf32>
    %128 = arith.addf %127, %126 : vector<8x32xf32>
    %129 = arith.divf %127, %128 : vector<8x32xf32>
    %130 = vector.extract_strided_slice %14 {offsets = [2, 0, 0], sizes = [1, 32, 32], strides = [1, 1, 1]} : vector<3x32x32xf32> to vector<1x32x32xf32>
    %131 = vector.shape_cast %130 : vector<1x32x32xf32> to vector<32x32xf32>
    %cst_48 = arith.constant dense<0.000000e+00> : vector<8x32xf32>
    %132 = tpu.matmul %93, %131, %cst_48 {dimension_numbers = #tpu.dot_dimension_numbers<[1], [0], [0], [1], [0, 0, 1, 1], [], []>} : vector<8x32xf32>, vector<32x32xf32>, vector<8x32xf32> -> vector<8x32xf32>
    %133 = vector.extract_strided_slice %16 {offsets = [2, 0], sizes = [1, 32], strides = [1, 1]} : vector<3x32xf32> to vector<1x32xf32>
    %134 = vector.broadcast %133 : vector<1x32xf32> to vector<8x32xf32>
    %135 = arith.addf %132, %134 : vector<8x32xf32>
    %136 = vector.extract_strided_slice %15 {offsets = [2, 0, 0], sizes = [1, 32, 32], strides = [1, 1, 1]} : vector<3x32x32xf32> to vector<1x32x32xf32>
    %137 = vector.shape_cast %136 : vector<1x32x32xf32> to vector<32x32xf32>
    %cst_49 = arith.constant dense<0.000000e+00> : vector<8x32xf32>
    %138 = tpu.matmul %83, %137, %cst_49 {dimension_numbers = #tpu.dot_dimension_numbers<[1], [0], [0], [1], [0, 0, 1, 1], [], []>} : vector<8x32xf32>, vector<32x32xf32>, vector<8x32xf32> -> vector<8x32xf32>
    %139 = vector.extract_strided_slice %17 {offsets = [2, 0], sizes = [1, 32], strides = [1, 1]} : vector<3x32xf32> to vector<1x32xf32>
    %140 = vector.broadcast %139 : vector<1x32xf32> to vector<8x32xf32>
    %141 = arith.addf %138, %140 : vector<8x32xf32>
    %142 = arith.mulf %111, %141 : vector<8x32xf32>
    %143 = arith.addf %135, %142 : vector<8x32xf32>
    %144 = math.tanh %143 : vector<8x32xf32>
    %cst_50 = arith.constant 1.000000e+00 : f32
    %145 = vector.broadcast %cst_50 : f32 to vector<8x32xf32>
    %146 = arith.subf %145, %129 : vector<8x32xf32>
    %147 = arith.mulf %146, %144 : vector<8x32xf32>
    %148 = arith.mulf %129, %83 : vector<8x32xf32>
    %149 = arith.addf %147, %148 : vector<8x32xf32>
    %cst_51 = arith.constant dense<0.000000e+00> : vector<12x32xf32>
    %150 = tpu.matmul %10, %149, %cst_51 {dimension_numbers = #tpu.dot_dimension_numbers<[1], [0], [0], [1], [0, 0, 1, 1], [], []>} : vector<12x8xf32>, vector<8x32xf32>, vector<12x32xf32> -> vector<12x32xf32>
    %151 = vector.shape_cast %150 : vector<12x32xf32> to vector<12x32x1xf32>
    %152 = vector.broadcast %151 : vector<12x32x1xf32> to vector<12x32x32xf32>
    %153 = arith.mulf %152, %8 : vector<12x32x32xf32>
    %cst_52 = arith.constant dense<0.000000e+00> : vector<12x32xf32>
    %154 = vector.multi_reduction <add>, %153, %cst_52 [1] : vector<12x32x32xf32> to vector<12x32xf32>
    %cst_53 = arith.constant dense<0.000000e+00> : vector<8x32xf32>
    %155 = tpu.matmul %12, %154, %cst_53 {dimension_numbers = #tpu.dot_dimension_numbers<[1], [0], [0], [1], [0, 0, 1, 1], [], []>} : vector<8x12xf32>, vector<12x32xf32>, vector<8x32xf32> -> vector<8x32xf32>
    %156 = vector.broadcast %13 : vector<1x32xf32> to vector<8x32xf32>
    %157 = arith.addf %155, %156 : vector<8x32xf32>
    %cst_54 = arith.constant 0.000000e+00 : f32
    %158 = vector.broadcast %cst_54 : f32 to vector<8x32xf32>
    %159 = arith.maximumf %157, %158 : vector<8x32xf32>
    %160 = vector.extract_strided_slice %14 {offsets = [0, 0, 0], sizes = [1, 32, 32], strides = [1, 1, 1]} : vector<3x32x32xf32> to vector<1x32x32xf32>
    %161 = vector.shape_cast %160 : vector<1x32x32xf32> to vector<32x32xf32>
    %cst_55 = arith.constant dense<0.000000e+00> : vector<8x32xf32>
    %162 = tpu.matmul %159, %161, %cst_55 {dimension_numbers = #tpu.dot_dimension_numbers<[1], [0], [0], [1], [0, 0, 1, 1], [], []>} : vector<8x32xf32>, vector<32x32xf32>, vector<8x32xf32> -> vector<8x32xf32>
    %163 = vector.extract_strided_slice %16 {offsets = [0, 0], sizes = [1, 32], strides = [1, 1]} : vector<3x32xf32> to vector<1x32xf32>
    %164 = vector.broadcast %163 : vector<1x32xf32> to vector<8x32xf32>
    %165 = arith.addf %162, %164 : vector<8x32xf32>
    %166 = vector.extract_strided_slice %15 {offsets = [0, 0, 0], sizes = [1, 32, 32], strides = [1, 1, 1]} : vector<3x32x32xf32> to vector<1x32x32xf32>
    %167 = vector.shape_cast %166 : vector<1x32x32xf32> to vector<32x32xf32>
    %cst_56 = arith.constant dense<0.000000e+00> : vector<8x32xf32>
    %168 = tpu.matmul %149, %167, %cst_56 {dimension_numbers = #tpu.dot_dimension_numbers<[1], [0], [0], [1], [0, 0, 1, 1], [], []>} : vector<8x32xf32>, vector<32x32xf32>, vector<8x32xf32> -> vector<8x32xf32>
    %169 = arith.addf %165, %168 : vector<8x32xf32>
    %170 = vector.extract_strided_slice %17 {offsets = [0, 0], sizes = [1, 32], strides = [1, 1]} : vector<3x32xf32> to vector<1x32xf32>
    %171 = vector.broadcast %170 : vector<1x32xf32> to vector<8x32xf32>
    %172 = arith.addf %169, %171 : vector<8x32xf32>
    %173 = arith.negf %172 : vector<8x32xf32>
    %174 = math.exp %173 : vector<8x32xf32>
    %cst_57 = arith.constant 1.000000e+00 : f32
    %175 = vector.broadcast %cst_57 : f32 to vector<8x32xf32>
    %176 = arith.addf %175, %174 : vector<8x32xf32>
    %177 = arith.divf %175, %176 : vector<8x32xf32>
    %178 = vector.extract_strided_slice %14 {offsets = [1, 0, 0], sizes = [1, 32, 32], strides = [1, 1, 1]} : vector<3x32x32xf32> to vector<1x32x32xf32>
    %179 = vector.shape_cast %178 : vector<1x32x32xf32> to vector<32x32xf32>
    %cst_58 = arith.constant dense<0.000000e+00> : vector<8x32xf32>
    %180 = tpu.matmul %159, %179, %cst_58 {dimension_numbers = #tpu.dot_dimension_numbers<[1], [0], [0], [1], [0, 0, 1, 1], [], []>} : vector<8x32xf32>, vector<32x32xf32>, vector<8x32xf32> -> vector<8x32xf32>
    %181 = vector.extract_strided_slice %16 {offsets = [1, 0], sizes = [1, 32], strides = [1, 1]} : vector<3x32xf32> to vector<1x32xf32>
    %182 = vector.broadcast %181 : vector<1x32xf32> to vector<8x32xf32>
    %183 = arith.addf %180, %182 : vector<8x32xf32>
    %184 = vector.extract_strided_slice %15 {offsets = [1, 0, 0], sizes = [1, 32, 32], strides = [1, 1, 1]} : vector<3x32x32xf32> to vector<1x32x32xf32>
    %185 = vector.shape_cast %184 : vector<1x32x32xf32> to vector<32x32xf32>
    %cst_59 = arith.constant dense<0.000000e+00> : vector<8x32xf32>
    %186 = tpu.matmul %149, %185, %cst_59 {dimension_numbers = #tpu.dot_dimension_numbers<[1], [0], [0], [1], [0, 0, 1, 1], [], []>} : vector<8x32xf32>, vector<32x32xf32>, vector<8x32xf32> -> vector<8x32xf32>
    %187 = arith.addf %183, %186 : vector<8x32xf32>
    %188 = vector.extract_strided_slice %17 {offsets = [1, 0], sizes = [1, 32], strides = [1, 1]} : vector<3x32xf32> to vector<1x32xf32>
    %189 = vector.broadcast %188 : vector<1x32xf32> to vector<8x32xf32>
    %190 = arith.addf %187, %189 : vector<8x32xf32>
    %191 = arith.negf %190 : vector<8x32xf32>
    %192 = math.exp %191 : vector<8x32xf32>
    %cst_60 = arith.constant 1.000000e+00 : f32
    %193 = vector.broadcast %cst_60 : f32 to vector<8x32xf32>
    %194 = arith.addf %193, %192 : vector<8x32xf32>
    %195 = arith.divf %193, %194 : vector<8x32xf32>
    %196 = vector.extract_strided_slice %14 {offsets = [2, 0, 0], sizes = [1, 32, 32], strides = [1, 1, 1]} : vector<3x32x32xf32> to vector<1x32x32xf32>
    %197 = vector.shape_cast %196 : vector<1x32x32xf32> to vector<32x32xf32>
    %cst_61 = arith.constant dense<0.000000e+00> : vector<8x32xf32>
    %198 = tpu.matmul %159, %197, %cst_61 {dimension_numbers = #tpu.dot_dimension_numbers<[1], [0], [0], [1], [0, 0, 1, 1], [], []>} : vector<8x32xf32>, vector<32x32xf32>, vector<8x32xf32> -> vector<8x32xf32>
    %199 = vector.extract_strided_slice %16 {offsets = [2, 0], sizes = [1, 32], strides = [1, 1]} : vector<3x32xf32> to vector<1x32xf32>
    %200 = vector.broadcast %199 : vector<1x32xf32> to vector<8x32xf32>
    %201 = arith.addf %198, %200 : vector<8x32xf32>
    %202 = vector.extract_strided_slice %15 {offsets = [2, 0, 0], sizes = [1, 32, 32], strides = [1, 1, 1]} : vector<3x32x32xf32> to vector<1x32x32xf32>
    %203 = vector.shape_cast %202 : vector<1x32x32xf32> to vector<32x32xf32>
    %cst_62 = arith.constant dense<0.000000e+00> : vector<8x32xf32>
    %204 = tpu.matmul %149, %203, %cst_62 {dimension_numbers = #tpu.dot_dimension_numbers<[1], [0], [0], [1], [0, 0, 1, 1], [], []>} : vector<8x32xf32>, vector<32x32xf32>, vector<8x32xf32> -> vector<8x32xf32>
    %205 = vector.extract_strided_slice %17 {offsets = [2, 0], sizes = [1, 32], strides = [1, 1]} : vector<3x32xf32> to vector<1x32xf32>
    %206 = vector.broadcast %205 : vector<1x32xf32> to vector<8x32xf32>
    %207 = arith.addf %204, %206 : vector<8x32xf32>
    %208 = arith.mulf %177, %207 : vector<8x32xf32>
    %209 = arith.addf %201, %208 : vector<8x32xf32>
    %210 = math.tanh %209 : vector<8x32xf32>
    %cst_63 = arith.constant 1.000000e+00 : f32
    %211 = vector.broadcast %cst_63 : f32 to vector<8x32xf32>
    %212 = arith.subf %211, %195 : vector<8x32xf32>
    %213 = arith.mulf %212, %210 : vector<8x32xf32>
    %214 = arith.mulf %195, %149 : vector<8x32xf32>
    %215 = arith.addf %213, %214 : vector<8x32xf32>
    %c0_64 = arith.constant 0 : index
    %c0_65 = arith.constant 0 : index
    %216 = vector.load %arg11[%c0_64, %c0_65] : memref<2x8xbf16, #tpu.memory_space<vmem>>, vector<2x8xbf16>
    %217 = arith.extf %216 : vector<2x8xbf16> to vector<2x8xf32>
    %cst_66 = arith.constant 0.000000e+00 : f32
    %218 = vector.broadcast %cst_66 : f32 to vector<2x8xf32>
    %219 = arith.cmpf ogt, %217, %218 : vector<2x8xf32>
    %c0_67 = arith.constant 0 : index
    %c0_68 = arith.constant 0 : index
    %c0_69 = arith.constant 0 : index
    %220 = vector.load %arg12[%c0_67, %c0_68, %c0_69] : memref<4x32x32xf32, #tpu.memory_space<vmem>>, vector<4x32x32xf32>
    %c0_70 = arith.constant 0 : index
    %c0_71 = arith.constant 0 : index
    %c0_72 = arith.constant 0 : index
    %221 = vector.load %arg13[%c0_70, %c0_71, %c0_72] : memref<4x32x32xf32, #tpu.memory_space<vmem>>, vector<4x32x32xf32>
    %c0_73 = arith.constant 0 : index
    %c0_74 = arith.constant 0 : index
    %222 = vector.load %arg14[%c0_73, %c0_74] : memref<4x32xf32, #tpu.memory_space<vmem>>, vector<4x32xf32>
    %cst_75 = arith.constant 0.000000e+00 : f32
    %223 = vector.broadcast %cst_75 : f32 to vector<2x32xf32>
    %cst_76 = arith.constant 0.000000e+00 : f32
    %224 = vector.broadcast %cst_76 : f32 to vector<2x32xf32>
    %cst_77 = arith.constant 0.000000e+00 : f32
    %225 = vector.broadcast %cst_77 : f32 to vector<2x32xf32>
    %226 = vector.extract_strided_slice %220 {offsets = [0, 0, 0], sizes = [1, 32, 32], strides = [1, 1, 1]} : vector<4x32x32xf32> to vector<1x32x32xf32>
    %227 = vector.shape_cast %226 : vector<1x32x32xf32> to vector<32x32xf32>
    %cst_78 = arith.constant dense<0.000000e+00> : vector<2x32xf32>
    %228 = tpu.matmul %223, %227, %cst_78 {dimension_numbers = #tpu.dot_dimension_numbers<[1], [0], [0], [1], [0, 0, 1, 1], [], []>} : vector<2x32xf32>, vector<32x32xf32>, vector<2x32xf32> -> vector<2x32xf32>
    %229 = vector.extract_strided_slice %221 {offsets = [0, 0, 0], sizes = [1, 32, 32], strides = [1, 1, 1]} : vector<4x32x32xf32> to vector<1x32x32xf32>
    %230 = vector.shape_cast %229 : vector<1x32x32xf32> to vector<32x32xf32>
    %cst_79 = arith.constant dense<0.000000e+00> : vector<2x32xf32>
    %231 = tpu.matmul %225, %230, %cst_79 {dimension_numbers = #tpu.dot_dimension_numbers<[1], [0], [0], [1], [0, 0, 1, 1], [], []>} : vector<2x32xf32>, vector<32x32xf32>, vector<2x32xf32> -> vector<2x32xf32>
    %232 = arith.addf %228, %231 : vector<2x32xf32>
    %233 = vector.extract_strided_slice %222 {offsets = [0, 0], sizes = [1, 32], strides = [1, 1]} : vector<4x32xf32> to vector<1x32xf32>
    %234 = vector.broadcast %233 : vector<1x32xf32> to vector<2x32xf32>
    %235 = arith.addf %232, %234 : vector<2x32xf32>
    %236 = arith.negf %235 : vector<2x32xf32>
    %237 = math.exp %236 : vector<2x32xf32>
    %cst_80 = arith.constant 1.000000e+00 : f32
    %238 = vector.broadcast %cst_80 : f32 to vector<2x32xf32>
    %239 = arith.addf %238, %237 : vector<2x32xf32>
    %240 = arith.divf %238, %239 : vector<2x32xf32>
    %241 = vector.extract_strided_slice %220 {offsets = [1, 0, 0], sizes = [1, 32, 32], strides = [1, 1, 1]} : vector<4x32x32xf32> to vector<1x32x32xf32>
    %242 = vector.shape_cast %241 : vector<1x32x32xf32> to vector<32x32xf32>
    %cst_81 = arith.constant dense<0.000000e+00> : vector<2x32xf32>
    %243 = tpu.matmul %223, %242, %cst_81 {dimension_numbers = #tpu.dot_dimension_numbers<[1], [0], [0], [1], [0, 0, 1, 1], [], []>} : vector<2x32xf32>, vector<32x32xf32>, vector<2x32xf32> -> vector<2x32xf32>
    %244 = vector.extract_strided_slice %221 {offsets = [1, 0, 0], sizes = [1, 32, 32], strides = [1, 1, 1]} : vector<4x32x32xf32> to vector<1x32x32xf32>
    %245 = vector.shape_cast %244 : vector<1x32x32xf32> to vector<32x32xf32>
    %cst_82 = arith.constant dense<0.000000e+00> : vector<2x32xf32>
    %246 = tpu.matmul %225, %245, %cst_82 {dimension_numbers = #tpu.dot_dimension_numbers<[1], [0], [0], [1], [0, 0, 1, 1], [], []>} : vector<2x32xf32>, vector<32x32xf32>, vector<2x32xf32> -> vector<2x32xf32>
    %247 = arith.addf %243, %246 : vector<2x32xf32>
    %248 = vector.extract_strided_slice %222 {offsets = [1, 0], sizes = [1, 32], strides = [1, 1]} : vector<4x32xf32> to vector<1x32xf32>
    %249 = vector.broadcast %248 : vector<1x32xf32> to vector<2x32xf32>
    %250 = arith.addf %247, %249 : vector<2x32xf32>
    %251 = arith.negf %250 : vector<2x32xf32>
    %252 = math.exp %251 : vector<2x32xf32>
    %cst_83 = arith.constant 1.000000e+00 : f32
    %253 = vector.broadcast %cst_83 : f32 to vector<2x32xf32>
    %254 = arith.addf %253, %252 : vector<2x32xf32>
    %255 = arith.divf %253, %254 : vector<2x32xf32>
    %256 = vector.extract_strided_slice %220 {offsets = [2, 0, 0], sizes = [1, 32, 32], strides = [1, 1, 1]} : vector<4x32x32xf32> to vector<1x32x32xf32>
    %257 = vector.shape_cast %256 : vector<1x32x32xf32> to vector<32x32xf32>
    %cst_84 = arith.constant dense<0.000000e+00> : vector<2x32xf32>
    %258 = tpu.matmul %223, %257, %cst_84 {dimension_numbers = #tpu.dot_dimension_numbers<[1], [0], [0], [1], [0, 0, 1, 1], [], []>} : vector<2x32xf32>, vector<32x32xf32>, vector<2x32xf32> -> vector<2x32xf32>
    %259 = vector.extract_strided_slice %221 {offsets = [2, 0, 0], sizes = [1, 32, 32], strides = [1, 1, 1]} : vector<4x32x32xf32> to vector<1x32x32xf32>
    %260 = vector.shape_cast %259 : vector<1x32x32xf32> to vector<32x32xf32>
    %cst_85 = arith.constant dense<0.000000e+00> : vector<2x32xf32>
    %261 = tpu.matmul %225, %260, %cst_85 {dimension_numbers = #tpu.dot_dimension_numbers<[1], [0], [0], [1], [0, 0, 1, 1], [], []>} : vector<2x32xf32>, vector<32x32xf32>, vector<2x32xf32> -> vector<2x32xf32>
    %262 = arith.addf %258, %261 : vector<2x32xf32>
    %263 = vector.extract_strided_slice %222 {offsets = [2, 0], sizes = [1, 32], strides = [1, 1]} : vector<4x32xf32> to vector<1x32xf32>
    %264 = vector.broadcast %263 : vector<1x32xf32> to vector<2x32xf32>
    %265 = arith.addf %262, %264 : vector<2x32xf32>
    %266 = math.tanh %265 : vector<2x32xf32>
    %267 = vector.extract_strided_slice %220 {offsets = [3, 0, 0], sizes = [1, 32, 32], strides = [1, 1, 1]} : vector<4x32x32xf32> to vector<1x32x32xf32>
    %268 = vector.shape_cast %267 : vector<1x32x32xf32> to vector<32x32xf32>
    %cst_86 = arith.constant dense<0.000000e+00> : vector<2x32xf32>
    %269 = tpu.matmul %223, %268, %cst_86 {dimension_numbers = #tpu.dot_dimension_numbers<[1], [0], [0], [1], [0, 0, 1, 1], [], []>} : vector<2x32xf32>, vector<32x32xf32>, vector<2x32xf32> -> vector<2x32xf32>
    %270 = vector.extract_strided_slice %221 {offsets = [3, 0, 0], sizes = [1, 32, 32], strides = [1, 1, 1]} : vector<4x32x32xf32> to vector<1x32x32xf32>
    %271 = vector.shape_cast %270 : vector<1x32x32xf32> to vector<32x32xf32>
    %cst_87 = arith.constant dense<0.000000e+00> : vector<2x32xf32>
    %272 = tpu.matmul %225, %271, %cst_87 {dimension_numbers = #tpu.dot_dimension_numbers<[1], [0], [0], [1], [0, 0, 1, 1], [], []>} : vector<2x32xf32>, vector<32x32xf32>, vector<2x32xf32> -> vector<2x32xf32>
    %273 = arith.addf %269, %272 : vector<2x32xf32>
    %274 = vector.extract_strided_slice %222 {offsets = [3, 0], sizes = [1, 32], strides = [1, 1]} : vector<4x32xf32> to vector<1x32xf32>
    %275 = vector.broadcast %274 : vector<1x32xf32> to vector<2x32xf32>
    %276 = arith.addf %273, %275 : vector<2x32xf32>
    %277 = arith.negf %276 : vector<2x32xf32>
    %278 = math.exp %277 : vector<2x32xf32>
    %cst_88 = arith.constant 1.000000e+00 : f32
    %279 = vector.broadcast %cst_88 : f32 to vector<2x32xf32>
    %280 = arith.addf %279, %278 : vector<2x32xf32>
    %281 = arith.divf %279, %280 : vector<2x32xf32>
    %282 = arith.mulf %255, %224 : vector<2x32xf32>
    %283 = arith.mulf %240, %266 : vector<2x32xf32>
    %284 = arith.addf %282, %283 : vector<2x32xf32>
    %285 = math.tanh %284 : vector<2x32xf32>
    %286 = arith.mulf %281, %285 : vector<2x32xf32>
    %cst_89 = arith.constant dense<0.000000e+00> : vector<2x8xf32>
    %287 = tpu.matmul %286, %215, %cst_89 {dimension_numbers = #tpu.dot_dimension_numbers<[1], [1], [0], [0], [0, 0, 1, 0], [], []>} : vector<2x32xf32>, vector<8x32xf32>, vector<2x8xf32> -> vector<2x8xf32>
    %cst_90 = arith.constant -1.000000e+30 : f32
    %288 = vector.broadcast %cst_90 : f32 to vector<2x8xf32>
    %289 = arith.select %219, %287, %288 : vector<2x8xi1>, vector<2x8xf32>
    %cst_91 = arith.constant dense<0xFF800000> : vector<2xf32>
    %290 = vector.multi_reduction <maximumf>, %289, %cst_91 [1] : vector<2x8xf32> to vector<2xf32>
    %291 = vector.shape_cast %290 : vector<2xf32> to vector<2x1xf32>
    %292 = vector.broadcast %291 : vector<2x1xf32> to vector<2x8xf32>
    %293 = arith.subf %289, %292 : vector<2x8xf32>
    %294 = math.exp %293 : vector<2x8xf32>
    %cst_92 = arith.constant 0.000000e+00 : f32
    %295 = vector.broadcast %cst_92 : f32 to vector<2x8xf32>
    %296 = arith.select %219, %294, %295 : vector<2x8xi1>, vector<2x8xf32>
    %cst_93 = arith.constant dense<0.000000e+00> : vector<2xf32>
    %297 = vector.multi_reduction <add>, %296, %cst_93 [1] : vector<2x8xf32> to vector<2xf32>
    %298 = vector.shape_cast %297 : vector<2xf32> to vector<2x1xf32>
    %cst_94 = arith.constant 1.000000e-30 : f32
    %299 = vector.broadcast %cst_94 : f32 to vector<2x1xf32>
    %300 = arith.maximumf %298, %299 : vector<2x1xf32>
    %301 = tpu.reciprocal %300 {approx = true} : vector<2x1xf32> -> vector<2x1xf32>
    %302 = vector.broadcast %301 : vector<2x1xf32> to vector<2x8xf32>
    %303 = arith.mulf %296, %302 : vector<2x8xf32>
    %cst_95 = arith.constant dense<0.000000e+00> : vector<2x32xf32>
    %304 = tpu.matmul %303, %215, %cst_95 {dimension_numbers = #tpu.dot_dimension_numbers<[1], [0], [0], [1], [0, 0, 1, 1], [], []>} : vector<2x8xf32>, vector<8x32xf32>, vector<2x32xf32> -> vector<2x32xf32>
    %305 = vector.extract_strided_slice %220 {offsets = [0, 0, 0], sizes = [1, 32, 32], strides = [1, 1, 1]} : vector<4x32x32xf32> to vector<1x32x32xf32>
    %306 = vector.shape_cast %305 : vector<1x32x32xf32> to vector<32x32xf32>
    %cst_96 = arith.constant dense<0.000000e+00> : vector<2x32xf32>
    %307 = tpu.matmul %286, %306, %cst_96 {dimension_numbers = #tpu.dot_dimension_numbers<[1], [0], [0], [1], [0, 0, 1, 1], [], []>} : vector<2x32xf32>, vector<32x32xf32>, vector<2x32xf32> -> vector<2x32xf32>
    %308 = vector.extract_strided_slice %221 {offsets = [0, 0, 0], sizes = [1, 32, 32], strides = [1, 1, 1]} : vector<4x32x32xf32> to vector<1x32x32xf32>
    %309 = vector.shape_cast %308 : vector<1x32x32xf32> to vector<32x32xf32>
    %cst_97 = arith.constant dense<0.000000e+00> : vector<2x32xf32>
    %310 = tpu.matmul %304, %309, %cst_97 {dimension_numbers = #tpu.dot_dimension_numbers<[1], [0], [0], [1], [0, 0, 1, 1], [], []>} : vector<2x32xf32>, vector<32x32xf32>, vector<2x32xf32> -> vector<2x32xf32>
    %311 = arith.addf %307, %310 : vector<2x32xf32>
    %312 = vector.extract_strided_slice %222 {offsets = [0, 0], sizes = [1, 32], strides = [1, 1]} : vector<4x32xf32> to vector<1x32xf32>
    %313 = vector.broadcast %312 : vector<1x32xf32> to vector<2x32xf32>
    %314 = arith.addf %311, %313 : vector<2x32xf32>
    %315 = arith.negf %314 : vector<2x32xf32>
    %316 = math.exp %315 : vector<2x32xf32>
    %cst_98 = arith.constant 1.000000e+00 : f32
    %317 = vector.broadcast %cst_98 : f32 to vector<2x32xf32>
    %318 = arith.addf %317, %316 : vector<2x32xf32>
    %319 = arith.divf %317, %318 : vector<2x32xf32>
    %320 = vector.extract_strided_slice %220 {offsets = [1, 0, 0], sizes = [1, 32, 32], strides = [1, 1, 1]} : vector<4x32x32xf32> to vector<1x32x32xf32>
    %321 = vector.shape_cast %320 : vector<1x32x32xf32> to vector<32x32xf32>
    %cst_99 = arith.constant dense<0.000000e+00> : vector<2x32xf32>
    %322 = tpu.matmul %286, %321, %cst_99 {dimension_numbers = #tpu.dot_dimension_numbers<[1], [0], [0], [1], [0, 0, 1, 1], [], []>} : vector<2x32xf32>, vector<32x32xf32>, vector<2x32xf32> -> vector<2x32xf32>
    %323 = vector.extract_strided_slice %221 {offsets = [1, 0, 0], sizes = [1, 32, 32], strides = [1, 1, 1]} : vector<4x32x32xf32> to vector<1x32x32xf32>
    %324 = vector.shape_cast %323 : vector<1x32x32xf32> to vector<32x32xf32>
    %cst_100 = arith.constant dense<0.000000e+00> : vector<2x32xf32>
    %325 = tpu.matmul %304, %324, %cst_100 {dimension_numbers = #tpu.dot_dimension_numbers<[1], [0], [0], [1], [0, 0, 1, 1], [], []>} : vector<2x32xf32>, vector<32x32xf32>, vector<2x32xf32> -> vector<2x32xf32>
    %326 = arith.addf %322, %325 : vector<2x32xf32>
    %327 = vector.extract_strided_slice %222 {offsets = [1, 0], sizes = [1, 32], strides = [1, 1]} : vector<4x32xf32> to vector<1x32xf32>
    %328 = vector.broadcast %327 : vector<1x32xf32> to vector<2x32xf32>
    %329 = arith.addf %326, %328 : vector<2x32xf32>
    %330 = arith.negf %329 : vector<2x32xf32>
    %331 = math.exp %330 : vector<2x32xf32>
    %cst_101 = arith.constant 1.000000e+00 : f32
    %332 = vector.broadcast %cst_101 : f32 to vector<2x32xf32>
    %333 = arith.addf %332, %331 : vector<2x32xf32>
    %334 = arith.divf %332, %333 : vector<2x32xf32>
    %335 = vector.extract_strided_slice %220 {offsets = [2, 0, 0], sizes = [1, 32, 32], strides = [1, 1, 1]} : vector<4x32x32xf32> to vector<1x32x32xf32>
    %336 = vector.shape_cast %335 : vector<1x32x32xf32> to vector<32x32xf32>
    %cst_102 = arith.constant dense<0.000000e+00> : vector<2x32xf32>
    %337 = tpu.matmul %286, %336, %cst_102 {dimension_numbers = #tpu.dot_dimension_numbers<[1], [0], [0], [1], [0, 0, 1, 1], [], []>} : vector<2x32xf32>, vector<32x32xf32>, vector<2x32xf32> -> vector<2x32xf32>
    %338 = vector.extract_strided_slice %221 {offsets = [2, 0, 0], sizes = [1, 32, 32], strides = [1, 1, 1]} : vector<4x32x32xf32> to vector<1x32x32xf32>
    %339 = vector.shape_cast %338 : vector<1x32x32xf32> to vector<32x32xf32>
    %cst_103 = arith.constant dense<0.000000e+00> : vector<2x32xf32>
    %340 = tpu.matmul %304, %339, %cst_103 {dimension_numbers = #tpu.dot_dimension_numbers<[1], [0], [0], [1], [0, 0, 1, 1], [], []>} : vector<2x32xf32>, vector<32x32xf32>, vector<2x32xf32> -> vector<2x32xf32>
    %341 = arith.addf %337, %340 : vector<2x32xf32>
    %342 = vector.extract_strided_slice %222 {offsets = [2, 0], sizes = [1, 32], strides = [1, 1]} : vector<4x32xf32> to vector<1x32xf32>
    %343 = vector.broadcast %342 : vector<1x32xf32> to vector<2x32xf32>
    %344 = arith.addf %341, %343 : vector<2x32xf32>
    %345 = math.tanh %344 : vector<2x32xf32>
    %346 = vector.extract_strided_slice %220 {offsets = [3, 0, 0], sizes = [1, 32, 32], strides = [1, 1, 1]} : vector<4x32x32xf32> to vector<1x32x32xf32>
    %347 = vector.shape_cast %346 : vector<1x32x32xf32> to vector<32x32xf32>
    %cst_104 = arith.constant dense<0.000000e+00> : vector<2x32xf32>
    %348 = tpu.matmul %286, %347, %cst_104 {dimension_numbers = #tpu.dot_dimension_numbers<[1], [0], [0], [1], [0, 0, 1, 1], [], []>} : vector<2x32xf32>, vector<32x32xf32>, vector<2x32xf32> -> vector<2x32xf32>
    %349 = vector.extract_strided_slice %221 {offsets = [3, 0, 0], sizes = [1, 32, 32], strides = [1, 1, 1]} : vector<4x32x32xf32> to vector<1x32x32xf32>
    %350 = vector.shape_cast %349 : vector<1x32x32xf32> to vector<32x32xf32>
    %cst_105 = arith.constant dense<0.000000e+00> : vector<2x32xf32>
    %351 = tpu.matmul %304, %350, %cst_105 {dimension_numbers = #tpu.dot_dimension_numbers<[1], [0], [0], [1], [0, 0, 1, 1], [], []>} : vector<2x32xf32>, vector<32x32xf32>, vector<2x32xf32> -> vector<2x32xf32>
    %352 = arith.addf %348, %351 : vector<2x32xf32>
    %353 = vector.extract_strided_slice %222 {offsets = [3, 0], sizes = [1, 32], strides = [1, 1]} : vector<4x32xf32> to vector<1x32xf32>
    %354 = vector.broadcast %353 : vector<1x32xf32> to vector<2x32xf32>
    %355 = arith.addf %352, %354 : vector<2x32xf32>
    %356 = arith.negf %355 : vector<2x32xf32>
    %357 = math.exp %356 : vector<2x32xf32>
    %cst_106 = arith.constant 1.000000e+00 : f32
    %358 = vector.broadcast %cst_106 : f32 to vector<2x32xf32>
    %359 = arith.addf %358, %357 : vector<2x32xf32>
    %360 = arith.divf %358, %359 : vector<2x32xf32>
    %361 = arith.mulf %334, %284 : vector<2x32xf32>
    %362 = arith.mulf %319, %345 : vector<2x32xf32>
    %363 = arith.addf %361, %362 : vector<2x32xf32>
    %364 = math.tanh %363 : vector<2x32xf32>
    %365 = arith.mulf %360, %364 : vector<2x32xf32>
    %cst_107 = arith.constant dense<0.000000e+00> : vector<2x8xf32>
    %366 = tpu.matmul %365, %215, %cst_107 {dimension_numbers = #tpu.dot_dimension_numbers<[1], [1], [0], [0], [0, 0, 1, 0], [], []>} : vector<2x32xf32>, vector<8x32xf32>, vector<2x8xf32> -> vector<2x8xf32>
    %cst_108 = arith.constant -1.000000e+30 : f32
    %367 = vector.broadcast %cst_108 : f32 to vector<2x8xf32>
    %368 = arith.select %219, %366, %367 : vector<2x8xi1>, vector<2x8xf32>
    %cst_109 = arith.constant dense<0xFF800000> : vector<2xf32>
    %369 = vector.multi_reduction <maximumf>, %368, %cst_109 [1] : vector<2x8xf32> to vector<2xf32>
    %370 = vector.shape_cast %369 : vector<2xf32> to vector<2x1xf32>
    %371 = vector.broadcast %370 : vector<2x1xf32> to vector<2x8xf32>
    %372 = arith.subf %368, %371 : vector<2x8xf32>
    %373 = math.exp %372 : vector<2x8xf32>
    %cst_110 = arith.constant 0.000000e+00 : f32
    %374 = vector.broadcast %cst_110 : f32 to vector<2x8xf32>
    %375 = arith.select %219, %373, %374 : vector<2x8xi1>, vector<2x8xf32>
    %cst_111 = arith.constant dense<0.000000e+00> : vector<2xf32>
    %376 = vector.multi_reduction <add>, %375, %cst_111 [1] : vector<2x8xf32> to vector<2xf32>
    %377 = vector.shape_cast %376 : vector<2xf32> to vector<2x1xf32>
    %cst_112 = arith.constant 1.000000e-30 : f32
    %378 = vector.broadcast %cst_112 : f32 to vector<2x1xf32>
    %379 = arith.maximumf %377, %378 : vector<2x1xf32>
    %380 = tpu.reciprocal %379 {approx = true} : vector<2x1xf32> -> vector<2x1xf32>
    %381 = vector.broadcast %380 : vector<2x1xf32> to vector<2x8xf32>
    %382 = arith.mulf %375, %381 : vector<2x8xf32>
    %cst_113 = arith.constant dense<0.000000e+00> : vector<2x32xf32>
    %383 = tpu.matmul %382, %215, %cst_113 {dimension_numbers = #tpu.dot_dimension_numbers<[1], [0], [0], [1], [0, 0, 1, 1], [], []>} : vector<2x8xf32>, vector<8x32xf32>, vector<2x32xf32> -> vector<2x32xf32>
    %384 = vector.extract_strided_slice %220 {offsets = [0, 0, 0], sizes = [1, 32, 32], strides = [1, 1, 1]} : vector<4x32x32xf32> to vector<1x32x32xf32>
    %385 = vector.shape_cast %384 : vector<1x32x32xf32> to vector<32x32xf32>
    %cst_114 = arith.constant dense<0.000000e+00> : vector<2x32xf32>
    %386 = tpu.matmul %365, %385, %cst_114 {dimension_numbers = #tpu.dot_dimension_numbers<[1], [0], [0], [1], [0, 0, 1, 1], [], []>} : vector<2x32xf32>, vector<32x32xf32>, vector<2x32xf32> -> vector<2x32xf32>
    %387 = vector.extract_strided_slice %221 {offsets = [0, 0, 0], sizes = [1, 32, 32], strides = [1, 1, 1]} : vector<4x32x32xf32> to vector<1x32x32xf32>
    %388 = vector.shape_cast %387 : vector<1x32x32xf32> to vector<32x32xf32>
    %cst_115 = arith.constant dense<0.000000e+00> : vector<2x32xf32>
    %389 = tpu.matmul %383, %388, %cst_115 {dimension_numbers = #tpu.dot_dimension_numbers<[1], [0], [0], [1], [0, 0, 1, 1], [], []>} : vector<2x32xf32>, vector<32x32xf32>, vector<2x32xf32> -> vector<2x32xf32>
    %390 = arith.addf %386, %389 : vector<2x32xf32>
    %391 = vector.extract_strided_slice %222 {offsets = [0, 0], sizes = [1, 32], strides = [1, 1]} : vector<4x32xf32> to vector<1x32xf32>
    %392 = vector.broadcast %391 : vector<1x32xf32> to vector<2x32xf32>
    %393 = arith.addf %390, %392 : vector<2x32xf32>
    %394 = arith.negf %393 : vector<2x32xf32>
    %395 = math.exp %394 : vector<2x32xf32>
    %cst_116 = arith.constant 1.000000e+00 : f32
    %396 = vector.broadcast %cst_116 : f32 to vector<2x32xf32>
    %397 = arith.addf %396, %395 : vector<2x32xf32>
    %398 = arith.divf %396, %397 : vector<2x32xf32>
    %399 = vector.extract_strided_slice %220 {offsets = [1, 0, 0], sizes = [1, 32, 32], strides = [1, 1, 1]} : vector<4x32x32xf32> to vector<1x32x32xf32>
    %400 = vector.shape_cast %399 : vector<1x32x32xf32> to vector<32x32xf32>
    %cst_117 = arith.constant dense<0.000000e+00> : vector<2x32xf32>
    %401 = tpu.matmul %365, %400, %cst_117 {dimension_numbers = #tpu.dot_dimension_numbers<[1], [0], [0], [1], [0, 0, 1, 1], [], []>} : vector<2x32xf32>, vector<32x32xf32>, vector<2x32xf32> -> vector<2x32xf32>
    %402 = vector.extract_strided_slice %221 {offsets = [1, 0, 0], sizes = [1, 32, 32], strides = [1, 1, 1]} : vector<4x32x32xf32> to vector<1x32x32xf32>
    %403 = vector.shape_cast %402 : vector<1x32x32xf32> to vector<32x32xf32>
    %cst_118 = arith.constant dense<0.000000e+00> : vector<2x32xf32>
    %404 = tpu.matmul %383, %403, %cst_118 {dimension_numbers = #tpu.dot_dimension_numbers<[1], [0], [0], [1], [0, 0, 1, 1], [], []>} : vector<2x32xf32>, vector<32x32xf32>, vector<2x32xf32> -> vector<2x32xf32>
    %405 = arith.addf %401, %404 : vector<2x32xf32>
    %406 = vector.extract_strided_slice %222 {offsets = [1, 0], sizes = [1, 32], strides = [1, 1]} : vector<4x32xf32> to vector<1x32xf32>
    %407 = vector.broadcast %406 : vector<1x32xf32> to vector<2x32xf32>
    %408 = arith.addf %405, %407 : vector<2x32xf32>
    %409 = arith.negf %408 : vector<2x32xf32>
    %410 = math.exp %409 : vector<2x32xf32>
    %cst_119 = arith.constant 1.000000e+00 : f32
    %411 = vector.broadcast %cst_119 : f32 to vector<2x32xf32>
    %412 = arith.addf %411, %410 : vector<2x32xf32>
    %413 = arith.divf %411, %412 : vector<2x32xf32>
    %414 = vector.extract_strided_slice %220 {offsets = [2, 0, 0], sizes = [1, 32, 32], strides = [1, 1, 1]} : vector<4x32x32xf32> to vector<1x32x32xf32>
    %415 = vector.shape_cast %414 : vector<1x32x32xf32> to vector<32x32xf32>
    %cst_120 = arith.constant dense<0.000000e+00> : vector<2x32xf32>
    %416 = tpu.matmul %365, %415, %cst_120 {dimension_numbers = #tpu.dot_dimension_numbers<[1], [0], [0], [1], [0, 0, 1, 1], [], []>} : vector<2x32xf32>, vector<32x32xf32>, vector<2x32xf32> -> vector<2x32xf32>
    %417 = vector.extract_strided_slice %221 {offsets = [2, 0, 0], sizes = [1, 32, 32], strides = [1, 1, 1]} : vector<4x32x32xf32> to vector<1x32x32xf32>
    %418 = vector.shape_cast %417 : vector<1x32x32xf32> to vector<32x32xf32>
    %cst_121 = arith.constant dense<0.000000e+00> : vector<2x32xf32>
    %419 = tpu.matmul %383, %418, %cst_121 {dimension_numbers = #tpu.dot_dimension_numbers<[1], [0], [0], [1], [0, 0, 1, 1], [], []>} : vector<2x32xf32>, vector<32x32xf32>, vector<2x32xf32> -> vector<2x32xf32>
    %420 = arith.addf %416, %419 : vector<2x32xf32>
    %421 = vector.extract_strided_slice %222 {offsets = [2, 0], sizes = [1, 32], strides = [1, 1]} : vector<4x32xf32> to vector<1x32xf32>
    %422 = vector.broadcast %421 : vector<1x32xf32> to vector<2x32xf32>
    %423 = arith.addf %420, %422 : vector<2x32xf32>
    %424 = math.tanh %423 : vector<2x32xf32>
    %425 = vector.extract_strided_slice %220 {offsets = [3, 0, 0], sizes = [1, 32, 32], strides = [1, 1, 1]} : vector<4x32x32xf32> to vector<1x32x32xf32>
    %426 = vector.shape_cast %425 : vector<1x32x32xf32> to vector<32x32xf32>
    %cst_122 = arith.constant dense<0.000000e+00> : vector<2x32xf32>
    %427 = tpu.matmul %365, %426, %cst_122 {dimension_numbers = #tpu.dot_dimension_numbers<[1], [0], [0], [1], [0, 0, 1, 1], [], []>} : vector<2x32xf32>, vector<32x32xf32>, vector<2x32xf32> -> vector<2x32xf32>
    %428 = vector.extract_strided_slice %221 {offsets = [3, 0, 0], sizes = [1, 32, 32], strides = [1, 1, 1]} : vector<4x32x32xf32> to vector<1x32x32xf32>
    %429 = vector.shape_cast %428 : vector<1x32x32xf32> to vector<32x32xf32>
    %cst_123 = arith.constant dense<0.000000e+00> : vector<2x32xf32>
    %430 = tpu.matmul %383, %429, %cst_123 {dimension_numbers = #tpu.dot_dimension_numbers<[1], [0], [0], [1], [0, 0, 1, 1], [], []>} : vector<2x32xf32>, vector<32x32xf32>, vector<2x32xf32> -> vector<2x32xf32>
    %431 = arith.addf %427, %430 : vector<2x32xf32>
    %432 = vector.extract_strided_slice %222 {offsets = [3, 0], sizes = [1, 32], strides = [1, 1]} : vector<4x32xf32> to vector<1x32xf32>
    %433 = vector.broadcast %432 : vector<1x32xf32> to vector<2x32xf32>
    %434 = arith.addf %431, %433 : vector<2x32xf32>
    %435 = arith.negf %434 : vector<2x32xf32>
    %436 = math.exp %435 : vector<2x32xf32>
    %cst_124 = arith.constant 1.000000e+00 : f32
    %437 = vector.broadcast %cst_124 : f32 to vector<2x32xf32>
    %438 = arith.addf %437, %436 : vector<2x32xf32>
    %439 = arith.divf %437, %438 : vector<2x32xf32>
    %440 = arith.mulf %413, %363 : vector<2x32xf32>
    %441 = arith.mulf %398, %424 : vector<2x32xf32>
    %442 = arith.addf %440, %441 : vector<2x32xf32>
    %443 = math.tanh %442 : vector<2x32xf32>
    %444 = arith.mulf %439, %443 : vector<2x32xf32>
    %cst_125 = arith.constant dense<0.000000e+00> : vector<2x8xf32>
    %445 = tpu.matmul %444, %215, %cst_125 {dimension_numbers = #tpu.dot_dimension_numbers<[1], [1], [0], [0], [0, 0, 1, 0], [], []>} : vector<2x32xf32>, vector<8x32xf32>, vector<2x8xf32> -> vector<2x8xf32>
    %cst_126 = arith.constant -1.000000e+30 : f32
    %446 = vector.broadcast %cst_126 : f32 to vector<2x8xf32>
    %447 = arith.select %219, %445, %446 : vector<2x8xi1>, vector<2x8xf32>
    %cst_127 = arith.constant dense<0xFF800000> : vector<2xf32>
    %448 = vector.multi_reduction <maximumf>, %447, %cst_127 [1] : vector<2x8xf32> to vector<2xf32>
    %449 = vector.shape_cast %448 : vector<2xf32> to vector<2x1xf32>
    %450 = vector.broadcast %449 : vector<2x1xf32> to vector<2x8xf32>
    %451 = arith.subf %447, %450 : vector<2x8xf32>
    %452 = math.exp %451 : vector<2x8xf32>
    %cst_128 = arith.constant 0.000000e+00 : f32
    %453 = vector.broadcast %cst_128 : f32 to vector<2x8xf32>
    %454 = arith.select %219, %452, %453 : vector<2x8xi1>, vector<2x8xf32>
    %cst_129 = arith.constant dense<0.000000e+00> : vector<2xf32>
    %455 = vector.multi_reduction <add>, %454, %cst_129 [1] : vector<2x8xf32> to vector<2xf32>
    %456 = vector.shape_cast %455 : vector<2xf32> to vector<2x1xf32>
    %cst_130 = arith.constant 1.000000e-30 : f32
    %457 = vector.broadcast %cst_130 : f32 to vector<2x1xf32>
    %458 = arith.maximumf %456, %457 : vector<2x1xf32>
    %459 = tpu.reciprocal %458 {approx = true} : vector<2x1xf32> -> vector<2x1xf32>
    %460 = vector.broadcast %459 : vector<2x1xf32> to vector<2x8xf32>
    %461 = arith.mulf %454, %460 : vector<2x8xf32>
    %cst_131 = arith.constant dense<0.000000e+00> : vector<2x32xf32>
    %462 = tpu.matmul %461, %215, %cst_131 {dimension_numbers = #tpu.dot_dimension_numbers<[1], [0], [0], [1], [0, 0, 1, 1], [], []>} : vector<2x8xf32>, vector<8x32xf32>, vector<2x32xf32> -> vector<2x32xf32>
    %c0_132 = arith.constant 0 : index
    %c0_133 = arith.constant 0 : index
    %463 = vector.load %arg15[%c0_132, %c0_133] : memref<2x32xf32, #tpu.memory_space<vmem>>, vector<2x32xf32>
    tpu.vector_store %arg15[%c0_132, %c0_133], %444 {strides = array<i32>} : memref<2x32xf32, #tpu.memory_space<vmem>>, vector<2x32xf32>,
    %c0_134 = arith.constant 0 : index
    %c0_135 = arith.constant 0 : index
    %464 = vector.load %arg16[%c0_134, %c0_135] : memref<2x32xf32, #tpu.memory_space<vmem>>, vector<2x32xf32>
    tpu.vector_store %arg16[%c0_134, %c0_135], %462 {strides = array<i32>} : memref<2x32xf32, #tpu.memory_space<vmem>>, vector<2x32xf32>,
    return
  }
}

</mosaic_0001>

<bundles_post_ra>
// kernel: mpnn_mol_embedder.2
= control target key start
LH: loop header
LB: loop body
LE: loop exit
PB: predicated region body
PF: predicated region fallthrough
CT: control target
= control target key end

     0   :  { %vm30_vm0 = vcmask 64512   ;;  %v543_v21 = vmov 0.0   ;;  %vm188_vm1 = vcmask 261120   ;;  %v148_v43 = vlaneseq  ;;  %s741_s1 = inlined_call_operand.vmem [shape: f32[8,32], index: 1, kind: input, shape index: {}]   ;;  %s742_s0 = inlined_call_operand.vmem [shape: f32[12,8], index: 0, kind: input, shape index: {}]   ;;  %s743_s3 = inlined_call_operand.vmem [shape: f32[32,1024], index: 3, kind: input, shape index: {}]   ;;  %s744_s2 = inlined_call_operand.vmem [shape: f32[1,32], index: 2, kind: input, shape index: {}]   ;;  %s745_s4 = inlined_call_operand.vmem [shape: f32[1,1024], index: 4, kind: input, shape index: {}]   ;;  %s746_s5 = inlined_call_operand.vmem [shape: f32[12,1024], index: 5, kind: output, shape index: {}]  }
   0x1   :  { %v22_v0 = vld [vmem:[%s741_s1] sm:$0xff]  ;;  %v21_v2 = vld [vmem:[%s742_s0 + $0x8] sm:$0xf]  ;;  %v141_v4 = vld [vmem:[%s743_s3 + $0xd8] sm:$0xff]  ;;  %259 = vmatprep.mubr.f32.mxu1 %v543_v21 }
   0x2   :  { %v20_v1 = vld [vmem:[%s742_s0] sm:$0xff]  ;;  %537 = vmatprep.subr.mxu0 %v22_v0  ;;  %v139_v3 = vld [vmem:[%s743_s3 + $0xc8] sm:$0xff]  ;;  %v140_v6 = vld [vmem:[%s743_s3 + $0xd0] sm:$0xff]  ;;  %v149_v44 = vshrl.u32 %v148_v43, 7 }
   0x3   :  { %539 = vmatprep.mubr.msk.f32.mxu0 %vm30_vm0, %v20_v1  ;;  %v138_v5 = vld [vmem:[%s743_s3 + $0xc0] sm:$0xff]  ;;  %538 = vmatpush3.msra.mxu0 %v22_v0  ;;  %v131_v7 = vld [vmem:[%s743_s3 + $0x88] sm:$0xff]  ;;  %v133_v8 = vld [vmem:[%s743_s3 + $0x98] sm:$0xff] }
   0x4   :  { %219 = vmatprep.subr.mxu1 %v139_v3  ;;  %540 = vmatmul.mubr.msk.f32.vlgmr.msra.gmra.mxu0 %vm30_vm0, %v21_v2  ;;  %v130_v9 = vld [vmem:[%s743_s3 + $0x80] sm:$0xff]  ;;  %v132_v10 = vld [vmem:[%s743_s3 + $0x90] sm:$0xff]  ;;  %v123_v11 = vld [vmem:[%s743_s3 + $0x48] sm:$0xff]  ;;  %v150_v45 = vsub.s32 0, %v149_v44  ;;  %v158_v46 = vsub.s32 2, %v149_v44  ;;  %v154_v48 = vsub.s32 1, %v149_v44 }
   0x5   :  { %296 = vmatprep.subr.mxu0 %v141_v4  ;;  %220 = vmatpush1.msra.mxu1 %v138_v5  ;;  %v125_v12 = vld [vmem:[%s743_s3 + $0x58] sm:$0xff]  ;;  %v122_v13 = vld [vmem:[%s743_s3 + $0x40] sm:$0xff]  ;;  %v124_v14 = vld [vmem:[%s743_s3 + $0x50] sm:$0xff]  ;;  %v162_v49 = vsub.s32 3, %v149_v44  ;;  %v166_v62 = vsub.s32 4, %v149_v44  ;;  %v174_v63 = vsub.s32 6, %v149_v44 }
   0x6   :  { %297 = vmatpush1.msra.mxu0 %v140_v6  ;;  %221 = vmatprep.subr.mxu1 %v131_v7  ;;  %v115_v15 = vld [vmem:[%s743_s3 + $0x8] sm:$0xff]  ;;  %v117_v16 = vld [vmem:[%s743_s3 + $0x18] sm:$0xff]  ;;  %v114_v17 = vld [vmem:[%s743_s3] sm:$0xff]  ;;  %v170_v2 = vsub.s32 5, %v149_v44  ;;  %v178_v3 = vsub.s32 7, %v149_v44 }
   0x7   :  { %298 = vmatprep.subr.mxu0 %v133_v8  ;;  %222 = vmatpush1.msra.mxu1 %v130_v9  ;;  %v116_v18 = vld [vmem:[%s743_s3 + $0x10] sm:$0xff]  ;;  %v143_v19 = vld [vmem:[%s743_s3 + $0xe8] sm:$0xff]  ;;  %v145_v20 = vld [vmem:[%s743_s3 + $0xf8] sm:$0xff] }
   0x8   :  { %299 = vmatpush1.msra.mxu0 %v132_v10  ;;  %223 = vmatprep.subr.mxu1 %v123_v11  ;;  %v523_v23 = vld [vmem:[%s744_s2] ss:$0 sm:$0xff]  ;;  %v144_v28 = vld [vmem:[%s743_s3 + $0xf0] sm:$0xff]  ;;  %v135_v29 = vld [vmem:[%s743_s3 + $0xa8] sm:$0xff] }
   0x9   :  { %300 = vmatprep.subr.mxu0 %v125_v12  ;;  %224 = vmatpush1.msra.mxu1 %v122_v13  ;;  %v142_v27 = vld [vmem:[%s743_s3 + $0xe0] sm:$0xff]  ;;  %v137_v30 = vld [vmem:[%s743_s3 + $0xb8] sm:$0xff]  ;;  %v136_v33 = vld [vmem:[%s743_s3 + $0xb0] sm:$0xff] }
   0xa   :  { %301 = vmatpush1.msra.mxu0 %v124_v14  ;;  %225 = vmatprep.subr.mxu1 %v115_v15  ;;  %v134_v32 = vld [vmem:[%s743_s3 + $0xa0] sm:$0xff]  ;;  %v127_v34 = vld [vmem:[%s743_s3 + $0x68] sm:$0xff]  ;;  %v129_v35 = vld [vmem:[%s743_s3 + $0x78] sm:$0xff] }
   0xb   :  { %302 = vmatprep.subr.mxu0 %v117_v16  ;;  %226 = vmatpush1.msra.mxu1 %v114_v17  ;;  %v126_v37 = vld [vmem:[%s743_s3 + $0x60] sm:$0xff]  ;;  %v128_v38 = vld [vmem:[%s743_s3 + $0x70] sm:$0xff]  ;;  %v119_v39 = vld [vmem:[%s743_s3 + $0x28] sm:$0xff] }
   0xc   :  { %303 = vmatpush1.msra.mxu0 %v116_v18  ;;  %336 = vmatprep.mubr.f32.mxu0 %v543_v21  ;;  %v121_v40 = vld [vmem:[%s743_s3 + $0x38] sm:$0xff]  ;;  %v118_v41 = vld [vmem:[%s743_s3 + $0x20] sm:$0xff]  ;;  %v120_v42 = vld [vmem:[%s743_s3 + $0x30] sm:$0xff] }
   0xd   :  { %373 = vmatprep.subr.mxu1 %v143_v19  ;;  %450 = vmatprep.subr.mxu0 %v145_v20  ;;  %v146_v47 = vld [vmem:[%s745_s4] sm:$0xff] }
   0xe   :  { %v151_v50 = vrot.slane %v146_v47, %v150_v45  ;;  %v159_v51 = vrot.slane %v146_v47, %v158_v46  ;;  %v155_v52 = vrot.slane %v146_v47, %v154_v48  ;;  %v163_v53 = vrot.slane %v146_v47, %v162_v49 }
   0xf   :  { %v167_v8 = vrot.slane %v146_v47, %v166_v62  ;;  %v175_v9 = vrot.slane %v146_v47, %v174_v63  ;;  %v171_v12 = vrot.slane %v146_v47, %v170_v2  ;;  %v179_v13 = vrot.slane %v146_v47, %v178_v3 }
  0xc4   :  { %v541_v22 = vpop.f32.mrf.mxu0 }
  0xc5   :  { %v109_v31 = vadd.f32 %v541_v22, %v523_v23 }
  0xc6   :  { %v103_v24 = vpop.f32.mrf.mxu0 }
  0xc7   :  { %v104_v25 = vadd.f32 %v523_v23, %v103_v24  ;;  %v113_v36 = vmax.f32 %v109_v31, 0.0 }
  0xc9   :  { %v112_v26 = vmax.f32 %v104_v25, 0.0 }
  0xcb   :  { %526 = vmatmul.mubr.msk.f32.vlgmr.msra.gmra.mxu1 %vm188_vm1, %v112_v26  ;;  %528 = vmatmul.mubr.msk.f32.vlgmr.msra.gmra.mxu0 %vm188_vm1, %v112_v26 }
  0xcc   :  { %374 = vmatpush1.msra.mxu1 %v142_v27  ;;  %451 = vmatpush1.msra.mxu0 %v144_v28 }
  0xcd   :  { %375 = vmatprep.subr.mxu1 %v135_v29  ;;  %452 = vmatprep.subr.mxu0 %v137_v30 }
  0xce   :  { %376 = vmatpush1.msra.mxu1 %v134_v32  ;;  %453 = vmatpush1.msra.mxu0 %v136_v33 }
  0xcf   :  { %265 = vmatprep.mubr.f32.mxu1 %v543_v21  ;;  %342 = vmatprep.mubr.f32.mxu0 %v543_v21 }
  0xd0   :  { %377 = vmatprep.subr.mxu1 %v127_v34  ;;  %454 = vmatprep.subr.mxu0 %v129_v35 }
  0xd1   :  { %527 = vmatmul.mubr.msk.f32.gmra.mxu1 %vm188_vm1, %v113_v36  ;;  %529 = vmatmul.mubr.msk.f32.gmra.mxu0 %vm188_vm1, %v113_v36 }
  0xd2   :  { %378 = vmatpush1.msra.mxu1 %v126_v37  ;;  %455 = vmatpush1.msra.mxu0 %v128_v38 }
  0xd3   :  { %379 = vmatprep.subr.mxu1 %v119_v39  ;;  %456 = vmatprep.subr.mxu0 %v121_v40 }
  0xd4   :  { %380 = vmatpush1.msra.mxu1 %v118_v41  ;;  %457 = vmatpush1.msra.mxu0 %v120_v42 }
  0xd5   :  { %413 = vmatprep.mubr.f32.mxu1 %v543_v21  ;;  %490 = vmatprep.mubr.f32.mxu0 %v543_v21 }
  0xd6   :  { %530 = vmatmul.mubr.msk.f32.vlgmr.msra.gmra.mxu1 %vm188_vm1, %v112_v26  ;;  %532 = vmatmul.mubr.msk.f32.vlgmr.msra.gmra.mxu0 %vm188_vm1, %v112_v26 }
  0xd7   :  { %419 = vmatprep.mubr.f32.mxu1 %v543_v21  ;;  %496 = vmatprep.mubr.f32.mxu0 %v543_v21 }
  0xda   :  { %531 = vmatmul.mubr.msk.f32.gmra.mxu1 %vm188_vm1, %v113_v36  ;;  %533 = vmatmul.mubr.msk.f32.gmra.mxu0 %vm188_vm1, %v113_v36 }
 0x18b   :  { %v261_v54 = vpop.f32.mrf.mxu1  ;;  %v338_v55 = vpop.f32.mrf.mxu0 }
 0x18c   :  { %v262_v56 = vadd.f32 %v261_v54, %v151_v50  ;;  %v339_v57 = vadd.f32 %v338_v55, %v159_v51 }
 0x18d   :  { %v263_v58 = vpop.f32.mrf.mxu1  ;;  %v340_v59 = vpop.f32.mrf.mxu0 }
 0x18e   :  { %503 = vst [vmem:[%s746_s5] sm:$0xff] %v262_v56  ;;  %505 = vst [vmem:[%s746_s5 + $0x10] sm:$0xff] %v339_v57  ;;  %v264_v60 = vadd.f32 %v263_v58, %v155_v52  ;;  %v341_v61 = vadd.f32 %v340_v59, %v163_v53 }
 0x190   :  { %504 = vst [vmem:[%s746_s5 + $0x8] sm:$0xff] %v264_v60  ;;  %506 = vst [vmem:[%s746_s5 + $0x18] sm:$0xff] %v341_v61 }
 0x191   :  { %v267_v0 = vpop.f32.mrf.mxu1  ;;  %v344_v1 = vpop.f32.mrf.mxu0 }
 0x192   :  { %v268_v4 = vadd.f32 %v267_v0, %v151_v50  ;;  %v345_v5 = vadd.f32 %v344_v1, %v159_v51 }
 0x193   :  { %v269_v6 = vpop.f32.mrf.mxu1  ;;  %v346_v7 = vpop.f32.mrf.mxu0 }
 0x194   :  { %511 = vst [vmem:[%s746_s5 + $0x40] sm:$0xf] %v268_v4  ;;  %513 = vst [vmem:[%s746_s5 + $0x50] sm:$0xf] %v345_v5  ;;  %v270_v10 = vadd.f32 %v269_v6, %v155_v52  ;;  %v347_v11 = vadd.f32 %v346_v7, %v163_v53 }
 0x196   :  { %512 = vst [vmem:[%s746_s5 + $0x48] sm:$0xf] %v270_v10  ;;  %514 = vst [vmem:[%s746_s5 + $0x58] sm:$0xf] %v347_v11  ;;  %v415_v14 = vpop.f32.mrf.mxu1  ;;  %v492_v15 = vpop.f32.mrf.mxu0 }
 0x197   :  { %v416_v16 = vadd.f32 %v415_v14, %v167_v8  ;;  %v493_v17 = vadd.f32 %v492_v15, %v175_v9 }
 0x198   :  { %v417_v18 = vpop.f32.mrf.mxu1  ;;  %v494_v19 = vpop.f32.mrf.mxu0 }
 0x199   :  { %507 = vst [vmem:[%s746_s5 + $0x20] sm:$0xff] %v416_v16  ;;  %509 = vst [vmem:[%s746_s5 + $0x30] sm:$0xff] %v493_v17  ;;  %v418_v20 = vadd.f32 %v417_v18, %v171_v12  ;;  %v495_v21 = vadd.f32 %v494_v19, %v179_v13 }
 0x19a   :  { %v421_v22 = vpop.f32.mrf.mxu1  ;;  %v498_v23 = vpop.f32.mrf.mxu0 }
 0x19b   :  { %508 = vst [vmem:[%s746_s5 + $0x28] sm:$0xff] %v418_v20  ;;  %510 = vst [vmem:[%s746_s5 + $0x38] sm:$0xff] %v495_v21  ;;  %v422_v24 = vadd.f32 %v421_v22, %v167_v8  ;;  %v499_v25 = vadd.f32 %v498_v23, %v175_v9 }
 0x19c   :  { %v423_v26 = vpop.f32.mrf.mxu1  ;;  %v500_v27 = vpop.f32.mrf.mxu0 }
 0x19d   :  { %515 = vst [vmem:[%s746_s5 + $0x60] sm:$0xf] %v422_v24  ;;  %517 = vst [vmem:[%s746_s5 + $0x70] sm:$0xf] %v499_v25  ;;  %v424_v28 = vadd.f32 %v423_v26, %v171_v12  ;;  %v501_v29 = vadd.f32 %v500_v27, %v179_v13 }
 0x19f   :  { %516 = vst [vmem:[%s746_s5 + $0x68] sm:$0xf] %v424_v28  ;;  %518 = vst [vmem:[%s746_s5 + $0x78] sm:$0xf] %v501_v29 }

// kernel: mpnn_mol_embedder.3
= control target key start
LH: loop header
LB: loop body
LE: loop exit
PB: predicated region body
PF: predicated region fallthrough
CT: control target
= control target key end

     0   :  { %v8642_v0 = vmov 0.0   ;;  %vm6761_vm0 = vmmov 0   ;;  %vm62_vm1 = vcmask 130048   ;;  %vm218_vm2 = vcmask 64512   ;;  %s8624_s1 = inlined_call_operand.vmem [shape: f32[16,32], index: 1, kind: input, shape index: {}]   ;;  %s8625_s0 = inlined_call_operand.vmem [shape: f32[8,16], index: 0, kind: input, shape index: {}]   ;;  %s8626_s4 = inlined_call_operand.vmem [shape: bf16[12,8], index: 4, kind: input, shape index: {}]   ;;  %s8627_s2 = inlined_call_operand.vmem [shape: f32[1,32], index: 2, kind: input, shape index: {}]   ;;  %s8628_s3 = inlined_call_operand.vmem [shape: f32[12,32,32], index: 3, kind: input, shape index: {}]   ;;  %s8629_s7 = inlined_call_operand.vmem [shape: f32[3,32,32], index: 7, kind: input, shape index: {}]   ;;  %s8630_s5 = inlined_call_operand.vmem [shape: bf16[8,12], index: 5, kind: input, shape index: {}]   ;;  %s8631_s8 = inlined_call_operand.vmem [shape: f32[3,32,32], index: 8, kind: input, shape index: {}]   ;;  %s8632_s6 = inlined_call_operand.vmem [shape: f32[1,32], index: 6, kind: input, shape index: {}]   ;;  %s8633_s9 = inlined_call_operand.vmem [shape: f32[3,32], index: 9, kind: input, shape index: {}]   ;;  %s8634_s10 = inlined_call_operand.vmem [shape: f32[3,32], index: 10, kind: input, shape index: {}]   ;;  %s8635_s12 = inlined_call_operand.vmem [shape: f32[4,32,32], index: 12, kind: input, shape index: {}]   ;;  %s8636_s13 = inlined_call_operand.vmem [shape: f32[4,32,32], index: 13, kind: input, shape index: {}]   ;;  %s8637_s14 = inlined_call_operand.vmem [shape: f32[4,32], index: 14, kind: input, shape index: {}]   ;;  %s8638_s11 = inlined_call_operand.vmem [shape: bf16[2,8], index: 11, kind: input, shape index: {}]   ;;  %s8639_s15 = inlined_call_operand.vmem [shape: f32[2,32], index: 15, kind: output, shape index: {0}]   ;;  %s8640_s16 = inlined_call_operand.vmem [shape: f32[2,32], index: 16, kind: output, shape index: {1}]  }
   0x1   :  { %8713 = sst [smem:[#allocation59_spill]] %s8624_s1  ;;  %6060 = vmatprep.subr.mxu0 %v8642_v0  ;;  %6064 = vmatprep.mubr.msk.f32.mxu0 %vm6761_vm0, %v8642_v0  ;;  %v52_v3 = vld [vmem:[%s8625_s0] sm:$0xff]  ;;  %v300_v13 = vlaneseq  ;;  %v170_v43 = vld [vmem:[%s8628_s3 + $0x108] sm:$0xff]  ;;  %v6924_v45 = vld [vmem:[%s8629_s7 + $0x18] sm:$0xff]  ;;  %vm576_vm3 = vcmask 261120   ;;  %vm751_vm4 = vcmask 1041409  }
   0x2   :  { %s8714_s23 = sld [smem:[#allocation59_spill]]  ;;  %v185_v4 = vld [vmem:[%s8626_s4] sm:$0xf]  ;;  %v186_v8 = vld [vmem:[%s8626_s4 + $0x4] sm:$0x3]  ;;  %v6929_v46 = vld [vmem:[%s8629_s7 + $0x10] sm:$0xff] }
   0x3   :  { %v6866_v5 = vunpack.c.l.bf16 %v185_v4  ;;  %v5744_v6 = vld [vmem:[%s8627_s2] ss:$0 sm:$0xff]  ;;  %v6878_v12 = vunpack.c.l.bf16 %v186_v8  ;;  %v301_v14 = vshrl.u32 %v300_v13, 7  ;;  %v171_v48 = vld [vmem:[%s8628_s3 + $0x110] sm:$0xff]  ;;  %v174_v52 = vld [vmem:[%s8628_s3 + $0x128] sm:$0xff]  ;;  %vm753_vm5 = vcmask 1042434  }
   0x4   :  { %v169_v44 = vld [vmem:[%s8628_s3 + $0x100] sm:$0xff]  ;;  %v175_v56 = vld [vmem:[%s8628_s3 + $0x130] sm:$0xff]  ;;  %v178_v63 = vld [vmem:[%s8628_s3 + $0x148] sm:$0xff]  ;;  %vm755_vm6 = vcmask 1043459   ;;  %vm773_vm7 = vcmask 1043456   ;;  %vm757_vm8 = vcmask 1044484  }
   0x5   :  { %8715 = vst [vmem:[#allocation2_spill] sm:$0xff] %v6866_v5  ;;  %6069 = vmatprep.mubr.msk.f32.mxu1 %vm218_vm2, %v6866_v5  ;;  %8716 = vst [vmem:[#allocation3_spill] sm:$0xff] %v6878_v12  ;;  %v6887_v15 = vsub.s32 0, %v301_v14  ;;  %v6889_v17 = vsub.s32 1, %v301_v14  ;;  %v6892_v19 = vsub.s32 2, %v301_v14  ;;  %v6896_v22 = vsub.s32 3, %v301_v14 }
   0x6   :  { %v6903_v29 = vsub.s32 4, %v301_v14  ;;  %v6906_v31 = vsub.s32 5, %v301_v14  ;;  %v6909_v33 = vsub.s32 6, %v301_v14  ;;  %v6912_v35 = vsub.s32 7, %v301_v14  ;;  %v173_v53 = vld [vmem:[%s8628_s3 + $0x120] sm:$0xff]  ;;  %v179_v14 = vld [vmem:[%s8628_s3 + $0x150] sm:$0xff] }
   0x7   :  { %8717 = vst [vmem:[#allocation4_spill] sm:$0xff] %v6887_v15  ;;  %8718 = vst [vmem:[#allocation5_spill] sm:$0xff] %v6889_v17  ;;  %v177_v62 = vld [vmem:[%s8628_s3 + $0x140] sm:$0xff]  ;;  %vm759_vm9 = vcmask 1045509   ;;  %vm761_vm10 = vcmask 1046534   ;;  %vm763_vm11 = vcmask 1047559  }
   0x8   :  { %v54_v1 = vld [vmem:[%s8714_s23 + $0x8] sm:$0xff]  ;;  %v53_v2 = vld [vmem:[%s8714_s23] sm:$0xff]  ;;  %8719 = vst [vmem:[#allocation6_spill] sm:$0xff] %v6892_v19  ;;  %8720 = vst [vmem:[#allocation7_spill] sm:$0xff] %v6896_v22  ;;  %vm769_vm12 = vcmask 97280   ;;  %vm4144_vm14 = vcmask 58368  }
   0x9   :  { %6061 = vmatpush3.msra.mxu0 %v54_v1  ;;  %8721 = vst [vmem:[#allocation8_spill] sm:$0xff] %v6903_v29  ;;  %8722 = vst [vmem:[#allocation9_spill] sm:$0xff] %v6906_v31  ;;  %v182_v1 = vld [vmem:[%s8628_s3 + $0x168] sm:$0xff]  ;;  %vm5733_vm15 = vcmask 254976  }
   0xa   :  { %6062 = vmatprep.subr.mxu0 %v8642_v0  ;;  %8723 = vst [vmem:[#allocation10_spill] sm:$0xff] %v6909_v33  ;;  %8724 = vst [vmem:[#allocation11_spill] sm:$0xff] %v6912_v35 }
   0xb   :  { %6063 = vmatpush3.msra.mxu0 %v53_v2  ;;  %v181_v2 = vld [vmem:[%s8628_s3 + $0x160] sm:$0xff] }
   0xc   :  { %6065 = vmatmul.mubr.msk.f32.vlgmr.msra.gmra.mxu0 %vm62_vm1, %v52_v3  ;;  %6079 = vmatprep.subr.mxu0 %v8642_v0  ;;  %v172_v3 = vld [vmem:[%s8628_s3 + $0x118] sm:$0xff] }
   0xd   :  { %6087 = vmatprep.mubr.msk.f32.mxu0 %vm6761_vm0, %v8642_v0  ;;  %6080 = vmatpush3.msra.mxu0 %v6924_v45 }
   0xe   :  { %6081 = vmatprep.subr.mxu0 %v8642_v0 }
   0xf   :  { %6082 = vmatpush3.msra.mxu0 %v6929_v46 }
  0x10   :  { %6083 = vmatprep.subr.mxu0 %v8642_v0 }
  0xcc   :  { %v132_v7 = vpop.f32.mrf.mxu0 }
  0xcd   :  { %v133_v9 = vadd.f32 %v5744_v6, %v132_v7 }
  0xce   :  { %v6066_v10 = vpop.f32.mrf.mxu0 }
  0xcf   :  { %v6876_v11 = vmax.f32 %v133_v9, 0.0 }
  0xd1   :  { %6067 = vmatprep.subr.mxu1 %v6876_v11 }
  0xd2   :  { %6068 = vmatpush3.msra.mxu1 %v6876_v11 }
  0xd3   :  { %6070 = vmatmul.mubr.msk.f32.vlgmr.msra.gmra.mxu1 %vm218_vm2, %v6878_v12  ;;  %6072 = vmatprep.subr.mxu1 %v8642_v0 }
  0xd4   :  { %6076 = vmatprep.mubr.msk.f32.mxu1 %vm6761_vm0, %v8642_v0 }
 0x193   :  { %v6071_v16 = vpop.f32.mrf.mxu1 }
 0x194   :  { %v455_v18 = vrot.slane %v6071_v16, %v6887_v15  ;;  %v474_v20 = vrot.slane %v6071_v16, %v6889_v17  ;;  %v493_v21 = vrot.slane %v6071_v16, %v6892_v19  ;;  %v512_v23 = vrot.slane %v6071_v16, %v6896_v22 }
 0x195   :  { %v291_v24 = vpop.f32.mrf.mxu1 }
 0x196   :  { %461 = vbcast.lane.b32.xlu1 %v455_v18, 264  ;;  %457 = vbcast.lane.b32.xlu0 %v455_v18, 256  ;;  %v322_v25 = vrot.slane %v291_v24, %v6889_v17  ;;  %v303_v26 = vrot.slane %v291_v24, %v6887_v15  ;;  %v341_v27 = vrot.slane %v291_v24, %v6892_v19 }
 0x197   :  { %v360_v28 = vrot.slane %v291_v24, %v6896_v22  ;;  %v379_v30 = vrot.slane %v291_v24, %v6903_v29  ;;  %v398_v32 = vrot.slane %v291_v24, %v6906_v31  ;;  %v417_v34 = vrot.slane %v291_v24, %v6909_v33 }
 0x198   :  { %v436_v36 = vrot.slane %v291_v24, %v6912_v35 }
 0x19a   :  { %480 = vbcast.lane.b32.xlu1 %v474_v20, 264  ;;  %476 = vbcast.lane.b32.xlu0 %v474_v20, 256 }
 0x19e   :  { %495 = vbcast.lane.b32.xlu1 %v493_v21, 256  ;;  %499 = vbcast.lane.b32.xlu0 %v493_v21, 264 }
 0x1a2   :  { %484 = vbcast.lane.b32.xlu1 %v474_v20, 272  ;;  %465 = vbcast.lane.b32.xlu0 %v455_v18, 272 }
 0x1a6   :  { %518 = vbcast.lane.b32.xlu1 %v512_v23, 264  ;;  %514 = vbcast.lane.b32.xlu0 %v512_v23, 256 }
 0x1aa   :  { %469 = vbcast.lane.b32.xlu1 %v455_v18, 280  ;;  %503 = vbcast.lane.b32.xlu0 %v493_v21, 272 }
 0x1ae   :  { %522 = vbcast.lane.b32.xlu1 %v512_v23, 272  ;;  %488 = vbcast.lane.b32.xlu0 %v474_v20, 280 }
 0x1b2   :  { %526 = vbcast.lane.b32.xlu1 %v512_v23, 280  ;;  %507 = vbcast.lane.b32.xlu0 %v493_v21, 280 }
 0x1b6   :  { %324 = vbcast.lane.b32.xlu1 %v322_v25, 256  ;;  %305 = vbcast.lane.b32.xlu0 %v303_v26, 256 }
 0x1ba   :  { %328 = vbcast.lane.b32.xlu1 %v322_v25, 264  ;;  %309 = vbcast.lane.b32.xlu0 %v303_v26, 264 }
 0x1be   :  { %347 = vbcast.lane.b32.xlu1 %v341_v27, 264  ;;  %343 = vbcast.lane.b32.xlu0 %v341_v27, 256 }
 0x1c2   :  { %332 = vbcast.lane.b32.xlu1 %v322_v25, 272  ;;  %313 = vbcast.lane.b32.xlu0 %v303_v26, 272 }
 0x1c6   :  { %366 = vbcast.lane.b32.xlu1 %v360_v28, 264  ;;  %362 = vbcast.lane.b32.xlu0 %v360_v28, 256 }
 0x1ca   :  { %381 = vbcast.lane.b32.xlu1 %v379_v30, 256  ;;  %351 = vbcast.lane.b32.xlu0 %v341_v27, 272 }
 0x1ce   :  { %317 = vbcast.lane.b32.xlu1 %v303_v26, 280  ;;  %385 = vbcast.lane.b32.xlu0 %v379_v30, 264  ;;  %v176_v26 = vld [vmem:[%s8628_s3 + $0x138] sm:$0xff] }
 0x1d2   :  { %370 = vbcast.lane.b32.xlu1 %v360_v28, 272  ;;  %336 = vbcast.lane.b32.xlu0 %v322_v25, 280  ;;  %v183_v25 = vld [vmem:[%s8628_s3 + $0x170] sm:$0xff] }
 0x1d6   :  { %404 = vbcast.lane.b32.xlu1 %v398_v32, 264  ;;  %400 = vbcast.lane.b32.xlu0 %v398_v32, 256 }
 0x1da   :  { %389 = vbcast.lane.b32.xlu1 %v379_v30, 272  ;;  %355 = vbcast.lane.b32.xlu0 %v341_v27, 280 }
 0x1de   :  { %423 = vbcast.lane.b32.xlu1 %v417_v34, 264  ;;  %419 = vbcast.lane.b32.xlu0 %v417_v34, 256 }
 0x1e2   :  { %374 = vbcast.lane.b32.xlu1 %v360_v28, 280  ;;  %408 = vbcast.lane.b32.xlu0 %v398_v32, 272 }
 0x1e6   :  { %438 = vbcast.lane.b32.xlu1 %v436_v36, 256  ;;  %442 = vbcast.lane.b32.xlu0 %v436_v36, 264 }
 0x1ea   :  { %427 = vbcast.lane.b32.xlu1 %v417_v34, 272  ;;  %393 = vbcast.lane.b32.xlu0 %v379_v30, 280 }
 0x1ee   :  { %412 = vbcast.lane.b32.xlu1 %v398_v32, 280  ;;  %446 = vbcast.lane.b32.xlu0 %v436_v36, 272 }
 0x1f2   :  { %450 = vbcast.lane.b32.xlu1 %v436_v36, 280  ;;  %431 = vbcast.lane.b32.xlu0 %v417_v34, 280 }
 0x208   :  { %v462_v37 = vpop.permute.xlu1 %461  ;;  %v458_v38 = vpop.permute.xlu0 %457 }
 0x209   :  { %v561_v50 = vmul.f32 %v462_v37, %v170_v43  ;;  %v560_v51 = vmul.f32 %v458_v38, %v169_v44 }
 0x20b   :  { %v682_v59 = vsel %vm576_vm3, %v561_v50, 0.0  ;;  %v681_v60 = vsel %vm576_vm3, %v560_v51, 0.0 }
 0x20c   :  { %v481_v39 = vpop.permute.xlu1 %480  ;;  %v477_v40 = vpop.permute.xlu0 %476  ;;  %v683_v7 = vadd.f32 %v682_v59, %v681_v60 }
 0x20d   :  { %v565_v55 = vmul.f32 %v481_v39, %v174_v52  ;;  %v564_v61 = vmul.f32 %v477_v40, %v173_v53 }
 0x20f   :  { %v695_v8 = vsel %vm576_vm3, %v565_v55, 0.0  ;;  %v694_v18 = vsel %vm576_vm3, %v564_v61, 0.0 }
 0x210   :  { %v496_v41 = vpop.permute.xlu1 %495  ;;  %v500_v42 = vpop.permute.xlu0 %499  ;;  %v696_v32 = vadd.f32 %v695_v8, %v694_v18 }
 0x211   :  { %v568_v9 = vmul.f32 %v496_v41, %v177_v62  ;;  %v569_v10 = vmul.f32 %v500_v42, %v178_v63 }
 0x213   :  { %v707_v34 = vsel %vm576_vm3, %v568_v9, 0.0  ;;  %v708_v36 = vsel %vm576_vm3, %v569_v10, 0.0 }
 0x214   :  { %v485_v47 = vpop.permute.xlu1 %484  ;;  %v466_v49 = vpop.permute.xlu0 %465  ;;  %v709_v53 = vadd.f32 %v708_v36, %v707_v34 }
 0x215   :  { %v562_v54 = vmul.f32 %v466_v49, %v171_v48  ;;  %v566_v4 = vmul.f32 %v485_v47, %v175_v56  ;;  %v184_v48 = vld [vmem:[%s8628_s3 + $0x178] sm:$0xff] }
 0x216   :  { %v180_v49 = vld [vmem:[%s8628_s3 + $0x158] sm:$0xff] }
 0x217   :  { %v684_v6 = vsel %vm576_vm3, %v562_v54, 0.0  ;;  %v697_v27 = vsel %vm576_vm3, %v566_v4, 0.0 }
 0x218   :  { %v519_v57 = vpop.permute.xlu1 %518  ;;  %v515_v58 = vpop.permute.xlu0 %514  ;;  %v685_v24 = vadd.f32 %v684_v6, %v683_v7  ;;  %v698_v44 = vadd.f32 %v697_v27, %v696_v32 }
 0x219   :  { %v573_v20 = vmul.f32 %v519_v57, %v182_v1  ;;  %v572_v21 = vmul.f32 %v515_v58, %v181_v2 }
 0x21b   :  { %v721_v40 = vsel %vm576_vm3, %v573_v20, 0.0  ;;  %v720_v41 = vsel %vm576_vm3, %v572_v21, 0.0 }
 0x21c   :  { %v470_v13 = vpop.permute.xlu1 %469  ;;  %v504_v16 = vpop.permute.xlu0 %503  ;;  %v722_v54 = vadd.f32 %v721_v40, %v720_v41 }
 0x21d   :  { %v563_v23 = vmul.f32 %v470_v13, %v172_v3  ;;  %v570_v30 = vmul.f32 %v504_v16, %v179_v14 }
 0x21f   :  { %v686_v28 = vsel %vm576_vm3, %v563_v23, 0.0  ;;  %v710_v50 = vsel %vm576_vm3, %v570_v30, 0.0 }
 0x220   :  { %v687_v37 = vadd.f32 %v686_v28, %v685_v24  ;;  %v523_v38 = vpop.permute.xlu1 %522  ;;  %v489_v39 = vpop.permute.xlu0 %488  ;;  %v711_v61 = vadd.f32 %v710_v50, %v709_v53 }
 0x221   :  { %v574_v42 = vmul.f32 %v523_v38, %v183_v25  ;;  %v567_v43 = vmul.f32 %v489_v39, %v176_v26 }
 0x222   :  { %v688_v47 = vrot.slane %v687_v37, 4 }
 0x223   :  { %v723_v51 = vsel %vm576_vm3, %v574_v42, 0.0  ;;  %v699_v52 = vsel %vm576_vm3, %v567_v43, 0.0 }
 0x224   :  { %v689_v55 = vadd.f32 %v688_v47, %v687_v37  ;;  %v700_v56 = vadd.f32 %v699_v52, %v698_v44  ;;  %v527_v57 = vpop.permute.xlu1 %526  ;;  %v508_v58 = vpop.permute.xlu0 %507  ;;  %v724_v62 = vadd.f32 %v723_v51, %v722_v54 }
 0x225   :  { %v575_v59 = vmul.f32 %v527_v57, %v184_v48  ;;  %v571_v60 = vmul.f32 %v508_v58, %v180_v49 }
 0x226   :  { %v701_v63 = vrot.slane %v700_v56, 4  ;;  %v690_v1 = vrot.slane %v689_v55, 2 }
 0x227   :  { %v725_v2 = vsel %vm576_vm3, %v575_v59, 0.0  ;;  %v712_v3 = vsel %vm576_vm3, %v571_v60, 0.0  ;;  %v141_v59 = vld [vmem:[%s8628_s3 + $0x20] sm:$0xff]  ;;  %v146_v60 = vld [vmem:[%s8628_s3 + $0x48] sm:$0xff] }
 0x228   :  { %v702_v4 = vadd.f32 %v701_v63, %v700_v56  ;;  %v726_v6 = vadd.f32 %v725_v2, %v724_v62  ;;  %v713_v7 = vadd.f32 %v712_v3, %v711_v61  ;;  %v325_v8 = vpop.permute.xlu1 %324  ;;  %v6993_v9 = vpop.permute.xlu0 %305  ;;  %v691_v16 = vadd.f32 %v690_v1, %v689_v55  ;;  %v142_v56 = vld [vmem:[%s8628_s3 + $0x28] sm:$0xff]  ;;  %v145_v61 = vld [vmem:[%s8628_s3 + $0x40] sm:$0xff]  ;;  %v143_v62 = vld [vmem:[%s8628_s3 + $0x30] sm:$0xff] }
 0x229   :  { %v138_v1 = vld [vmem:[%s8628_s3 + $0x8] sm:$0xff]  ;;  %v532_v2 = vmul.f32 %v325_v8, %v141_v59  ;;  %v137_v3 = vld [vmem:[%s8628_s3] sm:$0xff]  ;;  %v139_v8 = vld [vmem:[%s8628_s3 + $0x10] sm:$0xff] }
 0x22a   :  { %v703_v10 = vrot.slane %v702_v4, 2  ;;  %v727_v13 = vrot.slane %v726_v6, 4  ;;  %v714_v14 = vrot.slane %v713_v7, 4  ;;  %v692_v28 = vrot.slane %v691_v16, 1 }
 0x22c   :  { %v704_v18 = vadd.f32 %v703_v10, %v702_v4  ;;  %v728_v20 = vadd.f32 %v727_v13, %v726_v6  ;;  %v715_v21 = vadd.f32 %v714_v14, %v713_v7  ;;  %v329_v23 = vpop.permute.xlu1 %328  ;;  %v310_v24 = vpop.permute.xlu0 %309  ;;  %v693_v40 = vadd.f32 %v692_v28, %v691_v16  ;;  %v147_v7 = vld [vmem:[%s8628_s3 + $0x50] sm:$0xff]  ;;  %v144_v10 = vld [vmem:[%s8628_s3 + $0x38] sm:$0xff] }
 0x22d   :  { %v533_v63 = vmul.f32 %v329_v23, %v142_v56  ;;  %v148_v23 = vld [vmem:[%s8628_s3 + $0x58] sm:$0xff] }
 0x22e   :  { %v705_v25 = vrot.slane %v704_v18, 1  ;;  %v729_v26 = vrot.slane %v728_v20, 2  ;;  %v716_v27 = vrot.slane %v715_v21, 2 }
 0x230   :  { %v730_v30 = vadd.f32 %v729_v26, %v728_v20  ;;  %v717_v32 = vadd.f32 %v716_v27, %v715_v21  ;;  %v348_v34 = vpop.permute.xlu1 %347  ;;  %v344_v36 = vpop.permute.xlu0 %343  ;;  %v706_v37 = vadd.f32 %v705_v25, %v704_v18  ;;  %v529_v18 = vmul.f32 %v310_v24, %v138_v1  ;;  %v150_v20 = vld [vmem:[%s8628_s3 + $0x68] sm:$0xff]  ;;  %v149_v21 = vld [vmem:[%s8628_s3 + $0x60] sm:$0xff] }
 0x231   :  { %v537_v4 = vmul.f32 %v348_v34, %v146_v60  ;;  %v536_v6 = vmul.f32 %v344_v36, %v145_v61  ;;  %v528_v25 = vmul.f32 %v6993_v9, %v137_v3  ;;  %v591_v26 = vsel %vm576_vm3, %v533_v63, 0.0  ;;  %v140_v36 = vld [vmem:[%s8628_s3 + $0x18] sm:$0xff] }
 0x232   :  { %v731_v38 = vrot.slane %v730_v30, 1  ;;  %v718_v39 = vrot.slane %v717_v32, 1  ;;  %v765_v47 = vsel %vm751_vm4, %v706_v37, %v693_v40  ;;  %v590_v24 = vsel %vm576_vm3, %v532_v2, 0.0  ;;  %v151_v37 = vld [vmem:[%s8628_s3 + $0x70] sm:$0xff]  ;;  %v7071_v2 = vld [vmem:[%s8628_s3 + $0x88] sm:$0xff] }
 0x233   :  { %v577_v56 = vsel %vm576_vm3, %v528_v25, 0.0 }
 0x234   :  { %v719_v41 = vadd.f32 %v718_v39, %v717_v32  ;;  %v333_v42 = vpop.permute.xlu1 %332  ;;  %v314_v43 = vpop.permute.xlu0 %313  ;;  %v732_v44 = vadd.f32 %v731_v38, %v730_v30  ;;  %v604_v30 = vsel %vm576_vm3, %v537_v4, 0.0  ;;  %v603_v32 = vsel %vm576_vm3, %v536_v6, 0.0  ;;  %v7076_v4 = vld [vmem:[%s8628_s3 + $0x78] sm:$0xff] }
 0x235   :  { %v534_v16 = vmul.f32 %v333_v42, %v143_v62  ;;  %v530_v34 = vmul.f32 %v314_v43, %v139_v8 }
 0x236   :  { %v766_v48 = vsel %vm753_vm5, %v719_v41, %v765_v47  ;;  %v578_v47 = vsel %vm576_vm3, %v529_v18, 0.0  ;;  %v7088_v18 = vld [vmem:[%s8628_s3 + $0xa0] sm:$0xff] }
 0x237   :  { %v767_v49 = vsel %vm755_vm6, %v732_v44, %v766_v48  ;;  %v593_v39 = vsel %vm576_vm3, %v534_v16, 0.0  ;;  %v592_v44 = vadd.f32 %v591_v26, %v590_v24  ;;  %v580_v62 = vsel %vm576_vm3, %v530_v34, 0.0 }
 0x238   :  { %6073 = vmatpush3.msk.msra.mxu1 %vm773_vm7, %v767_v49  ;;  %v367_v50 = vpop.permute.xlu1 %366  ;;  %v363_v51 = vpop.permute.xlu0 %362  ;;  %v579_v1 = vadd.f32 %v578_v47, %v577_v56 }
 0x239   :  { %6074 = vmatprep.subr.mxu1 %v8642_v0  ;;  %v541_v40 = vmul.f32 %v367_v50, %v150_v20  ;;  %v540_v41 = vmul.f32 %v363_v51, %v149_v21  ;;  %v594_v59 = vadd.f32 %v593_v39, %v592_v44  ;;  %v7093_v20 = vld [vmem:[%s8628_s3 + $0x90] sm:$0xff] }
 0x23a   :  { %v581_v16 = vadd.f32 %v580_v62, %v579_v1 }
 0x23b   :  { %v617_v50 = vsel %vm576_vm3, %v541_v40, 0.0  ;;  %v616_v51 = vsel %vm576_vm3, %v540_v41, 0.0 }
 0x23c   :  { %v7000_v52 = vpop.permute.xlu1 %381  ;;  %v352_v53 = vpop.permute.xlu0 %351  ;;  %v618_v8 = vadd.f32 %v617_v50, %v616_v51 }
 0x23d   :  { %v538_v27 = vmul.f32 %v352_v53, %v147_v7 }
 0x23f   :  { %v606_v43 = vsel %vm576_vm3, %v538_v27, 0.0 }
 0x240   :  { %v318_v54 = vpop.permute.xlu1 %317  ;;  %v7002_v55 = vpop.permute.xlu0 %385 }
 0x241   :  { %v531_v48 = vmul.f32 %v318_v54, %v140_v36  ;;  %v7066_v54 = vld [vmem:[%s8628_s3 + $0x80] sm:$0xff]  ;;  %v545_v27 = vmul.f32 %v7002_v55, %v7071_v2 }
 0x242   :  { %v544_v26 = vmul.f32 %v7000_v52, %v7066_v54  ;;  %v7107_v52 = vld [vmem:[%s8628_s3 + $0xb0] sm:$0xff] }
 0x243   :  { %v582_v6 = vsel %vm576_vm3, %v531_v48, 0.0  ;;  %v7125_v48 = vld [vmem:[%s8628_s3 + $0xe0] sm:$0xff] }
 0x244   :  { %v371_v57 = vpop.permute.xlu1 %370  ;;  %v337_v58 = vpop.permute.xlu0 %336  ;;  %v583_v24 = vadd.f32 %v582_v6, %v581_v16 }
 0x245   :  { %v535_v28 = vmul.f32 %v337_v58, %v144_v10  ;;  %v542_v49 = vmul.f32 %v371_v57, %v151_v37  ;;  %v605_v58 = vadd.f32 %v604_v30, %v603_v32  ;;  %v7083_v10 = vld [vmem:[%s8628_s3 + $0xa8] sm:$0xff] }
 0x246   :  { %v584_v44 = vrot.slane %v583_v24, 4 }
 0x247   :  { %v595_v53 = vsel %vm576_vm3, %v535_v28, 0.0  ;;  %v607_v57 = vadd.f32 %v606_v43, %v605_v58  ;;  %v619_v7 = vsel %vm576_vm3, %v542_v49, 0.0  ;;  %v7130_v49 = vld [vmem:[%s8628_s3 + $0xe8] sm:$0xff] }
 0x248   :  { %v405_v13 = vpop.permute.xlu1 %404  ;;  %v401_v14 = vpop.permute.xlu0 %400  ;;  %v596_v3 = vadd.f32 %v595_v53, %v594_v59  ;;  %v620_v30 = vadd.f32 %v619_v7, %v618_v8  ;;  %v7135_v53 = vld [vmem:[%s8628_s3 + $0x98] sm:$0xff] }
 0x249   :  { %v549_v34 = vmul.f32 %v405_v13, %v7083_v10  ;;  %v548_v36 = vmul.f32 %v401_v14, %v7088_v18  ;;  %v7113_v13 = vld [vmem:[%s8628_s3 + $0xc8] sm:$0xff]  ;;  %v7118_v14 = vld [vmem:[%s8628_s3 + $0xc0] sm:$0xff] }
 0x24a   :  { %v597_v32 = vrot.slane %v596_v3, 4 }
 0x24b   :  { %v643_v43 = vsel %vm576_vm3, %v549_v34, 0.0  ;;  %v642_v56 = vsel %vm576_vm3, %v548_v36, 0.0 }
 0x24c   :  { %v390_v9 = vpop.permute.xlu1 %389  ;;  %v356_v38 = vpop.permute.xlu0 %355  ;;  %v598_v47 = vadd.f32 %v597_v32, %v596_v3 }
 0x24d   :  { %v539_v42 = vmul.f32 %v356_v38, %v148_v23  ;;  %v546_v37 = vmul.f32 %v390_v9, %v7093_v20  ;;  %v629_v9 = vsel %vm576_vm3, %v544_v26, 0.0 }
 0x24f   :  { %v608_v63 = vsel %vm576_vm3, %v539_v42, 0.0  ;;  %v630_v42 = vsel %vm576_vm3, %v545_v27, 0.0  ;;  %v632_v58 = vsel %vm576_vm3, %v546_v37, 0.0 }
 0x250   :  { %v424_v60 = vpop.permute.xlu1 %423  ;;  %v420_v61 = vpop.permute.xlu0 %419  ;;  %v609_v21 = vadd.f32 %v608_v63, %v607_v57  ;;  %v631_v50 = vadd.f32 %v630_v42, %v629_v9  ;;  %v7145_v57 = vld [vmem:[%s8628_s3 + $0xd0] sm:$0xff] }
 0x251   :  { %v553_v63 = vmul.f32 %v424_v60, %v7113_v13  ;;  %v552_v1 = vmul.f32 %v420_v61, %v7118_v14  ;;  %v7153_v60 = vld [vmem:[%s8628_s3 + $0xb8] sm:$0xff]  ;;  %v7158_v61 = vld [vmem:[%s8628_s3 + $0xf0] sm:$0xff] }
 0x252   :  { %v610_v39 = vrot.slane %v609_v21, 4  ;;  %v633_v26 = vadd.f32 %v632_v58, %v631_v50  ;;  %8725 = vst [vmem:[#allocation12_spill] sm:$0xff] %v7158_v61  ;;  %v7177_v58 = vld [vmem:[%s8628_s3 + $0xd8] sm:$0xff] }
 0x253   :  { %v656_v34 = vsel %vm576_vm3, %v553_v63, 0.0  ;;  %v655_v36 = vsel %vm576_vm3, %v552_v1, 0.0 }
 0x254   :  { %v375_v23 = vpop.permute.xlu1 %374  ;;  %v409_v25 = vpop.permute.xlu0 %408  ;;  %v611_v51 = vadd.f32 %v610_v39, %v609_v21  ;;  %v644_v21 = vadd.f32 %v643_v43, %v642_v56  ;;  %v7172_v56 = vld [vmem:[%s8628_s3 + $0xf8] sm:$0xff]  ;;  %v657_v1 = vadd.f32 %v656_v34, %v655_v36 }
 0x255   :  { %v543_v28 = vmul.f32 %v375_v23, %v7076_v4  ;;  %v550_v62 = vmul.f32 %v409_v25, %v7107_v52  ;;  %v585_v23 = vadd.f32 %v584_v44, %v583_v24  ;;  %v599_v25 = vrot.slane %v598_v47, 2 }
 0x256   :  { %v612_v32 = vrot.slane %v611_v51, 2 }
 0x257   :  { %v621_v38 = vsel %vm576_vm3, %v543_v28, 0.0  ;;  %v645_v28 = vsel %vm576_vm3, %v550_v62, 0.0  ;;  %v586_v9 = vrot.slane %v585_v23, 2 }
 0x258   :  { %v622_v40 = vadd.f32 %v621_v38, %v620_v30  ;;  %v439_v55 = vpop.permute.xlu1 %438  ;;  %v443_v41 = vpop.permute.xlu0 %442  ;;  %v646_v44 = vadd.f32 %v645_v28, %v644_v21  ;;  %v600_v21 = vadd.f32 %v599_v25, %v598_v47 }
 0x259   :  { %v556_v7 = vmul.f32 %v439_v55, %v7125_v48  ;;  %v557_v16 = vmul.f32 %v443_v41, %v7130_v49 }
 0x25a   :  { %v623_v59 = vrot.slane %v622_v40, 4  ;;  %v601_v47 = vrot.slane %v600_v21, 1 }
 0x25b   :  { %v668_v55 = vsel %vm576_vm3, %v556_v7, 0.0  ;;  %v669_v41 = vsel %vm576_vm3, %v557_v16, 0.0 }
 0x25c   :  { %v428_v3 = vpop.permute.xlu1 %427  ;;  %v394_v6 = vpop.permute.xlu0 %393  ;;  %v624_v27 = vadd.f32 %v623_v59, %v622_v40 }
 0x25d   :  { %v547_v8 = vmul.f32 %v394_v6, %v7135_v53  ;;  %v554_v30 = vmul.f32 %v428_v3, %v7145_v57  ;;  %v670_v3 = vadd.f32 %v669_v41, %v668_v55 }
 0x25e   :  { %v625_v59 = vrot.slane %v624_v27, 2 }
 0x25f   :  { %v634_v24 = vsel %vm576_vm3, %v547_v8, 0.0  ;;  %v658_v62 = vsel %vm576_vm3, %v554_v30, 0.0 }
 0x260   :  { %v635_v37 = vadd.f32 %v634_v24, %v633_v26  ;;  %v413_v38 = vpop.permute.xlu1 %412  ;;  %v447_v39 = vpop.permute.xlu0 %446  ;;  %v613_v26 = vadd.f32 %v612_v32, %v611_v51 }
 0x261   :  { %v551_v40 = vmul.f32 %v413_v38, %v7153_v60  ;;  %v558_v42 = vmul.f32 %v447_v39, %v7158_v61  ;;  %v659_v38 = vadd.f32 %v658_v62, %v657_v1  ;;  %v587_v61 = vadd.f32 %v586_v9, %v585_v23 }
 0x262   :  { %v636_v43 = vrot.slane %v635_v37, 4  ;;  %v614_v51 = vrot.slane %v613_v26, 1 }
 0x263   :  { %v647_v50 = vsel %vm576_vm3, %v551_v40, 0.0  ;;  %v671_v63 = vsel %vm576_vm3, %v558_v42, 0.0  ;;  %v626_v40 = vadd.f32 %v625_v59, %v624_v27  ;;  %v602_v27 = vadd.f32 %v601_v47, %v600_v21  ;;  %v189_v21 = vld [vmem:[%s8630_s5] sm:$0xf]  ;;  %v7201_v47 = vld [vmem:[%s8631_s8 + $0x18] sm:$0xff] }
 0x264   :  { %v637_v6 = vadd.f32 %v636_v43, %v635_v37  ;;  %v648_v7 = vadd.f32 %v647_v50, %v646_v44  ;;  %v451_v16 = vpop.permute.xlu1 %450  ;;  %v432_v8 = vpop.permute.xlu0 %431  ;;  %v672_v30 = vadd.f32 %v671_v63, %v670_v3  ;;  %v588_v43 = vrot.slane %v587_v61, 1 }
 0x265   :  { %v559_v28 = vmul.f32 %v451_v16, %v7172_v56  ;;  %v555_v24 = vmul.f32 %v432_v8, %v7177_v58  ;;  %v627_v62 = vrot.slane %v626_v40, 1  ;;  %v615_v9 = vadd.f32 %v614_v51, %v613_v26 }
 0x266   :  { %v638_v39 = vrot.slane %v637_v6, 2  ;;  %v649_v0 = vrot.slane %v648_v7, 4  ;;  %v8726_v51 = vmov 0.0  }
 0x267   :  { %v673_v42 = vsel %vm576_vm3, %v559_v28, 0.0  ;;  %v660_v34 = vsel %vm576_vm3, %v555_v24, 0.0 }
 0x268   :  { %v639_v36 = vadd.f32 %v638_v39, %v637_v6  ;;  %v650_v37 = vadd.f32 %v649_v0, %v648_v7  ;;  %v674_v55 = vadd.f32 %v673_v42, %v672_v30  ;;  %v661_v41 = vadd.f32 %v660_v34, %v659_v38 }
 0x269   :  { %v589_v6 = vadd.f32 %v588_v43, %v587_v61  ;;  %v628_v0 = vadd.f32 %v627_v62, %v626_v40  ;;  %v7232_v43 = vld [vmem:[%s8631_s8 + $0x38] sm:$0xff]  ;;  %v7241_v62 = vld [vmem:[%s8631_s8 + $0x30] sm:$0xff] }
 0x26a   :  { %v651_v25 = vrot.slane %v650_v37, 2  ;;  %v675_v32 = vrot.slane %v674_v55, 4  ;;  %v662_v44 = vrot.slane %v661_v41, 4  ;;  %v640_v50 = vrot.slane %v639_v36, 1 }
 0x26b   :  { %v752_v24 = vsel %vm751_vm4, %v602_v27, %v589_v6  ;;  %v7282_v27 = vld [vmem:[%s8631_s8 + $0x48] sm:$0xff] }
 0x26c   :  { %v652_v1 = vadd.f32 %v651_v25, %v650_v37  ;;  %v676_v63 = vadd.f32 %v675_v32, %v674_v55  ;;  %v663_v23 = vadd.f32 %v662_v44, %v661_v41  ;;  %v641_v7 = vadd.f32 %v640_v50, %v639_v36  ;;  %v7209_v25 = vld [vmem:[%s8631_s8 + $0x10] sm:$0xff]  ;;  %v7218_v32 = vld [vmem:[%s8631_s8 + $0x8] sm:$0xff]  ;;  %v7225_v44 = vld [vmem:[%s8631_s8] sm:$0xff] }
 0x26d   :  { %v754_v42 = vsel %vm753_vm5, %v615_v9, %v752_v24  ;;  %v7194_v37 = vunpack.c.l.bf16 %v189_v21  ;;  %v7250_v50 = vld [vmem:[%s8631_s8 + $0x28] sm:$0xff]  ;;  %v7289_v9 = vld [vmem:[%s8631_s8 + $0x40] sm:$0xff]  ;;  %v7328_v24 = vld [vmem:[%s8629_s7 + $0x30] sm:$0xff] }
 0x26e   :  { %v653_v59 = vrot.slane %v652_v1, 1  ;;  %v677_v3 = vrot.slane %v676_v63, 2  ;;  %v664_v16 = vrot.slane %v663_v23, 2  ;;  %v756_v26 = vsel %vm755_vm6, %v628_v0, %v754_v42  ;;  %8727 = vst [vmem:[#allocation13_spill] sm:$0xff] %v7289_v9  ;;  %8730 = vst [vmem:[#allocation16_spill] sm:$0xff] %v7328_v24  ;;  %v7351_v21 = vld [vmem:[%s8629_s7 + $0x58] sm:$0xff] }
 0x26f   :  { %v758_v34 = vsel %vm757_vm8, %v641_v7, %v756_v26  ;;  %8733 = vst [vmem:[#allocation19_spill] sm:$0xff] %v7351_v21  ;;  %v7359_v26 = vld [vmem:[%s8629_s7 + $0x50] sm:$0xff] }
 0x270   :  { %v678_v8 = vadd.f32 %v677_v3, %v676_v63  ;;  %v665_v28 = vadd.f32 %v664_v16, %v663_v23  ;;  %v654_v38 = vadd.f32 %v653_v59, %v652_v1  ;;  %v7257_v1 = vld [vmem:[%s8631_s8 + $0x20] sm:$0xff]  ;;  %v7264_v63 = vld [vmem:[%s8631_s8 + $0x58] sm:$0xff]  ;;  %v7273_v23 = vld [vmem:[%s8631_s8 + $0x50] sm:$0xff]  ;;  %8734 = vst [vmem:[#allocation20_spill] sm:$0xff] %v7359_v26 }
 0x271   :  { %v7302_v59 = vld [vmem:[%s8629_s7 + $0x8] sm:$0xff]  ;;  %v7308_v3 = vld [vmem:[%s8629_s7] sm:$0xff] }
 0x272   :  { %v666_v39 = vrot.slane %v665_v28, 1  ;;  %v679_v30 = vrot.slane %v678_v8, 1  ;;  %v760_v36 = vsel %vm759_vm9, %v654_v38, %v758_v34  ;;  %6084 = vmatpush3.msra.mxu0 %v7302_v59  ;;  %v7316_v16 = vld [vmem:[%s8632_s6] ss:$0 sm:$0xff]  ;;  %v7337_v38 = vld [vmem:[%s8629_s7 + $0x28] sm:$0xff] }
 0x273   :  { %6085 = vmatprep.subr.mxu0 %v8726_v51  ;;  %8728 = vst [vmem:[#allocation14_spill] sm:$0xff] %v7316_v16  ;;  %8731 = vst [vmem:[#allocation17_spill] sm:$0xff] %v7337_v38  ;;  %v7375_v34 = vld [vmem:[%s8629_s7 + $0x40] sm:$0xff] }
 0x274   :  { %v667_v61 = vadd.f32 %v666_v39, %v665_v28  ;;  %v680_v40 = vadd.f32 %v679_v30, %v678_v8  ;;  %6086 = vmatpush3.msra.mxu0 %v7308_v3  ;;  %v7322_v28 = vld [vmem:[%s8629_s7 + $0x38] sm:$0xff]  ;;  %v7344_v30 = vld [vmem:[%s8629_s7 + $0x20] sm:$0xff]  ;;  %8736 = vst [vmem:[#allocation22_spill] sm:$0xff] %v7375_v34 }
 0x275   :  { %6101 = vmatprep.subr.mxu0 %v8726_v51  ;;  %8729 = vst [vmem:[#allocation15_spill] sm:$0xff] %v7322_v28  ;;  %8732 = vst [vmem:[#allocation18_spill] sm:$0xff] %v7344_v30 }
 0x276   :  { %v762_v55 = vsel %vm761_vm10, %v667_v61, %v760_v36  ;;  %v7368_v61 = vld [vmem:[%s8629_s7 + $0x48] sm:$0xff] }
 0x277   :  { %v764_v41 = vsel %vm763_vm11, %v680_v40, %v762_v55  ;;  %8735 = vst [vmem:[#allocation21_spill] sm:$0xff] %v7368_v61 }
 0x278   :  { %6075 = vmatpush3.msra.mxu1 %v764_v41 }
 0x279   :  { %6077 = vmatmul.mubr.msk.f32.vlgmr.msra.gmra.mxu1 %vm769_vm12, %v7194_v37  ;;  %6090 = vmatprep.subr.mxu1 %v8726_v51 }
 0x27a   :  { %6091 = vmatpush3.msra.mxu1 %v7201_v47  ;;  %6098 = vmatprep.mubr.msk.f32.mxu1 %vm6761_vm0, %v8726_v51 }
 0x27b   :  { %6092 = vmatprep.subr.mxu1 %v8726_v51 }
 0x27c   :  { %6093 = vmatpush3.msra.mxu1 %v7209_v25 }
 0x27d   :  { %6094 = vmatprep.subr.mxu1 %v8726_v51 }
 0x27e   :  { %6095 = vmatpush3.msra.mxu1 %v7218_v32 }
 0x27f   :  { %6096 = vmatprep.subr.mxu1 %v8726_v51 }
 0x280   :  { %6097 = vmatpush3.msra.mxu1 %v7225_v44 }
 0x281   :  { %6099 = vmatmul.mubr.msk.f32.vlgmr.msra.gmra.mxu1 %vm576_vm3, %v6876_v11  ;;  %6112 = vmatprep.subr.mxu1 %v8726_v51 }
 0x282   :  { %6113 = vmatpush3.msra.mxu1 %v7232_v43  ;;  %6120 = vmatprep.mubr.msk.f32.mxu1 %vm6761_vm0, %v8726_v51 }
 0x283   :  { %6114 = vmatprep.subr.mxu1 %v8726_v51 }
 0x284   :  { %6115 = vmatpush3.msra.mxu1 %v7241_v62 }
 0x285   :  { %6116 = vmatprep.subr.mxu1 %v8726_v51 }
 0x286   :  { %6117 = vmatpush3.msra.mxu1 %v7250_v50 }
 0x287   :  { %6118 = vmatprep.subr.mxu1 %v8726_v51 }
 0x288   :  { %6119 = vmatpush3.msra.mxu1 %v7257_v1 }
 0x289   :  { %6121 = vmatmul.mubr.msk.f32.vlgmr.msra.gmra.mxu1 %vm576_vm3, %v6876_v11  ;;  %6134 = vmatprep.subr.mxu1 %v8726_v51 }
 0x28a   :  { %6135 = vmatpush3.msra.mxu1 %v7264_v63  ;;  %6142 = vmatprep.mubr.msk.f32.mxu1 %vm6761_vm0, %v8726_v51 }
 0x28b   :  { %6136 = vmatprep.subr.mxu1 %v8726_v51 }
 0x28c   :  { %6137 = vmatpush3.msra.mxu1 %v7273_v23 }
 0x28d   :  { %6138 = vmatprep.subr.mxu1 %v8726_v51 }
 0x28e   :  { %6139 = vmatpush3.msra.mxu1 %v7282_v27 }
 0x28f   :  { %6140 = vmatprep.subr.mxu1 %v8726_v51 }
 0x290   :  { %6141 = vmatpush3.msra.mxu1 %v7289_v9 }
 0x291   :  { %6143 = vmatmul.mubr.msk.f32.vlgmr.msra.gmra.mxu1 %vm576_vm3, %v6876_v11  ;;  %6150 = vmatprep.subr.mxu1 %v8726_v51 }
 0x292   :  { %6154 = vmatprep.mubr.msk.f32.mxu1 %vm6761_vm0, %v8726_v51 }
 0x339   :  { %v842_v6 = vpop.f32.mrf.mxu1 }
 0x33a   :  { %v843_v0 = vadd.f32 %v7316_v16, %v842_v6  ;;  %v216_v6 = vld [vmem:[%s8633_s9] sm:$0x7] }
 0x33b   :  { %v6078_v7 = vpop.f32.mrf.mxu1 }
 0x33c   :  { %v846_v8 = vmax.f32 %v843_v0, 0.0  ;;  %v7387_v0 = vrot.slane %v216_v6, %v6887_v15  ;;  %v217_v7 = vld [vmem:[%s8634_s10] sm:$0x7] }
 0x33e   :  { %6088 = vmatmul.mubr.msk.f32.vlgmr.msra.gmra.mxu0 %vm576_vm3, %v846_v8  ;;  %8737 = vst [vmem:[#allocation23_spill] sm:$0xff] %v7387_v0 }
 0x33f   :  { %6102 = vmatpush3.msra.mxu0 %v7322_v28  ;;  %6109 = vmatprep.mubr.msk.f32.mxu0 %vm6761_vm0, %v8726_v51 }
 0x340   :  { %6103 = vmatprep.subr.mxu0 %v8726_v51 }
 0x341   :  { %6104 = vmatpush3.msra.mxu0 %v7328_v24  ;;  %v993_v39 = vpop.f32.mrf.mxu1 }
 0x342   :  { %6105 = vmatprep.subr.mxu0 %v8726_v51 }
 0x343   :  { %6106 = vmatpush3.msra.mxu0 %v7337_v38  ;;  %v6100_v42 = vpop.f32.mrf.mxu1  ;;  %v7402_v38 = vrot.slane %v217_v7, %v6889_v17 }
 0x344   :  { %6107 = vmatprep.subr.mxu0 %v8726_v51 }
 0x345   :  { %6108 = vmatpush3.msra.mxu0 %v7344_v30  ;;  %8740 = vst [vmem:[#allocation26_spill] sm:$0xff] %v7402_v38 }
 0x346   :  { %6110 = vmatmul.mubr.msk.f32.vlgmr.msra.gmra.mxu0 %vm576_vm3, %v846_v8  ;;  %6123 = vmatprep.subr.mxu0 %v8726_v51 }
 0x347   :  { %6124 = vmatpush3.msra.mxu0 %v7351_v21  ;;  %6131 = vmatprep.mubr.msk.f32.mxu0 %vm6761_vm0, %v8726_v51 }
 0x348   :  { %6125 = vmatprep.subr.mxu0 %v8726_v51 }
 0x349   :  { %6126 = vmatpush3.msra.mxu0 %v7359_v26  ;;  %v1149_v40 = vpop.f32.mrf.mxu1 }
 0x34a   :  { %6127 = vmatprep.subr.mxu0 %v8726_v51 }
 0x34b   :  { %6128 = vmatpush3.msra.mxu0 %v7368_v61  ;;  %v6122_v36 = vpop.f32.mrf.mxu1  ;;  %v7398_v61 = vrot.slane %v216_v6, %v6889_v17 }
 0x34c   :  { %6129 = vmatprep.subr.mxu0 %v8726_v51 }
 0x34d   :  { %6130 = vmatpush3.msra.mxu0 %v7375_v34  ;;  %8739 = vst [vmem:[#allocation25_spill] sm:$0xff] %v7398_v61 }
 0x34e   :  { %6132 = vmatmul.mubr.msk.f32.vlgmr.msra.gmra.mxu0 %vm576_vm3, %v846_v8  ;;  %v7394_v8 = vrot.slane %v217_v7, %v6887_v15 }
 0x34f   :  { %6147 = vmatprep.mubr.msk.f32.mxu0 %vm218_vm2, %v6866_v5 }
 0x350   :  { %8738 = vst [vmem:[#allocation24_spill] sm:$0xff] %v7394_v8 }
 0x351   :  { %v1309_v55 = vpop.f32.mrf.mxu1 }
 0x353   :  { %v6144_v41 = vpop.f32.mrf.mxu1 }
 0x3fe   :  { %v920_v42 = vpop.f32.mrf.mxu0 }
 0x3ff   :  { %v921_v36 = vadd.f32 %v920_v42, %v7387_v0 }
 0x400   :  { %v6089_v5 = vpop.f32.mrf.mxu0 }
 0x401   :  { %v997_v34 = vadd.f32 %v993_v39, %v921_v36 }
 0x403   :  { %v1002_v41 = vadd.f32 %v7394_v8, %v997_v34 }
 0x405   :  { %v5753_v26 = vmul.f32 -1.442695, %v1002_v41  ;;  %v7406_v41 = vrot.slane %v217_v7, %v6892_v19 }
 0x406   :  { %v1079_v21 = vpop.f32.mrf.mxu0 }
 0x407   :  { %6597 = vpow2.f32 %v5753_v26  ;;  %v1080_v30 = vadd.f32 %v1079_v21, %v7398_v61  ;;  %8741 = vst [vmem:[#allocation27_spill] sm:$0xff] %v7406_v41  ;;  %v7409_v21 = vrot.slane %v216_v6, %v6892_v19 }
 0x408   :  { %v6111_v24 = vpop.f32.mrf.mxu0 }
 0x409   :  { %v1153_v42 = vadd.f32 %v1149_v40, %v1080_v30  ;;  %8742 = vst [vmem:[#allocation28_spill] sm:$0xff] %v7409_v21  ;;  %v1310_v24 = vadd.f32 %v1309_v55, %v7406_v41 }
 0x40b   :  { %v1158_v0 = vadd.f32 %v7402_v38, %v1153_v42 }
 0x40d   :  { %v5756_v28 = vmul.f32 -1.442695, %v1158_v0 }
 0x40e   :  { %v1235_v5 = vpop.f32.mrf.mxu0 }
 0x40f   :  { %6599 = vpow2.f32 %v5756_v28  ;;  %v1236_v40 = vadd.f32 %v1235_v5, %v7409_v21 }
 0x410   :  { %v6133_v39 = vpop.f32.mrf.mxu0 }
 0x414   :  { %v6598_v34 = vpop.eup %6597 }
 0x415   :  { %v1006_v36 = vadd.f32 1.0, %v6598_v34 }
 0x417   :  { %6601 = vrcp.f32 %v1006_v36 }
 0x41c   :  { %v6600_v8 = vpop.eup %6599 }
 0x41d   :  { %v1162_v26 = vadd.f32 1.0, %v6600_v8 }
 0x41f   :  { %6603 = vrcp.f32 %v1162_v26 }
 0x424   :  { %v6602_v30 = vpop.eup %6601 }
 0x425   :  { %v1313_v0 = vmul.f32 %v6602_v30, %v1310_v24 }
 0x427   :  { %v1314_v42 = vadd.f32 %v1313_v0, %v1236_v40 }
 0x429   :  { %6605 = vtanh.f32 %v1314_v42 }
 0x42c   :  { %v6604_v28 = vpop.eup %6603 }
 0x42d   :  { %v1316_v39 = vsub.f32 1.0, %v6604_v28  ;;  %v1318_v7 = vmul.f32 %v6604_v28, %v6876_v11 }
 0x436   :  { %v6606_v34 = vpop.eup %6605 }
 0x437   :  { %v1317_v36 = vmul.f32 %v6606_v34, %v1316_v39 }
 0x439   :  { %v7414_v38 = vadd.f32 %v1318_v7, %v1317_v36 }
 0x43b   :  { %6145 = vmatprep.subr.mxu0 %v7414_v38 }
 0x43c   :  { %6146 = vmatpush3.msra.mxu0 %v7414_v38 }
 0x43d   :  { %6148 = vmatmul.mubr.msk.f32.vlgmr.msra.gmra.mxu0 %vm218_vm2, %v6878_v12  ;;  %6157 = vmatprep.subr.mxu0 %v8726_v51 }
 0x43e   :  { %6158 = vmatpush3.msra.mxu0 %v6924_v45  ;;  %6165 = vmatprep.mubr.msk.f32.mxu0 %vm6761_vm0, %v8726_v51 }
 0x43f   :  { %6159 = vmatprep.subr.mxu0 %v8726_v51 }
 0x440   :  { %6160 = vmatpush3.msra.mxu0 %v6929_v46 }
 0x441   :  { %6161 = vmatprep.subr.mxu0 %v8726_v51 }
 0x442   :  { %6162 = vmatpush3.msra.mxu0 %v7302_v59 }
 0x443   :  { %6163 = vmatprep.subr.mxu0 %v8726_v51 }
 0x444   :  { %6164 = vmatpush3.msra.mxu0 %v7308_v3 }
 0x445   :  { %6179 = vmatprep.subr.mxu0 %v8726_v51 }
 0x4fd   :  { %v6149_v11 = vpop.f32.mrf.mxu0 }
 0x4fe   :  { %v1550_v45 = vrot.slane %v6149_v11, %v6887_v15  ;;  %v1569_v55 = vrot.slane %v6149_v11, %v6889_v17  ;;  %v1588_v46 = vrot.slane %v6149_v11, %v6892_v19  ;;  %v1607_v59 = vrot.slane %v6149_v11, %v6896_v22 }
 0x4ff   :  { %v1386_v3 = vpop.f32.mrf.mxu0 }
 0x500   :  { %1556 = vbcast.lane.b32.xlu1 %v1550_v45, 264  ;;  %1552 = vbcast.lane.b32.xlu0 %v1550_v45, 256  ;;  %v1398_v6 = vrot.slane %v1386_v3, %v6887_v15  ;;  %v1417_v8 = vrot.slane %v1386_v3, %v6889_v17  ;;  %v1436_v5 = vrot.slane %v1386_v3, %v6892_v19 }
 0x501   :  { %v1455_v26 = vrot.slane %v1386_v3, %v6896_v22  ;;  %v1474_v24 = vrot.slane %v1386_v3, %v6903_v29  ;;  %v1493_v30 = vrot.slane %v1386_v3, %v6906_v31  ;;  %v1512_v40 = vrot.slane %v1386_v3, %v6909_v33  ;;  %v7544_v29 = vld [vmem:[%s8628_s3 + $0x178] sm:$0xff] }
 0x502   :  { %v1531_v0 = vrot.slane %v1386_v3, %v6912_v35  ;;  %8757 = vst [vmem:[#allocation43_spill] sm:$0xff] %v7544_v29 }
 0x504   :  { %1575 = vbcast.lane.b32.xlu1 %v1569_v55, 264  ;;  %1571 = vbcast.lane.b32.xlu0 %v1569_v55, 256 }
 0x508   :  { %1590 = vbcast.lane.b32.xlu1 %v1588_v46, 256  ;;  %1594 = vbcast.lane.b32.xlu0 %v1588_v46, 264 }
 0x50c   :  { %1579 = vbcast.lane.b32.xlu1 %v1569_v55, 272  ;;  %1560 = vbcast.lane.b32.xlu0 %v1550_v45, 272 }
 0x510   :  { %1613 = vbcast.lane.b32.xlu1 %v1607_v59, 264  ;;  %1609 = vbcast.lane.b32.xlu0 %v1607_v59, 256 }
 0x514   :  { %1564 = vbcast.lane.b32.xlu1 %v1550_v45, 280  ;;  %1598 = vbcast.lane.b32.xlu0 %v1588_v46, 272 }
 0x518   :  { %1617 = vbcast.lane.b32.xlu1 %v1607_v59, 272  ;;  %1583 = vbcast.lane.b32.xlu0 %v1569_v55, 280  ;;  %v7446_v55 = vld [vmem:[%s8628_s3 + $0x108] sm:$0xff] }
 0x519   :  { %8743 = vst [vmem:[#allocation29_spill] sm:$0xff] %v7446_v55 }
 0x51c   :  { %1621 = vbcast.lane.b32.xlu1 %v1607_v59, 280  ;;  %1602 = vbcast.lane.b32.xlu0 %v1588_v46, 280  ;;  %v7452_v59 = vld [vmem:[%s8628_s3 + $0x100] sm:$0xff] }
 0x51d   :  { %8744 = vst [vmem:[#allocation30_spill] sm:$0xff] %v7452_v59 }
 0x520   :  { %1404 = vbcast.lane.b32.xlu1 %v1398_v6, 264  ;;  %1400 = vbcast.lane.b32.xlu0 %v1398_v6, 256 }
 0x524   :  { %1423 = vbcast.lane.b32.xlu1 %v1417_v8, 264  ;;  %1419 = vbcast.lane.b32.xlu0 %v1417_v8, 256 }
 0x528   :  { %1442 = vbcast.lane.b32.xlu1 %v1436_v5, 264  ;;  %1438 = vbcast.lane.b32.xlu0 %v1436_v5, 256 }
 0x52c   :  { %1427 = vbcast.lane.b32.xlu1 %v1417_v8, 272  ;;  %1408 = vbcast.lane.b32.xlu0 %v1398_v6, 272 }
 0x530   :  { %1461 = vbcast.lane.b32.xlu1 %v1455_v26, 264  ;;  %1457 = vbcast.lane.b32.xlu0 %v1455_v26, 256 }
 0x534   :  { %1476 = vbcast.lane.b32.xlu1 %v1474_v24, 256  ;;  %1446 = vbcast.lane.b32.xlu0 %v1436_v5, 272 }
 0x538   :  { %1412 = vbcast.lane.b32.xlu1 %v1398_v6, 280  ;;  %1480 = vbcast.lane.b32.xlu0 %v1474_v24, 264  ;;  %v7458_v6 = vld [vmem:[%s8628_s3 + $0x110] sm:$0xff] }
 0x539   :  { %8745 = vst [vmem:[#allocation31_spill] sm:$0xff] %v7458_v6 }
 0x53c   :  { %1465 = vbcast.lane.b32.xlu1 %v1455_v26, 272  ;;  %1431 = vbcast.lane.b32.xlu0 %v1417_v8, 280 }
 0x540   :  { %1499 = vbcast.lane.b32.xlu1 %v1493_v30, 264  ;;  %1495 = vbcast.lane.b32.xlu0 %v1493_v30, 256 }
 0x544   :  { %1484 = vbcast.lane.b32.xlu1 %v1474_v24, 272  ;;  %1450 = vbcast.lane.b32.xlu0 %v1436_v5, 280  ;;  %v7464_v5 = vld [vmem:[%s8628_s3 + $0x128] sm:$0xff] }
 0x545   :  { %8746 = vst [vmem:[#allocation32_spill] sm:$0xff] %v7464_v5 }
 0x548   :  { %1518 = vbcast.lane.b32.xlu1 %v1512_v40, 264  ;;  %1514 = vbcast.lane.b32.xlu0 %v1512_v40, 256 }
 0x54c   :  { %1469 = vbcast.lane.b32.xlu1 %v1455_v26, 280  ;;  %1503 = vbcast.lane.b32.xlu0 %v1493_v30, 272 }
 0x550   :  { %1533 = vbcast.lane.b32.xlu1 %v1531_v0, 256  ;;  %1537 = vbcast.lane.b32.xlu0 %v1531_v0, 264 }
 0x554   :  { %1522 = vbcast.lane.b32.xlu1 %v1512_v40, 272  ;;  %1488 = vbcast.lane.b32.xlu0 %v1474_v24, 280 }
 0x558   :  { %1507 = vbcast.lane.b32.xlu1 %v1493_v30, 280  ;;  %1541 = vbcast.lane.b32.xlu0 %v1531_v0, 272 }
 0x55c   :  { %1545 = vbcast.lane.b32.xlu1 %v1531_v0, 280  ;;  %1526 = vbcast.lane.b32.xlu0 %v1512_v40, 280 }
 0x572   :  { %v1557_v42 = vpop.permute.xlu1 %1556  ;;  %v1553_v28 = vpop.permute.xlu0 %1552 }
 0x573   :  { %v1656_v46 = vmul.f32 %v7446_v55, %v1557_v42  ;;  %v1655_v3 = vmul.f32 %v7452_v59, %v1553_v28  ;;  %v7472_v42 = vld [vmem:[%s8628_s3 + $0x120] sm:$0xff] }
 0x574   :  { %8747 = vst [vmem:[#allocation33_spill] sm:$0xff] %v7472_v42 }
 0x575   :  { %v1776_v40 = vsel %vm576_vm3, %v1656_v46, 0.0  ;;  %v1775_v0 = vsel %vm576_vm3, %v1655_v3, 0.0  ;;  %v7486_v3 = vld [vmem:[%s8628_s3 + $0x140] sm:$0xff] }
 0x576   :  { %v1576_v39 = vpop.permute.xlu1 %1575  ;;  %v1572_v34 = vpop.permute.xlu0 %1571  ;;  %8749 = vst [vmem:[#allocation35_spill] sm:$0xff] %v7486_v3 }
 0x577   :  { %v1660_v26 = vmul.f32 %v7464_v5, %v1576_v39  ;;  %v1659_v28 = vmul.f32 %v7472_v42, %v1572_v34  ;;  %v7492_v34 = vld [vmem:[%s8628_s3 + $0x148] sm:$0xff] }
 0x578   :  { %8750 = vst [vmem:[#allocation36_spill] sm:$0xff] %v7492_v34 }
 0x579   :  { %v1789_v46 = vsel %vm576_vm3, %v1660_v26, 0.0  ;;  %v7499_v26 = vld [vmem:[%s8628_s3 + $0x168] sm:$0xff] }
 0x57a   :  { %v1591_v36 = vpop.permute.xlu1 %1590  ;;  %v1595_v7 = vpop.permute.xlu0 %1594  ;;  %8751 = vst [vmem:[#allocation37_spill] sm:$0xff] %v7499_v26 }
 0x57b   :  { %v1663_v59 = vmul.f32 %v7486_v3, %v1591_v36  ;;  %v1664_v42 = vmul.f32 %v7492_v34, %v1595_v7  ;;  %v7505_v36 = vld [vmem:[%s8628_s3 + $0x160] sm:$0xff]  ;;  %v7511_v7 = vld [vmem:[%s8628_s3 + $0x118] sm:$0xff] }
 0x57c   :  { %8752 = vst [vmem:[#allocation38_spill] sm:$0xff] %v7505_v36  ;;  %8753 = vst [vmem:[#allocation39_spill] sm:$0xff] %v7511_v7 }
 0x57d   :  { %v1802_v35 = vsel %vm576_vm3, %v1664_v42, 0.0 }
 0x57e   :  { %v1580_v11 = vpop.permute.xlu1 %1579  ;;  %v1561_v45 = vpop.permute.xlu0 %1560 }
 0x57f   :  { %v1657_v8 = vmul.f32 %v7458_v6, %v1561_v45  ;;  %v7478_v45 = vld [vmem:[%s8628_s3 + $0x130] sm:$0xff]  ;;  %v1777_v6 = vadd.f32 %v1776_v40, %v1775_v0 }
 0x580   :  { %8748 = vst [vmem:[#allocation34_spill] sm:$0xff] %v7478_v45  ;;  %v1661_v39 = vmul.f32 %v7478_v45, %v1580_v11 }
 0x581   :  { %v1778_v5 = vsel %vm576_vm3, %v1657_v8, 0.0  ;;  %v1788_v8 = vsel %vm576_vm3, %v1659_v28, 0.0 }
 0x582   :  { %v1614_v24 = vpop.permute.xlu1 %1613  ;;  %v1610_v30 = vpop.permute.xlu0 %1609  ;;  %v1779_v34 = vadd.f32 %v1778_v5, %v1777_v6  ;;  %v1791_v3 = vsel %vm576_vm3, %v1661_v39, 0.0  ;;  %v7529_v39 = vld [vmem:[%s8628_s3 + $0x170] sm:$0xff] }
 0x583   :  { %v1668_v40 = vmul.f32 %v7499_v26, %v1614_v24  ;;  %v1667_v0 = vmul.f32 %v7505_v36, %v1610_v30  ;;  %v7519_v24 = vld [vmem:[%s8628_s3 + $0x150] sm:$0xff]  ;;  %v1790_v30 = vadd.f32 %v1789_v46, %v1788_v8  ;;  %v1801_v36 = vsel %vm576_vm3, %v1663_v59, 0.0  ;;  %8755 = vst [vmem:[#allocation41_spill] sm:$0xff] %v7529_v39  ;;  %v7535_v59 = vld [vmem:[%s8628_s3 + $0x138] sm:$0xff] }
 0x584   :  { %8754 = vst [vmem:[#allocation40_spill] sm:$0xff] %v7519_v24  ;;  %8756 = vst [vmem:[#allocation42_spill] sm:$0xff] %v7535_v59 }
 0x585   :  { %v1815_v6 = vsel %vm576_vm3, %v1668_v40, 0.0  ;;  %v1814_v5 = vsel %vm576_vm3, %v1667_v0, 0.0  ;;  %v1792_v42 = vadd.f32 %v1791_v3, %v1790_v30  ;;  %v1803_v40 = vadd.f32 %v1802_v35, %v1801_v36 }
 0x586   :  { %v1565_v11 = vpop.permute.xlu1 %1564  ;;  %v1599_v45 = vpop.permute.xlu0 %1598  ;;  %v1816_v0 = vadd.f32 %v1815_v6, %v1814_v5 }
 0x587   :  { %v1658_v28 = vmul.f32 %v7511_v7, %v1565_v11  ;;  %v1665_v26 = vmul.f32 %v7519_v24, %v1599_v45 }
 0x589   :  { %v1780_v55 = vsel %vm576_vm3, %v1658_v28, 0.0  ;;  %v1804_v46 = vsel %vm576_vm3, %v1665_v26, 0.0  ;;  %v7550_v26 = vld [vmem:[%s8628_s3 + $0x158] sm:$0xff] }
 0x58a   :  { %v1781_v33 = vadd.f32 %v1780_v55, %v1779_v34  ;;  %v1618_v31 = vpop.permute.xlu1 %1617  ;;  %v1584_v11 = vpop.permute.xlu0 %1583  ;;  %8758 = vst [vmem:[#allocation44_spill] sm:$0xff] %v7550_v26  ;;  %v1805_v35 = vadd.f32 %v1804_v46, %v1803_v40 }
 0x58b   :  { %v1669_v28 = vmul.f32 %v7529_v39, %v1618_v31  ;;  %v1662_v55 = vmul.f32 %v7535_v59, %v1584_v11 }
 0x58c   :  { %v1782_v45 = vrot.slane %v1781_v33, 4 }
 0x58d   :  { %v1817_v34 = vsel %vm576_vm3, %v1669_v28, 0.0  ;;  %v1793_v8 = vsel %vm576_vm3, %v1662_v55, 0.0 }
 0x58e   :  { %v1783_v24 = vadd.f32 %v1782_v45, %v1781_v33  ;;  %v1794_v7 = vadd.f32 %v1793_v8, %v1792_v42  ;;  %v1622_v31 = vpop.permute.xlu1 %1621  ;;  %v1603_v39 = vpop.permute.xlu0 %1602  ;;  %v1818_v36 = vadd.f32 %v1817_v34, %v1816_v0 }
 0x58f   :  { %v1670_v3 = vmul.f32 %v7544_v29, %v1622_v31  ;;  %v1666_v30 = vmul.f32 %v7550_v26, %v1603_v39 }
 0x590   :  { %v1795_v33 = vrot.slane %v1794_v7, 4  ;;  %v1784_v11 = vrot.slane %v1783_v24, 2 }
 0x591   :  { %v1819_v6 = vsel %vm576_vm3, %v1670_v3, 0.0  ;;  %v1806_v5 = vsel %vm576_vm3, %v1666_v30, 0.0 }
 0x592   :  { %v1796_v28 = vadd.f32 %v1795_v33, %v1794_v7  ;;  %v1820_v55 = vadd.f32 %v1819_v6, %v1818_v36  ;;  %v1807_v42 = vadd.f32 %v1806_v5, %v1805_v35  ;;  %v1405_v45 = vpop.permute.xlu1 %1404  ;;  %v1401_v8 = vpop.permute.xlu0 %1400  ;;  %v1785_v22 = vadd.f32 %v1784_v11, %v1783_v24 }
 0x594   :  { %v1797_v31 = vrot.slane %v1796_v28, 2  ;;  %v1821_v29 = vrot.slane %v1820_v55, 4  ;;  %v1808_v59 = vrot.slane %v1807_v42, 4  ;;  %v1786_v3 = vrot.slane %v1785_v22, 1 }
 0x596   :  { %v1798_v19 = vadd.f32 %v1797_v31, %v1796_v28  ;;  %v1822_v17 = vadd.f32 %v1821_v29, %v1820_v55  ;;  %v1809_v39 = vadd.f32 %v1808_v59, %v1807_v42  ;;  %v1424_v46 = vpop.permute.xlu1 %1423  ;;  %v1420_v34 = vpop.permute.xlu0 %1419  ;;  %v1787_v5 = vadd.f32 %v1786_v3, %v1785_v22 }
 0x598   :  { %v1799_v40 = vrot.slane %v1798_v19, 1  ;;  %v1823_v0 = vrot.slane %v1822_v17, 2  ;;  %v1810_v26 = vrot.slane %v1809_v39, 2 }
 0x59a   :  { %v1824_v15 = vadd.f32 %v1823_v0, %v1822_v17  ;;  %v1811_v30 = vadd.f32 %v1810_v26, %v1809_v39  ;;  %v1443_v7 = vpop.permute.xlu1 %1442  ;;  %v1439_v36 = vpop.permute.xlu0 %1438  ;;  %v1800_v35 = vadd.f32 %v1799_v40, %v1798_v19  ;;  %v7573_v39 = vld [vmem:[%s8628_s3 + $0x20] sm:$0xff]  ;;  %v7579_v0 = vld [vmem:[%s8628_s3 + $0x48] sm:$0xff] }
 0x59b   :  { %8760 = vst [vmem:[#allocation46_spill] sm:$0xff] %v7573_v39  ;;  %v1627_v40 = vmul.f32 %v7573_v39, %v1420_v34  ;;  %8761 = vst [vmem:[#allocation47_spill] sm:$0xff] %v7579_v0  ;;  %v1632_v3 = vmul.f32 %v7579_v0, %v1443_v7  ;;  %v7591_v34 = vld [vmem:[%s8628_s3 + $0x30] sm:$0xff]  ;;  %v7597_v7 = vld [vmem:[%s8628_s3 + $0x8] sm:$0xff] }
 0x59c   :  { %v1825_v33 = vrot.slane %v1824_v15, 1  ;;  %v1812_v6 = vrot.slane %v1811_v30, 1  ;;  %v1846_v29 = vsel %vm751_vm4, %v1800_v35, %v1787_v5  ;;  %8763 = vst [vmem:[#allocation49_spill] sm:$0xff] %v7591_v34  ;;  %8764 = vst [vmem:[#allocation50_spill] sm:$0xff] %v7597_v7  ;;  %v1624_v5 = vmul.f32 %v7597_v7, %v1405_v45  ;;  %v7617_v45 = vld [vmem:[%s8628_s3 + $0x38] sm:$0xff]  ;;  %v7632_v0 = vld [vmem:[%s8628_s3 + $0x68] sm:$0xff] }
 0x59d   :  { %8767 = vst [vmem:[#allocation53_spill] sm:$0xff] %v7617_v45  ;;  %8769 = vst [vmem:[#allocation55_spill] sm:$0xff] %v7632_v0 }
 0x59e   :  { %v1826_v12 = vadd.f32 %v1825_v33, %v1824_v15  ;;  %v1813_v21 = vadd.f32 %v1812_v6, %v1811_v30  ;;  %v1428_v24 = vpop.permute.xlu1 %1427  ;;  %v1409_v11 = vpop.permute.xlu0 %1408  ;;  %v7585_v30 = vld [vmem:[%s8628_s3 + $0x40] sm:$0xff] }
 0x59f   :  { %8762 = vst [vmem:[#allocation48_spill] sm:$0xff] %v7585_v30  ;;  %v1629_v6 = vmul.f32 %v7591_v34, %v1428_v24  ;;  %v7611_v24 = vld [vmem:[%s8628_s3 + $0x50] sm:$0xff] }
 0x5a0   :  { %v1847_v59 = vsel %vm753_vm5, %v1813_v21, %v1846_v29  ;;  %v7567_v21 = vld [vmem:[%s8628_s3 + $0x28] sm:$0xff]  ;;  %8766 = vst [vmem:[#allocation52_spill] sm:$0xff] %v7611_v24 }
 0x5a1   :  { %v1848_v28 = vsel %vm755_vm6, %v1826_v12, %v1847_v59  ;;  %8759 = vst [vmem:[#allocation45_spill] sm:$0xff] %v7567_v21  ;;  %v1628_v12 = vmul.f32 %v7567_v21, %v1424_v46  ;;  %v1631_v46 = vmul.f32 %v7585_v30, %v1439_v36  ;;  %v7603_v36 = vld [vmem:[%s8628_s3] sm:$0xff] }
 0x5a2   :  { %6151 = vmatpush3.msk.msra.mxu1 %vm773_vm7, %v1848_v28  ;;  %v1462_v17 = vpop.permute.xlu1 %1461  ;;  %v1458_v26 = vpop.permute.xlu0 %1457  ;;  %8765 = vst [vmem:[#allocation51_spill] sm:$0xff] %v7603_v36  ;;  %v1623_v29 = vmul.f32 %v7603_v36, %v1401_v8  ;;  %v1684_v28 = vsel %vm576_vm3, %v1627_v40, 0.0  ;;  %v1698_v8 = vsel %vm576_vm3, %v1632_v3, 0.0  ;;  %v7625_v40 = vld [vmem:[%s8628_s3 + $0x10] sm:$0xff]  ;;  %v7638_v3 = vld [vmem:[%s8628_s3 + $0x60] sm:$0xff] }
 0x5a3   :  { %6152 = vmatprep.subr.mxu1 %v8726_v51  ;;  %v1685_v59 = vsel %vm576_vm3, %v1628_v12, 0.0  ;;  %v1697_v12 = vsel %vm576_vm3, %v1631_v46, 0.0  ;;  %8768 = vst [vmem:[#allocation54_spill] sm:$0xff] %v7625_v40  ;;  %v1625_v36 = vmul.f32 %v7625_v40, %v1409_v11  ;;  %8770 = vst [vmem:[#allocation56_spill] sm:$0xff] %v7638_v3  ;;  %v1635_v46 = vmul.f32 %v7638_v3, %v1458_v26  ;;  %v7644_v11 = vld [vmem:[%s8628_s3 + $0x58] sm:$0xff]  ;;  %v7659_v3 = vld [vmem:[%s8628_s3 + $0x70] sm:$0xff] }
 0x5a4   :  { %8771 = vst [vmem:[#allocation57_spill] sm:$0xff] %v7644_v11  ;;  %v1672_v40 = vsel %vm576_vm3, %v1624_v5, 0.0  ;;  %v1686_v39 = vadd.f32 %v1685_v59, %v1684_v28 }
 0x5a5   :  { %v1710_v41 = vsel %vm576_vm3, %v1635_v46, 0.0 }
 0x5a6   :  { %v7560_v19 = vpop.permute.xlu1 %1476  ;;  %v1447_v55 = vpop.permute.xlu0 %1446 }
 0x5a7   :  { %v1633_v34 = vmul.f32 %v7611_v24, %v1447_v55  ;;  %v1687_v24 = vsel %vm576_vm3, %v1629_v6, 0.0 }
 0x5a8   :  { %v1688_v59 = vadd.f32 %v1687_v24, %v1686_v39 }
 0x5aa   :  { %v1413_v22 = vpop.permute.xlu1 %1412  ;;  %v7562_v15 = vpop.permute.xlu0 %1480 }
 0x5ae   :  { %v1466_v42 = vpop.permute.xlu1 %1465  ;;  %v1432_v31 = vpop.permute.xlu0 %1431 }
 0x5af   :  { %v1630_v7 = vmul.f32 %v7617_v45, %v1432_v31  ;;  %v1636_v31 = vmul.f32 %v7632_v0, %v1462_v17  ;;  %v1671_v45 = vsel %vm576_vm3, %v1623_v29, 0.0  ;;  %v1700_v17 = vsel %vm576_vm3, %v1633_v34, 0.0  ;;  %v7653_v0 = vld [vmem:[%s8628_s3 + $0x18] sm:$0xff] }
 0x5b0   :  { %8772 = vst [vmem:[#allocation58_spill] sm:$0xff] %v7653_v0  ;;  %v1626_v26 = vmul.f32 %v7653_v0, %v1413_v22  ;;  %v1699_v29 = vadd.f32 %v1698_v8, %v1697_v12  ;;  %v1673_v0 = vadd.f32 %v1672_v40, %v1671_v45 }
 0x5b1   :  { %v1689_v5 = vsel %vm576_vm3, %v1630_v7, 0.0  ;;  %v1711_v21 = vsel %vm576_vm3, %v1636_v31, 0.0  ;;  %v1640_v31 = vmul.f32 %v7562_v15, %v7071_v2 }
 0x5b2   :  { %v1500_v35 = vpop.permute.xlu1 %1499  ;;  %v1496_v33 = vpop.permute.xlu0 %1495  ;;  %v1701_v61 = vadd.f32 %v1700_v17, %v1699_v29  ;;  %v1690_v16 = vadd.f32 %v1689_v5, %v1688_v59  ;;  %v1676_v9 = vsel %vm576_vm3, %v1626_v26, 0.0  ;;  %v1712_v8 = vadd.f32 %v1711_v21, %v1710_v41 }
 0x5b3   :  { %v1644_v17 = vmul.f32 %v1500_v35, %v7083_v10  ;;  %v1643_v26 = vmul.f32 %v1496_v33, %v7088_v18 }
 0x5b5   :  { %v1737_v15 = vsel %vm576_vm3, %v1644_v17, 0.0  ;;  %v1736_v10 = vsel %vm576_vm3, %v1643_v26, 0.0 }
 0x5b6   :  { %v1485_v30 = vpop.permute.xlu1 %1484  ;;  %v1451_v55 = vpop.permute.xlu0 %1450 }
 0x5b7   :  { %v1634_v6 = vmul.f32 %v7644_v11, %v1451_v55  ;;  %v1637_v55 = vmul.f32 %v7659_v3, %v1466_v42  ;;  %v1674_v11 = vsel %vm576_vm3, %v1625_v36, 0.0  ;;  %v1639_v36 = vmul.f32 %v7560_v19, %v7066_v54 }
 0x5b8   :  { %v1675_v7 = vadd.f32 %v1674_v11, %v1673_v0  ;;  %v1641_v41 = vmul.f32 %v1485_v30, %v7093_v20  ;;  %v1724_v19 = vsel %vm576_vm3, %v1640_v31, 0.0 }
 0x5b9   :  { %v1702_v22 = vsel %vm576_vm3, %v1634_v6, 0.0  ;;  %v1713_v42 = vsel %vm576_vm3, %v1637_v55, 0.0  ;;  %v1691_v6 = vrot.slane %v1690_v16, 4  ;;  %v1723_v2 = vsel %vm576_vm3, %v1639_v36, 0.0 }
 0x5ba   :  { %v1519_v28 = vpop.permute.xlu1 %1518  ;;  %v1515_v34 = vpop.permute.xlu0 %1514  ;;  %v1703_v39 = vadd.f32 %v1702_v22, %v1701_v61  ;;  %v1677_v45 = vadd.f32 %v1676_v9, %v1675_v7  ;;  %v1714_v40 = vadd.f32 %v1713_v42, %v1712_v8  ;;  %v1726_v18 = vsel %vm576_vm3, %v1641_v41, 0.0 }
 0x5bb   :  { %v1692_v9 = vadd.f32 %v1691_v6, %v1690_v16  ;;  %v1725_v30 = vadd.f32 %v1724_v19, %v1723_v2  ;;  %v1648_v55 = vmul.f32 %v1519_v28, %v7113_v13  ;;  %v1647_v5 = vmul.f32 %v1515_v34, %v7118_v14 }
 0x5bc   :  { %v1704_v21 = vrot.slane %v1703_v39, 4 }
 0x5bd   :  { %v1693_v8 = vrot.slane %v1692_v9, 2  ;;  %v1727_v36 = vadd.f32 %v1726_v18, %v1725_v30  ;;  %v1750_v28 = vsel %vm576_vm3, %v1648_v55, 0.0 }
 0x5be   :  { %v1470_v24 = vpop.permute.xlu1 %1469  ;;  %v1504_v12 = vpop.permute.xlu0 %1503  ;;  %v1705_v33 = vadd.f32 %v1704_v21, %v1703_v39 }
 0x5bf   :  { %v1638_v46 = vmul.f32 %v1470_v24, %v7076_v4  ;;  %v1678_v4 = vrot.slane %v1677_v45, 4  ;;  %v1645_v20 = vmul.f32 %v1504_v12, %v7107_v52  ;;  %v1738_v24 = vadd.f32 %v1737_v15, %v1736_v10 }
 0x5c0   :  { %v1706_v14 = vrot.slane %v1705_v33, 2  ;;  %v1694_v10 = vadd.f32 %v1693_v8, %v1692_v9 }
 0x5c1   :  { %v1715_v61 = vsel %vm576_vm3, %v1638_v46, 0.0  ;;  %v1679_v7 = vadd.f32 %v1678_v4, %v1677_v45  ;;  %v1739_v52 = vsel %vm576_vm3, %v1645_v20, 0.0 }
 0x5c2   :  { %v1716_v0 = vadd.f32 %v1715_v61, %v1714_v40  ;;  %v1534_v11 = vpop.permute.xlu1 %1533  ;;  %v1538_v54 = vpop.permute.xlu0 %1537  ;;  %v8773_v40 = vld [vmem:[#allocation12_spill] sm:$0xff]  ;;  %v1695_v9 = vrot.slane %v1694_v10, 1 }
 0x5c3   :  { %v1651_v22 = vmul.f32 %v1534_v11, %v7125_v48  ;;  %v1652_v16 = vmul.f32 %v1538_v54, %v7130_v49  ;;  %v1749_v48 = vsel %vm576_vm3, %v1647_v5, 0.0  ;;  %v1680_v17 = vrot.slane %v1679_v7, 2 }
 0x5c4   :  { %v1717_v35 = vrot.slane %v1716_v0, 4  ;;  %v1751_v11 = vadd.f32 %v1750_v28, %v1749_v48 }
 0x5c5   :  { %v1763_v46 = vsel %vm576_vm3, %v1652_v16, 0.0 }
 0x5c6   :  { %v1523_v29 = vpop.permute.xlu1 %1522  ;;  %v1489_v59 = vpop.permute.xlu0 %1488  ;;  %v1718_v31 = vadd.f32 %v1717_v35, %v1716_v0 }
 0x5c7   :  { %v1642_v42 = vmul.f32 %v1489_v59, %v7135_v53  ;;  %v1649_v39 = vmul.f32 %v1523_v29, %v7145_v57  ;;  %v1762_v53 = vsel %vm576_vm3, %v1651_v22, 0.0  ;;  %v1740_v57 = vadd.f32 %v1739_v52, %v1738_v24 }
 0x5c8   :  { %v1719_v41 = vrot.slane %v1718_v31, 2  ;;  %v1764_v54 = vadd.f32 %v1763_v46, %v1762_v53  ;;  %v1681_v29 = vadd.f32 %v1680_v17, %v1679_v7 }
 0x5c9   :  { %v1728_v13 = vsel %vm576_vm3, %v1642_v42, 0.0  ;;  %v1752_v61 = vsel %vm576_vm3, %v1649_v39, 0.0 }
 0x5ca   :  { %v1729_v34 = vadd.f32 %v1728_v13, %v1727_v36  ;;  %v1508_v49 = vpop.permute.xlu1 %1507  ;;  %v1542_v12 = vpop.permute.xlu0 %1541  ;;  %v1753_v20 = vadd.f32 %v1752_v61, %v1751_v11  ;;  %v1720_v59 = vadd.f32 %v1719_v41, %v1718_v31  ;;  %v1696_v31 = vadd.f32 %v1695_v9, %v1694_v10  ;;  %v8779_v10 = vld [vmem:[#allocation18_spill] sm:$0xff] }
 0x5cb   :  { %v1646_v45 = vmul.f32 %v1508_v49, %v7153_v60  ;;  %v1653_v6 = vmul.f32 %v1542_v12, %v8773_v40  ;;  %v1707_v60 = vadd.f32 %v1706_v14, %v1705_v33 }
 0x5cc   :  { %v1730_v26 = vrot.slane %v1729_v34, 4  ;;  %v1721_v13 = vrot.slane %v1720_v59, 1 }
 0x5cd   :  { %v1741_v21 = vsel %vm576_vm3, %v1646_v45, 0.0  ;;  %v1765_v0 = vsel %vm576_vm3, %v1653_v6, 0.0  ;;  %v1708_v33 = vrot.slane %v1707_v60, 1 }
 0x5ce   :  { %v1731_v19 = vadd.f32 %v1730_v26, %v1729_v34  ;;  %v1742_v2 = vadd.f32 %v1741_v21, %v1740_v57  ;;  %v1546_v4 = vpop.permute.xlu1 %1545  ;;  %v1527_v15 = vpop.permute.xlu0 %1526  ;;  %v1766_v5 = vadd.f32 %v1765_v0, %v1764_v54  ;;  %v1722_v45 = vadd.f32 %v1721_v13, %v1720_v59 }
 0x5cf   :  { %v1654_v18 = vmul.f32 %v1546_v4, %v7172_v56  ;;  %v1650_v35 = vmul.f32 %v1527_v15, %v7177_v58  ;;  %v1682_v58 = vrot.slane %v1681_v29, 1  ;;  %v1709_v34 = vadd.f32 %v1708_v33, %v1707_v60  ;;  %v8780_v60 = vld [vmem:[#allocation19_spill] sm:$0xff] }
 0x5d0   :  { %v1732_v30 = vrot.slane %v1731_v19, 2  ;;  %v1743_v55 = vrot.slane %v1742_v2, 4 }
 0x5d1   :  { %v1767_v22 = vsel %vm576_vm3, %v1654_v18, 0.0  ;;  %v1754_v16 = vsel %vm576_vm3, %v1650_v35, 0.0  ;;  %v1683_v46 = vadd.f32 %v1682_v58, %v1681_v29  ;;  %v8781_v18 = vld [vmem:[#allocation20_spill] sm:$0xff] }
 0x5d2   :  { %v1733_v42 = vadd.f32 %v1732_v30, %v1731_v19  ;;  %v1744_v24 = vadd.f32 %v1743_v55, %v1742_v2  ;;  %v1768_v36 = vadd.f32 %v1767_v22, %v1766_v5  ;;  %v1755_v52 = vadd.f32 %v1754_v16, %v1753_v20  ;;  %v8782_v20 = vld [vmem:[#allocation21_spill] sm:$0xff]  ;;  %v8783_v55 = vld [vmem:[#allocation22_spill] sm:$0xff]  ;;  %v8785_v16 = vld [vmem:[#allocation23_spill] sm:$0xff] }
 0x5d3   :  { %v1839_v57 = vsel %vm751_vm4, %v1696_v31, %v1683_v46  ;;  %v8784_v5 = vld [vmem:[#allocation2_spill] sm:$0xff]  ;;  %v8789_v46 = vld [vmem:[#allocation27_spill] sm:$0xff] }
 0x5d4   :  { %v1745_v8 = vrot.slane %v1744_v24, 2  ;;  %v1769_v56 = vrot.slane %v1768_v36, 4  ;;  %v1756_v39 = vrot.slane %v1755_v52, 4  ;;  %v1734_v14 = vrot.slane %v1733_v42, 1 }
 0x5d5   :  { %v1840_v41 = vsel %vm753_vm5, %v1709_v34, %v1839_v57 }
 0x5d6   :  { %v1746_v28 = vadd.f32 %v1745_v8, %v1744_v24  ;;  %v1770_v48 = vadd.f32 %v1769_v56, %v1768_v36  ;;  %v1757_v7 = vadd.f32 %v1756_v39, %v1755_v52  ;;  %v1735_v40 = vadd.f32 %v1734_v14, %v1733_v42  ;;  %v8786_v52 = vld [vmem:[#allocation24_spill] sm:$0xff]  ;;  %v8787_v56 = vld [vmem:[#allocation25_spill] sm:$0xff]  ;;  %v8788_v14 = vld [vmem:[#allocation26_spill] sm:$0xff] }
 0x5d7   :  { %v1841_v0 = vsel %vm755_vm6, %v1722_v45, %v1840_v41 }
 0x5d8   :  { %v1747_v49 = vrot.slane %v1746_v28, 1  ;;  %v1771_v12 = vrot.slane %v1770_v48, 2  ;;  %v1758_v53 = vrot.slane %v1757_v7, 2  ;;  %v1842_v19 = vsel %vm757_vm8, %v1735_v40, %v1841_v0 }
 0x5da   :  { %v1772_v6 = vadd.f32 %v1771_v12, %v1770_v48  ;;  %v1759_v17 = vadd.f32 %v1758_v53, %v1757_v7  ;;  %v1748_v26 = vadd.f32 %v1747_v49, %v1746_v28 }
 0x5dc   :  { %v1773_v61 = vrot.slane %v1772_v6, 1  ;;  %v1760_v21 = vrot.slane %v1759_v17, 1  ;;  %v1843_v2 = vsel %vm759_vm9, %v1748_v26, %v1842_v19  ;;  %v8791_v19 = vld [vmem:[#allocation3_spill] sm:$0xff] }
 0x5de   :  { %v1761_v11 = vadd.f32 %v1760_v21, %v1759_v17  ;;  %v1774_v54 = vadd.f32 %v1773_v61, %v1772_v6  ;;  %v8790_v6 = vld [vmem:[#allocation28_spill] sm:$0xff] }
 0x5e0   :  { %v1844_v4 = vsel %vm761_vm10, %v1761_v11, %v1843_v2  ;;  %v6718_v2 = vld [vmem:[%s8629_s7 + $0x18] sm:$0xff] }
 0x5e1   :  { %v1845_v15 = vsel %vm763_vm11, %v1774_v54, %v1844_v4  ;;  %v6720_v4 = vld [vmem:[%s8629_s7 + $0x8] sm:$0xff] }
 0x5e2   :  { %6153 = vmatpush3.msra.mxu1 %v1845_v15  ;;  %v6721_v15 = vld [vmem:[%s8629_s7] sm:$0xff] }
 0x5e3   :  { %6155 = vmatmul.mubr.msk.f32.vlgmr.msra.gmra.mxu1 %vm769_vm12, %v7194_v37  ;;  %6168 = vmatprep.subr.mxu1 %v8726_v51 }
 0x5e4   :  { %6169 = vmatpush3.msra.mxu1 %v7201_v47  ;;  %6176 = vmatprep.mubr.msk.f32.mxu1 %vm6761_vm0, %v8726_v51  ;;  %v8774_v47 = vld [vmem:[#allocation13_spill] sm:$0xff] }
 0x5e5   :  { %6170 = vmatprep.subr.mxu1 %v8726_v51 }
 0x5e6   :  { %6171 = vmatpush3.msra.mxu1 %v7209_v25 }
 0x5e7   :  { %6172 = vmatprep.subr.mxu1 %v8726_v51 }
 0x5e8   :  { %6173 = vmatpush3.msra.mxu1 %v7218_v32  ;;  %v8775_v32 = vld [vmem:[#allocation14_spill] sm:$0xff] }
 0x5e9   :  { %6174 = vmatprep.subr.mxu1 %v8726_v51 }
 0x5ea   :  { %6175 = vmatpush3.msra.mxu1 %v7225_v44 }
 0x5eb   :  { %6177 = vmatmul.mubr.msk.f32.vlgmr.msra.gmra.mxu1 %vm576_vm3, %v7414_v38  ;;  %6190 = vmatprep.subr.mxu1 %v8726_v51 }
 0x5ec   :  { %6191 = vmatpush3.msra.mxu1 %v7232_v43  ;;  %6198 = vmatprep.mubr.msk.f32.mxu1 %vm6761_vm0, %v8726_v51 }
 0x5ed   :  { %6192 = vmatprep.subr.mxu1 %v8726_v51 }
 0x5ee   :  { %6193 = vmatpush3.msra.mxu1 %v7241_v62 }
 0x5ef   :  { %6194 = vmatprep.subr.mxu1 %v8726_v51 }
 0x5f0   :  { %6195 = vmatpush3.msra.mxu1 %v7250_v50  ;;  %v8776_v50 = vld [vmem:[#allocation15_spill] sm:$0xff] }
 0x5f1   :  { %6196 = vmatprep.subr.mxu1 %v8726_v51 }
 0x5f2   :  { %6197 = vmatpush3.msra.mxu1 %v7257_v1  ;;  %v8777_v1 = vld [vmem:[#allocation16_spill] sm:$0xff] }
 0x5f3   :  { %6199 = vmatmul.mubr.msk.f32.vlgmr.msra.gmra.mxu1 %vm576_vm3, %v7414_v38  ;;  %6212 = vmatprep.subr.mxu1 %v8726_v51 }
 0x5f4   :  { %6213 = vmatpush3.msra.mxu1 %v7264_v63  ;;  %6220 = vmatprep.mubr.msk.f32.mxu1 %vm6761_vm0, %v8726_v51 }
 0x5f5   :  { %6214 = vmatprep.subr.mxu1 %v8726_v51 }
 0x5f6   :  { %6215 = vmatpush3.msra.mxu1 %v7273_v23  ;;  %v8778_v23 = vld [vmem:[#allocation17_spill] sm:$0xff] }
 0x5f7   :  { %6216 = vmatprep.subr.mxu1 %v8726_v51 }
 0x5f8   :  { %6217 = vmatpush3.msra.mxu1 %v7282_v27 }
 0x5f9   :  { %6218 = vmatprep.subr.mxu1 %v8726_v51 }
 0x5fa   :  { %6219 = vmatpush3.msra.mxu1 %v8774_v47 }
 0x5fb   :  { %6221 = vmatmul.mubr.msk.f32.vlgmr.msra.gmra.mxu1 %vm576_vm3, %v7414_v38  ;;  %6228 = vmatprep.subr.mxu1 %v8726_v51 }
 0x5fc   :  { %6232 = vmatprep.mubr.msk.f32.mxu1 %vm6761_vm0, %v8726_v51 }
 0x6a3   :  { %v1918_v25 = vpop.f32.mrf.mxu1 }
 0x6a4   :  { %v1919_v44 = vadd.f32 %v8775_v32, %v1918_v25  ;;  %v8792_v25 = vld [vmem:[#allocation4_spill] sm:$0xff] }
 0x6a5   :  { %v6156_v43 = vpop.f32.mrf.mxu1 }
 0x6a6   :  { %v1922_v62 = vmax.f32 %v1919_v44, 0.0  ;;  %v8793_v44 = vld [vmem:[#allocation5_spill] sm:$0xff] }
 0x6a8   :  { %6166 = vmatmul.mubr.msk.f32.vlgmr.msra.gmra.mxu0 %vm576_vm3, %v1922_v62 }
 0x6a9   :  { %6180 = vmatpush3.msra.mxu0 %v8776_v50  ;;  %6187 = vmatprep.mubr.msk.f32.mxu0 %vm6761_vm0, %v8726_v51 }
 0x6aa   :  { %6181 = vmatprep.subr.mxu0 %v8726_v51 }
 0x6ab   :  { %6182 = vmatpush3.msra.mxu0 %v8777_v1  ;;  %v2065_v63 = vpop.f32.mrf.mxu1  ;;  %v8795_v1 = vld [vmem:[#allocation7_spill] sm:$0xff] }
 0x6ac   :  { %6183 = vmatprep.subr.mxu0 %v8726_v51 }
 0x6ad   :  { %6184 = vmatpush3.msra.mxu0 %v8778_v23  ;;  %v6178_v27 = vpop.f32.mrf.mxu1 }
 0x6ae   :  { %6185 = vmatprep.subr.mxu0 %v8726_v51 }
 0x6af   :  { %6186 = vmatpush3.msra.mxu0 %v8779_v10 }
 0x6b0   :  { %6188 = vmatmul.mubr.msk.f32.vlgmr.msra.gmra.mxu0 %vm576_vm3, %v1922_v62  ;;  %6201 = vmatprep.subr.mxu0 %v8726_v51 }
 0x6b1   :  { %6202 = vmatpush3.msra.mxu0 %v8780_v60  ;;  %6209 = vmatprep.mubr.msk.f32.mxu0 %vm6761_vm0, %v8726_v51 }
 0x6b2   :  { %6203 = vmatprep.subr.mxu0 %v8726_v51 }
 0x6b3   :  { %6204 = vmatpush3.msra.mxu0 %v8781_v18  ;;  %v2213_v35 = vpop.f32.mrf.mxu1 }
 0x6b4   :  { %6205 = vmatprep.subr.mxu0 %v8726_v51 }
 0x6b5   :  { %6206 = vmatpush3.msra.mxu0 %v8782_v20  ;;  %v6200_v30 = vpop.f32.mrf.mxu1 }
 0x6b6   :  { %6207 = vmatprep.subr.mxu0 %v8726_v51  ;;  %v8797_v30 = vld [vmem:[#allocation9_spill] sm:$0xff] }
 0x6b7   :  { %6208 = vmatpush3.msra.mxu0 %v8783_v55 }
 0x6b8   :  { %6210 = vmatmul.mubr.msk.f32.vlgmr.msra.gmra.mxu0 %vm576_vm3, %v1922_v62  ;;  %v8794_v62 = vld [vmem:[#allocation6_spill] sm:$0xff] }
 0x6b9   :  { %6225 = vmatprep.mubr.msk.f32.mxu0 %vm218_vm2, %v8784_v5  ;;  %v8798_v5 = vld [vmem:[#allocation10_spill] sm:$0xff] }
 0x6bb   :  { %v2361_v29 = vpop.f32.mrf.mxu1 }
 0x6bc   :  { %v2362_v45 = vadd.f32 %v2361_v29, %v8789_v46 }
 0x6bd   :  { %v6222_v59 = vpop.f32.mrf.mxu1 }
 0x6be   :  { %v8799_v59 = vld [vmem:[#allocation11_spill] sm:$0xff] }
 0x768   :  { %v1992_v22 = vpop.f32.mrf.mxu0 }
 0x769   :  { %v1993_v42 = vadd.f32 %v1992_v22, %v8785_v16 }
 0x76a   :  { %v6167_v24 = vpop.f32.mrf.mxu0 }
 0x76b   :  { %v2069_v36 = vadd.f32 %v2065_v63, %v1993_v42 }
 0x76d   :  { %v2070_v9 = vadd.f32 %v2069_v36, %v8786_v52 }
 0x76f   :  { %v5765_v33 = vmul.f32 -1.442695, %v2070_v9 }
 0x770   :  { %v2143_v8 = vpop.f32.mrf.mxu0 }
 0x771   :  { %6607 = vpow2.f32 %v5765_v33  ;;  %v2144_v39 = vadd.f32 %v2143_v8, %v8787_v56 }
 0x772   :  { %v6189_v58 = vpop.f32.mrf.mxu0 }
 0x773   :  { %v2217_v13 = vadd.f32 %v2213_v35, %v2144_v39  ;;  %v8796_v35 = vld [vmem:[#allocation8_spill] sm:$0xff] }
 0x775   :  { %v2218_v28 = vadd.f32 %v2217_v13, %v8788_v14  ;;  %v8800_v13 = vld [vmem:[#allocation29_spill] sm:$0xff] }
 0x777   :  { %v5768_v48 = vmul.f32 -1.442695, %v2218_v28 }
 0x778   :  { %v2291_v7 = vpop.f32.mrf.mxu0 }
 0x779   :  { %6609 = vpow2.f32 %v5768_v48  ;;  %v2292_v17 = vadd.f32 %v2291_v7, %v8790_v6  ;;  %v8801_v48 = vld [vmem:[#allocation30_spill] sm:$0xff] }
 0x77a   :  { %v6211_v31 = vpop.f32.mrf.mxu0 }
 0x77b   :  { %v8802_v31 = vld [vmem:[#allocation31_spill] sm:$0xff] }
 0x77e   :  { %v6608_v34 = vpop.eup %6607 }
 0x77f   :  { %v2074_v49 = vadd.f32 1.0, %v6608_v34 }
 0x781   :  { %6611 = vrcp.f32 %v2074_v49  ;;  %v8803_v49 = vld [vmem:[#allocation32_spill] sm:$0xff] }
 0x786   :  { %v6610_v12 = vpop.eup %6609 }
 0x787   :  { %v2222_v53 = vadd.f32 1.0, %v6610_v12 }
 0x789   :  { %6613 = vrcp.f32 %v2222_v53 }
 0x78e   :  { %v6612_v40 = vpop.eup %6611 }
 0x78f   :  { %v2365_v57 = vmul.f32 %v6612_v40, %v2362_v45 }
 0x791   :  { %v2366_v26 = vadd.f32 %v2365_v57, %v2292_v17  ;;  %v8804_v57 = vld [vmem:[#allocation33_spill] sm:$0xff] }
 0x793   :  { %6615 = vtanh.f32 %v2366_v26 }
 0x796   :  { %v6614_v41 = vpop.eup %6613 }
 0x797   :  { %v2368_v61 = vsub.f32 1.0, %v6614_v41  ;;  %v2370_v11 = vmul.f32 %v6614_v41, %v7414_v38  ;;  %v6719_v38 = vld [vmem:[%s8629_s7 + $0x10] sm:$0xff]  ;;  %v8805_v41 = vld [vmem:[#allocation34_spill] sm:$0xff] }
 0x7a0   :  { %v6616_v21 = vpop.eup %6615 }
 0x7a1   :  { %v2369_v0 = vmul.f32 %v6616_v21, %v2368_v61 }
 0x7a3   :  { %v7785_v54 = vadd.f32 %v2370_v11, %v2369_v0 }
 0x7a5   :  { %6223 = vmatprep.subr.mxu0 %v7785_v54 }
 0x7a6   :  { %6224 = vmatpush3.msra.mxu0 %v7785_v54 }
 0x7a7   :  { %6226 = vmatmul.mubr.msk.f32.vlgmr.msra.gmra.mxu0 %vm218_vm2, %v8791_v19  ;;  %6235 = vmatprep.subr.mxu0 %v8726_v51  ;;  %v8806_v19 = vld [vmem:[#allocation35_spill] sm:$0xff] }
 0x7a8   :  { %6236 = vmatpush3.msra.mxu0 %v6718_v2  ;;  %6243 = vmatprep.mubr.msk.f32.mxu0 %vm6761_vm0, %v8726_v51 }
 0x7a9   :  { %6237 = vmatprep.subr.mxu0 %v8726_v51 }
 0x7aa   :  { %6238 = vmatpush3.msra.mxu0 %v6719_v38  ;;  %v8807_v38 = vld [vmem:[#allocation36_spill] sm:$0xff] }
 0x7ab   :  { %6239 = vmatprep.subr.mxu0 %v8726_v51 }
 0x7ac   :  { %6240 = vmatpush3.msra.mxu0 %v6720_v4 }
 0x7ad   :  { %6241 = vmatprep.subr.mxu0 %v8726_v51 }
 0x7ae   :  { %6242 = vmatpush3.msra.mxu0 %v6721_v15 }
 0x7af   :  { %6257 = vmatprep.subr.mxu0 %v8726_v51 }
 0x867   :  { %v6227_v47 = vpop.f32.mrf.mxu0 }
 0x868   :  { %v2602_v32 = vrot.slane %v6227_v47, %v8792_v25  ;;  %v2621_v43 = vrot.slane %v6227_v47, %v8793_v44  ;;  %v2640_v50 = vrot.slane %v6227_v47, %v8794_v62  ;;  %v2659_v63 = vrot.slane %v6227_v47, %v8795_v1 }
 0x869   :  { %v2438_v23 = vpop.f32.mrf.mxu0 }
 0x86a   :  { %2608 = vbcast.lane.b32.xlu1 %v2602_v32, 264  ;;  %2604 = vbcast.lane.b32.xlu0 %v2602_v32, 256  ;;  %v2450_v27 = vrot.slane %v2438_v23, %v8792_v25  ;;  %v2469_v10 = vrot.slane %v2438_v23, %v8793_v44  ;;  %v2488_v60 = vrot.slane %v2438_v23, %v8794_v62 }
 0x86b   :  { %v2507_v18 = vrot.slane %v2438_v23, %v8795_v1  ;;  %v2526_v20 = vrot.slane %v2438_v23, %v8796_v35  ;;  %v2545_v55 = vrot.slane %v2438_v23, %v8797_v30  ;;  %v2564_v29 = vrot.slane %v2438_v23, %v8798_v5 }
 0x86c   :  { %v2583_v22 = vrot.slane %v2438_v23, %v8799_v59 }
 0x86e   :  { %2627 = vbcast.lane.b32.xlu1 %v2621_v43, 264  ;;  %2623 = vbcast.lane.b32.xlu0 %v2621_v43, 256 }
 0x872   :  { %2642 = vbcast.lane.b32.xlu1 %v2640_v50, 256  ;;  %2646 = vbcast.lane.b32.xlu0 %v2640_v50, 264 }
 0x876   :  { %2631 = vbcast.lane.b32.xlu1 %v2621_v43, 272  ;;  %2612 = vbcast.lane.b32.xlu0 %v2602_v32, 272 }
 0x87a   :  { %2665 = vbcast.lane.b32.xlu1 %v2659_v63, 264  ;;  %2661 = vbcast.lane.b32.xlu0 %v2659_v63, 256 }
 0x87e   :  { %2616 = vbcast.lane.b32.xlu1 %v2602_v32, 280  ;;  %2650 = vbcast.lane.b32.xlu0 %v2640_v50, 272 }
 0x882   :  { %2669 = vbcast.lane.b32.xlu1 %v2659_v63, 272  ;;  %2635 = vbcast.lane.b32.xlu0 %v2621_v43, 280  ;;  %v8808_v43 = vld [vmem:[#allocation37_spill] sm:$0xff] }
 0x886   :  { %2673 = vbcast.lane.b32.xlu1 %v2659_v63, 280  ;;  %2654 = vbcast.lane.b32.xlu0 %v2640_v50, 280  ;;  %v8809_v63 = vld [vmem:[#allocation38_spill] sm:$0xff] }
 0x88a   :  { %2456 = vbcast.lane.b32.xlu1 %v2450_v27, 264  ;;  %2452 = vbcast.lane.b32.xlu0 %v2450_v27, 256 }
 0x88e   :  { %2475 = vbcast.lane.b32.xlu1 %v2469_v10, 264  ;;  %2471 = vbcast.lane.b32.xlu0 %v2469_v10, 256 }
 0x892   :  { %2494 = vbcast.lane.b32.xlu1 %v2488_v60, 264  ;;  %2490 = vbcast.lane.b32.xlu0 %v2488_v60, 256 }
 0x896   :  { %2479 = vbcast.lane.b32.xlu1 %v2469_v10, 272  ;;  %2460 = vbcast.lane.b32.xlu0 %v2450_v27, 272 }
 0x89a   :  { %2513 = vbcast.lane.b32.xlu1 %v2507_v18, 264  ;;  %2509 = vbcast.lane.b32.xlu0 %v2507_v18, 256 }
 0x89e   :  { %2528 = vbcast.lane.b32.xlu1 %v2526_v20, 256  ;;  %2498 = vbcast.lane.b32.xlu0 %v2488_v60, 272 }
 0x8a2   :  { %2464 = vbcast.lane.b32.xlu1 %v2450_v27, 280  ;;  %2532 = vbcast.lane.b32.xlu0 %v2526_v20, 264  ;;  %v8810_v27 = vld [vmem:[#allocation39_spill] sm:$0xff] }
 0x8a6   :  { %2517 = vbcast.lane.b32.xlu1 %v2507_v18, 272  ;;  %2483 = vbcast.lane.b32.xlu0 %v2469_v10, 280 }
 0x8aa   :  { %2551 = vbcast.lane.b32.xlu1 %v2545_v55, 264  ;;  %2547 = vbcast.lane.b32.xlu0 %v2545_v55, 256 }
 0x8ae   :  { %2536 = vbcast.lane.b32.xlu1 %v2526_v20, 272  ;;  %2502 = vbcast.lane.b32.xlu0 %v2488_v60, 280 }
 0x8b2   :  { %2570 = vbcast.lane.b32.xlu1 %v2564_v29, 264  ;;  %2566 = vbcast.lane.b32.xlu0 %v2564_v29, 256 }
 0x8b6   :  { %2521 = vbcast.lane.b32.xlu1 %v2507_v18, 280  ;;  %2555 = vbcast.lane.b32.xlu0 %v2545_v55, 272 }
 0x8ba   :  { %2585 = vbcast.lane.b32.xlu1 %v2583_v22, 256  ;;  %2589 = vbcast.lane.b32.xlu0 %v2583_v22, 264 }
 0x8be   :  { %2574 = vbcast.lane.b32.xlu1 %v2564_v29, 272  ;;  %2540 = vbcast.lane.b32.xlu0 %v2526_v20, 280  ;;  %v8811_v20 = vld [vmem:[#allocation40_spill] sm:$0xff] }
 0x8c2   :  { %2559 = vbcast.lane.b32.xlu1 %v2545_v55, 280  ;;  %2593 = vbcast.lane.b32.xlu0 %v2583_v22, 272 }
 0x8c6   :  { %2597 = vbcast.lane.b32.xlu1 %v2583_v22, 280  ;;  %2578 = vbcast.lane.b32.xlu0 %v2564_v29, 280 }
 0x8dc   :  { %v2609_v42 = vpop.permute.xlu1 %2608  ;;  %v2605_v24 = vpop.permute.xlu0 %2604 }
 0x8dd   :  { %v2708_v28 = vmul.f32 %v8800_v13, %v2609_v42  ;;  %v2707_v7 = vmul.f32 %v8801_v48, %v2605_v24 }
 0x8df   :  { %v2828_v40 = vsel %vm576_vm3, %v2708_v28, 0.0  ;;  %v2827_v17 = vsel %vm576_vm3, %v2707_v7, 0.0 }
 0x8e0   :  { %v2628_v36 = vpop.permute.xlu1 %2627  ;;  %v2624_v9 = vpop.permute.xlu0 %2623  ;;  %v2829_v0 = vadd.f32 %v2828_v40, %v2827_v17  ;;  %v8814_v40 = vld [vmem:[#allocation43_spill] sm:$0xff] }
 0x8e1   :  { %v2712_v12 = vmul.f32 %v8803_v49, %v2628_v36  ;;  %v2711_v26 = vmul.f32 %v8804_v57, %v2624_v9  ;;  %v8812_v9 = vld [vmem:[#allocation41_spill] sm:$0xff]  ;;  %v8815_v57 = vld [vmem:[#allocation44_spill] sm:$0xff] }
 0x8e3   :  { %v2841_v11 = vsel %vm576_vm3, %v2712_v12, 0.0  ;;  %v2840_v32 = vsel %vm576_vm3, %v2711_v26, 0.0 }
 0x8e4   :  { %v2643_v33 = vpop.permute.xlu1 %2642  ;;  %v2647_v8 = vpop.permute.xlu0 %2646  ;;  %v2842_v55 = vadd.f32 %v2841_v11, %v2840_v32 }
 0x8e5   :  { %v2715_v2 = vmul.f32 %v8806_v19, %v2643_v33  ;;  %v2716_v4 = vmul.f32 %v8807_v38, %v2647_v8  ;;  %v8813_v8 = vld [vmem:[#allocation42_spill] sm:$0xff] }
 0x8e7   :  { %v2853_v5 = vsel %vm576_vm3, %v2715_v2, 0.0  ;;  %v2854_v29 = vsel %vm576_vm3, %v2716_v4, 0.0 }
 0x8e8   :  { %v2632_v39 = vpop.permute.xlu1 %2631  ;;  %v2613_v58 = vpop.permute.xlu0 %2612 }
 0x8e9   :  { %v2709_v34 = vmul.f32 %v8802_v31, %v2613_v58  ;;  %v2713_v61 = vmul.f32 %v8805_v41, %v2632_v39  ;;  %v2855_v31 = vadd.f32 %v2854_v29, %v2853_v5 }
 0x8eb   :  { %v2830_v21 = vsel %vm576_vm3, %v2709_v34, 0.0  ;;  %v2843_v18 = vsel %vm576_vm3, %v2713_v61, 0.0 }
 0x8ec   :  { %v2666_v53 = vpop.permute.xlu1 %2665  ;;  %v2662_v45 = vpop.permute.xlu0 %2661  ;;  %v2831_v60 = vadd.f32 %v2830_v21, %v2829_v0  ;;  %v2844_v58 = vadd.f32 %v2843_v18, %v2842_v55 }
 0x8ed   :  { %v2720_v50 = vmul.f32 %v8808_v43, %v2666_v53  ;;  %v2719_v23 = vmul.f32 %v8809_v63, %v2662_v45 }
 0x8ef   :  { %v2867_v24 = vsel %vm576_vm3, %v2720_v50, 0.0  ;;  %v2866_v36 = vsel %vm576_vm3, %v2719_v23, 0.0 }
 0x8f0   :  { %v2617_v15 = vpop.permute.xlu1 %2616  ;;  %v2651_v47 = vpop.permute.xlu0 %2650  ;;  %v2868_v34 = vadd.f32 %v2867_v24, %v2866_v36 }
 0x8f1   :  { %v2710_v10 = vmul.f32 %v8810_v27, %v2617_v15  ;;  %v2717_v30 = vmul.f32 %v8811_v20, %v2651_v47 }
 0x8f3   :  { %v2832_v35 = vsel %vm576_vm3, %v2710_v10, 0.0  ;;  %v2856_v28 = vsel %vm576_vm3, %v2717_v30, 0.0 }
 0x8f4   :  { %v2833_v59 = vadd.f32 %v2832_v35, %v2831_v60  ;;  %v2670_v22 = vpop.permute.xlu1 %2669  ;;  %v2636_v42 = vpop.permute.xlu0 %2635  ;;  %v2857_v41 = vadd.f32 %v2856_v28, %v2855_v31 }
 0x8f5   :  { %v2721_v33 = vmul.f32 %v8812_v9, %v2670_v22  ;;  %v2714_v39 = vmul.f32 %v8813_v8, %v2636_v42 }
 0x8f6   :  { %v2834_v13 = vrot.slane %v2833_v59, 4 }
 0x8f7   :  { %v2869_v48 = vsel %vm576_vm3, %v2721_v33, 0.0  ;;  %v2845_v7 = vsel %vm576_vm3, %v2714_v39, 0.0 }
 0x8f8   :  { %v2835_v49 = vadd.f32 %v2834_v13, %v2833_v59  ;;  %v2846_v12 = vadd.f32 %v2845_v7, %v2844_v58  ;;  %v2674_v53 = vpop.permute.xlu1 %2673  ;;  %v2655_v45 = vpop.permute.xlu0 %2654  ;;  %v2870_v61 = vadd.f32 %v2869_v48, %v2868_v34 }
 0x8f9   :  { %v2722_v17 = vmul.f32 %v8814_v40, %v2674_v53  ;;  %v2718_v26 = vmul.f32 %v8815_v57, %v2655_v45 }
 0x8fa   :  { %v2847_v21 = vrot.slane %v2846_v12, 4  ;;  %v2836_v0 = vrot.slane %v2835_v49, 2 }
 0x8fb   :  { %v2871_v11 = vsel %vm576_vm3, %v2722_v17, 0.0  ;;  %v2858_v19 = vsel %vm576_vm3, %v2718_v26, 0.0  ;;  %v8816_v17 = vld [vmem:[#allocation45_spill] sm:$0xff]  ;;  %v8817_v26 = vld [vmem:[#allocation46_spill] sm:$0xff] }
 0x8fc   :  { %v2848_v2 = vadd.f32 %v2847_v21, %v2846_v12  ;;  %v2872_v38 = vadd.f32 %v2871_v11, %v2870_v61  ;;  %v2859_v4 = vadd.f32 %v2858_v19, %v2857_v41  ;;  %v2457_v15 = vpop.permute.xlu1 %2456  ;;  %v2453_v47 = vpop.permute.xlu0 %2452  ;;  %v2837_v63 = vadd.f32 %v2836_v0, %v2835_v49  ;;  %v8818_v61 = vld [vmem:[#allocation47_spill] sm:$0xff]  ;;  %v8819_v0 = vld [vmem:[#allocation48_spill] sm:$0xff] }
 0x8fe   :  { %v2849_v32 = vrot.slane %v2848_v2, 2  ;;  %v2873_v43 = vrot.slane %v2872_v38, 4  ;;  %v2860_v50 = vrot.slane %v2859_v4, 4  ;;  %v2838_v55 = vrot.slane %v2837_v63, 1 }
 0x900   :  { %v2850_v23 = vadd.f32 %v2849_v32, %v2848_v2  ;;  %v2874_v27 = vadd.f32 %v2873_v43, %v2872_v38  ;;  %v2861_v10 = vadd.f32 %v2860_v50, %v2859_v4  ;;  %v2476_v60 = vpop.permute.xlu1 %2475  ;;  %v2472_v18 = vpop.permute.xlu0 %2471  ;;  %v2839_v9 = vadd.f32 %v2838_v55, %v2837_v63  ;;  %v8820_v38 = vld [vmem:[#allocation49_spill] sm:$0xff]  ;;  %v8821_v32 = vld [vmem:[#allocation50_spill] sm:$0xff]  ;;  %v8822_v50 = vld [vmem:[#allocation51_spill] sm:$0xff] }
 0x901   :  { %v2680_v57 = vmul.f32 %v8816_v17, %v2476_v60  ;;  %v2679_v41 = vmul.f32 %v8817_v26, %v2472_v18  ;;  %v2676_v43 = vmul.f32 %v8821_v32, %v2457_v15  ;;  %v2675_v63 = vmul.f32 %v8822_v50, %v2453_v47  ;;  %v8825_v55 = vld [vmem:[#allocation54_spill] sm:$0xff] }
 0x902   :  { %v2851_v35 = vrot.slane %v2850_v23, 1  ;;  %v2875_v20 = vrot.slane %v2874_v27, 2  ;;  %v2862_v30 = vrot.slane %v2861_v10, 2  ;;  %v6722_v50 = vld [vmem:[%s8628_s3 + $0x80] sm:$0xff] }
 0x904   :  { %v2876_v5 = vadd.f32 %v2875_v20, %v2874_v27  ;;  %v2863_v29 = vadd.f32 %v2862_v30, %v2861_v10  ;;  %v2495_v59 = vpop.permute.xlu1 %2494  ;;  %v2491_v22 = vpop.permute.xlu0 %2490  ;;  %v2852_v42 = vadd.f32 %v2851_v35, %v2850_v23  ;;  %v2737_v23 = vsel %vm576_vm3, %v2680_v57, 0.0  ;;  %v8823_v10 = vld [vmem:[#allocation52_spill] sm:$0xff]  ;;  %v8824_v35 = vld [vmem:[#allocation53_spill] sm:$0xff] }
 0x905   :  { %v2684_v21 = vmul.f32 %v8818_v61, %v2495_v59  ;;  %v2683_v11 = vmul.f32 %v8819_v0, %v2491_v22  ;;  %v2736_v27 = vsel %vm576_vm3, %v2679_v41, 0.0  ;;  %v8826_v22 = vld [vmem:[#allocation55_spill] sm:$0xff] }
 0x906   :  { %v2877_v24 = vrot.slane %v2876_v5, 1  ;;  %v2864_v36 = vrot.slane %v2863_v29, 1  ;;  %v2898_v13 = vsel %vm751_vm4, %v2852_v42, %v2839_v9  ;;  %v8827_v42 = vld [vmem:[#allocation56_spill] sm:$0xff] }
 0x907   :  { %v2750_v20 = vsel %vm576_vm3, %v2684_v21, 0.0  ;;  %v2749_v30 = vsel %vm576_vm3, %v2683_v11, 0.0 }
 0x908   :  { %v2878_v33 = vadd.f32 %v2877_v24, %v2876_v5  ;;  %v2865_v8 = vadd.f32 %v2864_v36, %v2863_v29  ;;  %v2480_v39 = vpop.permute.xlu1 %2479  ;;  %v2461_v58 = vpop.permute.xlu0 %2460  ;;  %v8828_v36 = vld [vmem:[#allocation57_spill] sm:$0xff] }
 0x909   :  { %v2681_v4 = vmul.f32 %v8820_v38, %v2480_v39  ;;  %v2677_v5 = vmul.f32 %v8825_v55, %v2461_v58  ;;  %v2738_v39 = vadd.f32 %v2737_v23, %v2736_v27  ;;  %v6723_v23 = vld [vmem:[%s8628_s3 + $0x88] sm:$0xff] }
 0x90a   :  { %v2899_v28 = vsel %vm753_vm5, %v2865_v8, %v2898_v13  ;;  %v2723_v8 = vsel %vm576_vm3, %v2675_v63, 0.0 }
 0x90b   :  { %v2900_v48 = vsel %vm755_vm6, %v2878_v33, %v2899_v28  ;;  %v2739_v15 = vsel %vm576_vm3, %v2681_v4, 0.0  ;;  %v2724_v33 = vsel %vm576_vm3, %v2676_v43, 0.0  ;;  %v8829_v28 = vld [vmem:[#allocation58_spill] sm:$0xff] }
 0x90c   :  { %6229 = vmatpush3.msk.msra.mxu1 %vm773_vm7, %v2900_v48  ;;  %v2514_v7 = vpop.permute.xlu1 %2513  ;;  %v2510_v31 = vpop.permute.xlu0 %2509  ;;  %v2740_v17 = vadd.f32 %v2739_v15, %v2738_v39  ;;  %v2725_v21 = vadd.f32 %v2724_v33, %v2723_v8 }
 0x90d   :  { %6230 = vmatprep.subr.mxu1 %v8726_v51  ;;  %v2688_v47 = vmul.f32 %v8826_v22, %v2514_v7  ;;  %v2687_v24 = vmul.f32 %v8827_v42, %v2510_v31  ;;  %v2726_v31 = vsel %vm576_vm3, %v2677_v5, 0.0 }
 0x90f   :  { %v2763_v26 = vsel %vm576_vm3, %v2688_v47, 0.0  ;;  %v2762_v41 = vsel %vm576_vm3, %v2687_v24, 0.0 }
 0x910   :  { %v2529_v34 = vpop.permute.xlu1 %2528  ;;  %v2499_v49 = vpop.permute.xlu0 %2498  ;;  %v2764_v38 = vadd.f32 %v2763_v26, %v2762_v41 }
 0x911   :  { %v2685_v60 = vmul.f32 %v8823_v10, %v2499_v49  ;;  %v2691_v63 = vmul.f32 %v6722_v50, %v2529_v34  ;;  %v6724_v10 = vld [vmem:[%s8628_s3 + $0x78] sm:$0xff]  ;;  %v6726_v34 = vld [vmem:[%s8628_s3 + $0xa0] sm:$0xff] }
 0x913   :  { %v2752_v13 = vsel %vm576_vm3, %v2685_v60, 0.0 }
 0x914   :  { %v2465_v12 = vpop.permute.xlu1 %2464  ;;  %v2533_v53 = vpop.permute.xlu0 %2532 }
 0x915   :  { %v2678_v48 = vmul.f32 %v8829_v28, %v2465_v12  ;;  %v2692_v27 = vmul.f32 %v6723_v23, %v2533_v53  ;;  %v6727_v53 = vld [vmem:[%s8628_s3 + $0x90] sm:$0xff] }
 0x917   :  { %v2728_v12 = vsel %vm576_vm3, %v2678_v48, 0.0 }
 0x918   :  { %v2518_v45 = vpop.permute.xlu1 %2517  ;;  %v2484_v40 = vpop.permute.xlu0 %2483 }
 0x919   :  { %v2682_v18 = vmul.f32 %v8824_v35, %v2484_v40  ;;  %v2689_v58 = vmul.f32 %v7659_v3, %v2518_v45  ;;  %v2751_v40 = vadd.f32 %v2750_v20, %v2749_v30  ;;  %v2727_v45 = vadd.f32 %v2726_v31, %v2725_v21  ;;  %v6725_v30 = vld [vmem:[%s8628_s3 + $0xa8] sm:$0xff] }
 0x91b   :  { %v2741_v49 = vsel %vm576_vm3, %v2682_v18, 0.0  ;;  %v2753_v0 = vadd.f32 %v2752_v13, %v2751_v40  ;;  %v2765_v3 = vsel %vm576_vm3, %v2689_v58, 0.0  ;;  %v2729_v35 = vadd.f32 %v2728_v12, %v2727_v45 }
 0x91c   :  { %v2552_v19 = vpop.permute.xlu1 %2551  ;;  %v2548_v2 = vpop.permute.xlu0 %2547  ;;  %v2742_v11 = vadd.f32 %v2741_v49, %v2740_v17  ;;  %v2766_v18 = vadd.f32 %v2765_v3, %v2764_v38  ;;  %v6729_v49 = vld [vmem:[%s8628_s3 + $0xc8] sm:$0xff]  ;;  %v6730_v17 = vld [vmem:[%s8628_s3 + $0xc0] sm:$0xff] }
 0x91d   :  { %v2696_v55 = vmul.f32 %v6725_v30, %v2552_v19  ;;  %v2695_v5 = vmul.f32 %v6726_v34, %v2548_v2  ;;  %v2775_v19 = vsel %vm576_vm3, %v2691_v63, 0.0 }
 0x91e   :  { %v2743_v20 = vrot.slane %v2742_v11, 4 }
 0x91f   :  { %v2789_v8 = vsel %vm576_vm3, %v2696_v55, 0.0  ;;  %v2788_v2 = vsel %vm576_vm3, %v2695_v5, 0.0  ;;  %v6735_v55 = vld [vmem:[%s8628_s3 + $0xb8] sm:$0xff]  ;;  %v6736_v5 = vld [vmem:[%s8628_s3 + $0xf0] sm:$0xff] }
 0x920   :  { %v2537_v29 = vpop.permute.xlu1 %2536  ;;  %v2503_v59 = vpop.permute.xlu0 %2502  ;;  %v2744_v33 = vadd.f32 %v2743_v20, %v2742_v11 }
 0x921   :  { %v2686_v9 = vmul.f32 %v8828_v36, %v2503_v59  ;;  %v2693_v59 = vmul.f32 %v6727_v53, %v2537_v29  ;;  %v2776_v36 = vsel %vm576_vm3, %v2692_v27, 0.0  ;;  %v6728_v29 = vld [vmem:[%s8628_s3 + $0xb0] sm:$0xff] }
 0x922   :  { %v2777_v48 = vadd.f32 %v2776_v36, %v2775_v19  ;;  %v2745_v45 = vrot.slane %v2744_v33, 2 }
 0x923   :  { %v2754_v61 = vsel %vm576_vm3, %v2686_v9, 0.0  ;;  %v2730_v9 = vrot.slane %v2729_v35, 4  ;;  %v2778_v39 = vsel %vm576_vm3, %v2693_v59, 0.0 }
 0x924   :  { %v2571_v7 = vpop.permute.xlu1 %2570  ;;  %v2567_v57 = vpop.permute.xlu0 %2566  ;;  %v2755_v4 = vadd.f32 %v2754_v61, %v2753_v0  ;;  %v6731_v61 = vld [vmem:[%s8628_s3 + $0xe0] sm:$0xff]  ;;  %v6732_v0 = vld [vmem:[%s8628_s3 + $0xe8] sm:$0xff]  ;;  %v2779_v38 = vadd.f32 %v2778_v39, %v2777_v48  ;;  %v6737_v48 = vld [vmem:[%s8628_s3 + $0xf8] sm:$0xff] }
 0x925   :  { %v2700_v40 = vmul.f32 %v6729_v49, %v2571_v7  ;;  %v2699_v31 = vmul.f32 %v6730_v17, %v2567_v57  ;;  %v6733_v7 = vld [vmem:[%s8628_s3 + $0x98] sm:$0xff]  ;;  %v2731_v3 = vadd.f32 %v2730_v9, %v2729_v35  ;;  %v2790_v57 = vadd.f32 %v2789_v8, %v2788_v2 }
 0x926   :  { %v2756_v22 = vrot.slane %v2755_v4, 4 }
 0x927   :  { %v2802_v27 = vsel %vm576_vm3, %v2700_v40, 0.0  ;;  %v2732_v59 = vrot.slane %v2731_v3, 2  ;;  %v6738_v40 = vld [vmem:[%s8628_s3 + $0xd8] sm:$0xff] }
 0x928   :  { %v2522_v32 = vpop.permute.xlu1 %2521  ;;  %v2556_v43 = vpop.permute.xlu0 %2555  ;;  %v2757_v58 = vadd.f32 %v2756_v22, %v2755_v4 }
 0x929   :  { %v2690_v60 = vmul.f32 %v6724_v10, %v2522_v32  ;;  %v2697_v28 = vmul.f32 %v6728_v29, %v2556_v43  ;;  %v6734_v43 = vld [vmem:[%s8628_s3 + $0xd0] sm:$0xff]  ;;  %v2801_v10 = vsel %vm576_vm3, %v2699_v31, 0.0  ;;  %v2746_v29 = vadd.f32 %v2745_v45, %v2744_v33 }
 0x92a   :  { %v2758_v23 = vrot.slane %v2757_v58, 2  ;;  %v2803_v19 = vadd.f32 %v2802_v27, %v2801_v10 }
 0x92b   :  { %v2767_v15 = vsel %vm576_vm3, %v2690_v60, 0.0  ;;  %v2791_v32 = vsel %vm576_vm3, %v2697_v28, 0.0 }
 0x92c   :  { %v2768_v47 = vadd.f32 %v2767_v15, %v2766_v18  ;;  %v2586_v42 = vpop.permute.xlu1 %2585  ;;  %v2590_v24 = vpop.permute.xlu0 %2589  ;;  %v2792_v15 = vadd.f32 %v2791_v32, %v2790_v57  ;;  %v2759_v28 = vadd.f32 %v2758_v23, %v2757_v58  ;;  %v2747_v57 = vrot.slane %v2746_v29, 1 }
 0x92d   :  { %v2703_v21 = vmul.f32 %v6731_v61, %v2586_v42  ;;  %v2704_v11 = vmul.f32 %v6732_v0, %v2590_v24 }
 0x92e   :  { %v2769_v13 = vrot.slane %v2768_v47, 4 }
 0x92f   :  { %v2814_v20 = vsel %vm576_vm3, %v2703_v21, 0.0  ;;  %v2815_v30 = vsel %vm576_vm3, %v2704_v11, 0.0  ;;  %v2733_v21 = vadd.f32 %v2732_v59, %v2731_v3 }
 0x930   :  { %v2575_v26 = vpop.permute.xlu1 %2574  ;;  %v2541_v41 = vpop.permute.xlu0 %2540  ;;  %v2770_v4 = vadd.f32 %v2769_v13, %v2768_v47  ;;  %v2816_v9 = vadd.f32 %v2815_v30, %v2814_v20 }
 0x931   :  { %v2694_v12 = vmul.f32 %v6733_v7, %v2541_v41  ;;  %v2701_v50 = vmul.f32 %v6734_v43, %v2575_v26 }
 0x932   :  { %v2771_v47 = vrot.slane %v2770_v4, 2 }
 0x933   :  { %v2780_v63 = vsel %vm576_vm3, %v2694_v12, 0.0  ;;  %v2804_v42 = vsel %vm576_vm3, %v2701_v50, 0.0 }
 0x934   :  { %v2781_v60 = vadd.f32 %v2780_v63, %v2779_v38  ;;  %v2560_v35 = vpop.permute.xlu1 %2559  ;;  %v2594_v18 = vpop.permute.xlu0 %2593  ;;  %v2805_v31 = vadd.f32 %v2804_v42, %v2803_v19  ;;  %v2772_v0 = vadd.f32 %v2771_v47, %v2770_v4  ;;  %v2760_v38 = vrot.slane %v2759_v28, 1 }
 0x935   :  { %v2698_v34 = vmul.f32 %v6735_v55, %v2560_v35  ;;  %v2705_v53 = vmul.f32 %v6736_v5, %v2594_v18  ;;  %v2734_v63 = vrot.slane %v2733_v21, 1  ;;  %v2748_v4 = vadd.f32 %v2747_v57, %v2746_v29  ;;  %v6739_v29 = vld [vmem:[%s8631_s8 + $0x18] sm:$0xff]  ;;  %v8084_v57 = vld [vmem:[%s8635_s12 + $0x20] sm:$0xff] }
 0x936   :  { %v2782_v22 = vrot.slane %v2781_v60, 4  ;;  %v2773_v23 = vrot.slane %v2772_v0, 1  ;;  %v2761_v35 = vadd.f32 %v2760_v38, %v2759_v28  ;;  %v6740_v28 = vld [vmem:[%s8631_s8 + $0x10] sm:$0xff]  ;;  %v8094_v38 = vld [vmem:[%s8635_s12 + $0x58] sm:$0xff] }
 0x937   :  { %v2793_v24 = vsel %vm576_vm3, %v2698_v34, 0.0  ;;  %v2817_v36 = vsel %vm576_vm3, %v2705_v53, 0.0  ;;  %v2735_v55 = vadd.f32 %v2734_v63, %v2733_v21  ;;  %v6750_v21 = vld [vmem:[%s8631_s8 + $0x40] sm:$0xff]  ;;  %v8123_v63 = vld [vmem:[%s8635_s12 + $0x78] sm:$0xff] }
 0x938   :  { %v2783_v8 = vadd.f32 %v2782_v22, %v2781_v60  ;;  %v2794_v2 = vadd.f32 %v2793_v24, %v2792_v15  ;;  %v2598_v39 = vpop.permute.xlu1 %2597  ;;  %v2579_v13 = vpop.permute.xlu0 %2578  ;;  %v2818_v61 = vadd.f32 %v2817_v36, %v2816_v9  ;;  %v2774_v34 = vadd.f32 %v2773_v23, %v2772_v0  ;;  %v8032_v0 = vld [vmem:[%s8635_s12 + $0x18] sm:$0xff]  ;;  %v8132_v23 = vld [vmem:[%s8635_s12 + $0x70] sm:$0xff] }
 0x939   :  { %v2706_v49 = vmul.f32 %v6737_v48, %v2598_v39  ;;  %v2702_v17 = vmul.f32 %v6738_v40, %v2579_v13  ;;  %v2891_v15 = vsel %vm751_vm4, %v2748_v4, %v2735_v55  ;;  %v6742_v48 = vld [vmem:[%s8631_s8] sm:$0xff]  ;;  %v6744_v40 = vld [vmem:[%s8631_s8 + $0x30] sm:$0xff] }
 0x93a   :  { %v2784_v26 = vrot.slane %v2783_v8, 2  ;;  %v2795_v41 = vrot.slane %v2794_v2, 4  ;;  %v2892_v47 = vsel %vm753_vm5, %v2761_v35, %v2891_v15  ;;  %v6757_v15 = vld [vmem:[%s8629_s7 + $0x50] sm:$0xff] }
 0x93b   :  { %v2819_v11 = vsel %vm576_vm3, %v2706_v49, 0.0  ;;  %v2806_v33 = vsel %vm576_vm3, %v2702_v17, 0.0  ;;  %v2893_v36 = vsel %vm755_vm6, %v2774_v34, %v2892_v47  ;;  %v6743_v49 = vld [vmem:[%s8631_s8 + $0x38] sm:$0xff]  ;;  %v6745_v17 = vld [vmem:[%s8631_s8 + $0x28] sm:$0xff] }
 0x93c   :  { %v2785_v58 = vadd.f32 %v2784_v26, %v2783_v8  ;;  %v2796_v7 = vadd.f32 %v2795_v41, %v2794_v2  ;;  %v2820_v12 = vadd.f32 %v2819_v11, %v2818_v61  ;;  %v2807_v45 = vadd.f32 %v2806_v33, %v2805_v31  ;;  %v6746_v31 = vld [vmem:[%s8631_s8 + $0x20] sm:$0xff]  ;;  %v6747_v26 = vld [vmem:[%s8631_s8 + $0x58] sm:$0xff]  ;;  %v6748_v41 = vld [vmem:[%s8631_s8 + $0x50] sm:$0xff] }
 0x93d   :  { %v6749_v61 = vld [vmem:[%s8631_s8 + $0x48] sm:$0xff]  ;;  %v8039_v11 = vld [vmem:[%s8635_s12 + $0x10] sm:$0xff] }
 0x93e   :  { %v2797_v32 = vrot.slane %v2796_v7, 2  ;;  %v2821_v43 = vrot.slane %v2820_v12, 4  ;;  %v2808_v50 = vrot.slane %v2807_v45, 4  ;;  %v2786_v27 = vrot.slane %v2785_v58, 1  ;;  %v8046_v33 = vld [vmem:[%s8635_s12 + $0x8] sm:$0xff] }
 0x93f   :  { %v6754_v34 = vld [vmem:[%s8629_s7 + $0x28] sm:$0xff] }
 0x940   :  { %v2798_v10 = vadd.f32 %v2797_v32, %v2796_v7  ;;  %v2822_v60 = vadd.f32 %v2821_v43, %v2820_v12  ;;  %v2809_v3 = vadd.f32 %v2808_v50, %v2807_v45  ;;  %v2787_v5 = vadd.f32 %v2786_v27, %v2785_v58  ;;  %v8053_v58 = vld [vmem:[%s8635_s12] sm:$0xff]  ;;  %v8061_v7 = vld [vmem:[%s8635_s12 + $0x38] sm:$0xff]  ;;  %v8070_v12 = vld [vmem:[%s8635_s12 + $0x30] sm:$0xff] }
 0x941   :  { %v8077_v45 = vld [vmem:[%s8635_s12 + $0x28] sm:$0xff]  ;;  %v8101_v32 = vld [vmem:[%s8635_s12 + $0x50] sm:$0xff]  ;;  %v8115_v50 = vld [vmem:[%s8635_s12 + $0x40] sm:$0xff] }
 0x942   :  { %v2799_v18 = vrot.slane %v2798_v10, 1  ;;  %v2823_v20 = vrot.slane %v2822_v60, 2  ;;  %v2810_v30 = vrot.slane %v2809_v3, 2  ;;  %v2894_v8 = vsel %vm757_vm8, %v2787_v5, %v2893_v36  ;;  %v8108_v43 = vld [vmem:[%s8635_s12 + $0x48] sm:$0xff]  ;;  %v6759_v36 = vld [vmem:[%s8629_s7 + $0x40] sm:$0xff] }
 0x943   :  { %v8139_v27 = vld [vmem:[%s8635_s12 + $0x68] sm:$0xff] }
 0x944   :  { %v2824_v53 = vadd.f32 %v2823_v20, %v2822_v60  ;;  %v2811_v59 = vadd.f32 %v2810_v30, %v2809_v3  ;;  %v2800_v22 = vadd.f32 %v2799_v18, %v2798_v10  ;;  %v8146_v10 = vld [vmem:[%s8635_s12 + $0x60] sm:$0xff]  ;;  %v6752_v20 = vld [vmem:[%s8629_s7 + $0x38] sm:$0xff]  ;;  %v6753_v30 = vld [vmem:[%s8629_s7 + $0x30] sm:$0xff] }
 0x945   :  { %v6751_v3 = vld [vmem:[%s8632_s6] ss:$0 sm:$0xff]  ;;  %v6758_v47 = vld [vmem:[%s8629_s7 + $0x48] sm:$0xff] }
 0x946   :  { %v2825_v42 = vrot.slane %v2824_v53, 1  ;;  %v2812_v24 = vrot.slane %v2811_v59, 1  ;;  %v2895_v2 = vsel %vm759_vm9, %v2800_v22, %v2894_v8 }
 0x948   :  { %v2813_v19 = vadd.f32 %v2812_v24, %v2811_v59  ;;  %v2826_v9 = vadd.f32 %v2825_v42, %v2824_v53  ;;  %v6755_v53 = vld [vmem:[%s8629_s7 + $0x20] sm:$0xff]  ;;  %v6756_v59 = vld [vmem:[%s8629_s7 + $0x58] sm:$0xff] }
 0x949   :  { %v8197_v24 = vld [vmem:[%s8636_s13 + $0x18] sm:$0xff] }
 0x94a   :  { %v2896_v39 = vsel %vm761_vm10, %v2813_v19, %v2895_v2  ;;  %v8207_v19 = vld [vmem:[%s8636_s13 + $0x10] sm:$0xff]  ;;  %v8225_v2 = vld [vmem:[%s8636_s13] sm:$0xff] }
 0x94b   :  { %v2897_v13 = vsel %vm763_vm11, %v2826_v9, %v2896_v39  ;;  %v8216_v9 = vld [vmem:[%s8636_s13 + $0x8] sm:$0xff] }
 0x94c   :  { %6231 = vmatpush3.msra.mxu1 %v2897_v13  ;;  %v8232_v13 = vld [vmem:[%s8636_s13 + $0x38] sm:$0xff] }
 0x94d   :  { %6233 = vmatmul.mubr.msk.f32.vlgmr.msra.gmra.mxu1 %vm769_vm12, %v7194_v37  ;;  %6246 = vmatprep.subr.mxu1 %v8726_v51  ;;  %v6741_v37 = vld [vmem:[%s8631_s8 + $0x8] sm:$0xff] }
 0x94e   :  { %6247 = vmatpush3.msra.mxu1 %v6739_v29  ;;  %6254 = vmatprep.mubr.msk.f32.mxu1 %vm6761_vm0, %v8726_v51  ;;  %v8240_v29 = vld [vmem:[%s8636_s13 + $0x30] sm:$0xff] }
 0x94f   :  { %6248 = vmatprep.subr.mxu1 %v8726_v51 }
 0x950   :  { %6249 = vmatpush3.msra.mxu1 %v6740_v28  ;;  %v8249_v28 = vld [vmem:[%s8636_s13 + $0x28] sm:$0xff] }
 0x951   :  { %6250 = vmatprep.subr.mxu1 %v8726_v51 }
 0x952   :  { %6251 = vmatpush3.msra.mxu1 %v6741_v37  ;;  %v8256_v37 = vld [vmem:[%s8636_s13 + $0x20] sm:$0xff] }
 0x953   :  { %6252 = vmatprep.subr.mxu1 %v8726_v51 }
 0x954   :  { %6253 = vmatpush3.msra.mxu1 %v6742_v48  ;;  %v8263_v48 = vld [vmem:[%s8636_s13 + $0x58] sm:$0xff] }
 0x955   :  { %6255 = vmatmul.mubr.msk.f32.vlgmr.msra.gmra.mxu1 %vm576_vm3, %v7785_v54  ;;  %6268 = vmatprep.subr.mxu1 %v8726_v51 }
 0x956   :  { %6269 = vmatpush3.msra.mxu1 %v6743_v49  ;;  %6276 = vmatprep.mubr.msk.f32.mxu1 %vm6761_vm0, %v8726_v51  ;;  %v8271_v49 = vld [vmem:[%s8636_s13 + $0x50] sm:$0xff] }
 0x957   :  { %6270 = vmatprep.subr.mxu1 %v8726_v51 }
 0x958   :  { %6271 = vmatpush3.msra.mxu1 %v6744_v40  ;;  %v8280_v40 = vld [vmem:[%s8636_s13 + $0x48] sm:$0xff] }
 0x959   :  { %6272 = vmatprep.subr.mxu1 %v8726_v51 }
 0x95a   :  { %6273 = vmatpush3.msra.mxu1 %v6745_v17  ;;  %v8287_v17 = vld [vmem:[%s8636_s13 + $0x40] sm:$0xff] }
 0x95b   :  { %6274 = vmatprep.subr.mxu1 %v8726_v51 }
 0x95c   :  { %6275 = vmatpush3.msra.mxu1 %v6746_v31  ;;  %v8294_v31 = vld [vmem:[%s8636_s13 + $0x78] sm:$0xff] }
 0x95d   :  { %6277 = vmatmul.mubr.msk.f32.vlgmr.msra.gmra.mxu1 %vm576_vm3, %v7785_v54  ;;  %6290 = vmatprep.subr.mxu1 %v8726_v51 }
 0x95e   :  { %6291 = vmatpush3.msra.mxu1 %v6747_v26  ;;  %6298 = vmatprep.mubr.msk.f32.mxu1 %vm6761_vm0, %v8726_v51  ;;  %v8302_v26 = vld [vmem:[%s8636_s13 + $0x70] sm:$0xff] }
 0x95f   :  { %6292 = vmatprep.subr.mxu1 %v8726_v51 }
 0x960   :  { %6293 = vmatpush3.msra.mxu1 %v6748_v41  ;;  %v8311_v41 = vld [vmem:[%s8636_s13 + $0x68] sm:$0xff] }
 0x961   :  { %6294 = vmatprep.subr.mxu1 %v8726_v51 }
 0x962   :  { %6295 = vmatpush3.msra.mxu1 %v6749_v61  ;;  %v8318_v61 = vld [vmem:[%s8636_s13 + $0x60] sm:$0xff] }
 0x963   :  { %6296 = vmatprep.subr.mxu1 %v8726_v51  ;;  %8830 = vst [vmem:[#allocation12_spill] sm:$0xff] %v8318_v61 }
 0x964   :  { %6297 = vmatpush3.msra.mxu1 %v6750_v21 }
 0x965   :  { %6299 = vmatmul.mubr.msk.f32.vlgmr.msra.gmra.mxu1 %vm576_vm3, %v7785_v54  ;;  %6312 = vmatprep.subr.mxu1 %v8726_v51 }
 0x966   :  { %6320 = vmatprep.mubr.msk.f32.mxu1 %vm6761_vm0, %v8726_v51  ;;  %6313 = vmatpush3.msra.mxu1 %v8032_v0 }
 0x967   :  { %6314 = vmatprep.subr.mxu1 %v8726_v51 }
 0x968   :  { %6315 = vmatpush3.msra.mxu1 %v8039_v11 }
 0x969   :  { %6316 = vmatprep.subr.mxu1 %v8726_v51 }
 0x96a   :  { %6317 = vmatpush3.msra.mxu1 %v8046_v33 }
 0x96b   :  { %6318 = vmatprep.subr.mxu1 %v8726_v51 }
 0x96c   :  { %6319 = vmatpush3.msra.mxu1 %v8053_v58 }
 0x96d   :  { %6334 = vmatprep.subr.mxu1 %v8726_v51  ;;  %6321 = vmatmul.mubr.f32.vlgmr.msra.gmra.mxu1 %v8726_v51 }
 0x96e   :  { %6335 = vmatpush3.msra.mxu1 %v8061_v7  ;;  %6342 = vmatprep.mubr.msk.f32.mxu1 %vm6761_vm0, %v8726_v51 }
 0x96f   :  { %6336 = vmatprep.subr.mxu1 %v8726_v51 }
 0x970   :  { %6337 = vmatpush3.msra.mxu1 %v8070_v12 }
 0x971   :  { %6338 = vmatprep.subr.mxu1 %v8726_v51 }
 0x972   :  { %6339 = vmatpush3.msra.mxu1 %v8077_v45 }
 0x973   :  { %6340 = vmatprep.subr.mxu1 %v8726_v51 }
 0x974   :  { %6341 = vmatpush3.msra.mxu1 %v8084_v57 }
 0x975   :  { %6343 = vmatmul.mubr.f32.vlgmr.msra.gmra.mxu1 %v8726_v51  ;;  %6356 = vmatprep.subr.mxu1 %v8726_v51 }
 0x976   :  { %6364 = vmatprep.mubr.msk.f32.mxu1 %vm6761_vm0, %v8726_v51  ;;  %6357 = vmatpush3.msra.mxu1 %v8094_v38 }
 0x977   :  { %6358 = vmatprep.subr.mxu1 %v8726_v51 }
 0x978   :  { %6359 = vmatpush3.msra.mxu1 %v8101_v32 }
 0x979   :  { %6360 = vmatprep.subr.mxu1 %v8726_v51 }
 0x97a   :  { %6361 = vmatpush3.msra.mxu1 %v8108_v43 }
 0x97b   :  { %6362 = vmatprep.subr.mxu1 %v8726_v51 }
 0x97c   :  { %6363 = vmatpush3.msra.mxu1 %v8115_v50 }
 0x97d   :  { %6378 = vmatprep.subr.mxu1 %v8726_v51  ;;  %6365 = vmatmul.mubr.f32.vlgmr.msra.gmra.mxu1 %v8726_v51 }
 0x97e   :  { %6379 = vmatpush3.msra.mxu1 %v8123_v63  ;;  %6386 = vmatprep.mubr.msk.f32.mxu1 %vm6761_vm0, %v8726_v51 }
 0x97f   :  { %6380 = vmatprep.subr.mxu1 %v8726_v51 }
 0x980   :  { %6381 = vmatpush3.msra.mxu1 %v8132_v23 }
 0x981   :  { %6382 = vmatprep.subr.mxu1 %v8726_v51 }
 0x982   :  { %6383 = vmatpush3.msra.mxu1 %v8139_v27 }
 0x983   :  { %6384 = vmatprep.subr.mxu1 %v8726_v51 }
 0x984   :  { %6385 = vmatpush3.msra.mxu1 %v8146_v10 }
 0x985   :  { %6387 = vmatmul.mubr.f32.vlgmr.msra.gmra.mxu1 %v8726_v51  ;;  %6394 = vmatprep.subr.mxu1 %v8726_v51 }
 0x986   :  { %6396 = vmatprep.mubr.msk.f32.mxu1 %vm6761_vm0, %v8726_v51 }
 0xa0d   :  { %v2970_v60 = vpop.f32.mrf.mxu1 }
 0xa0e   :  { %v2971_v4 = vadd.f32 %v6751_v3, %v2970_v60 }
 0xa0f   :  { %v6234_v35 = vpop.f32.mrf.mxu1 }
 0xa10   :  { %v2974_v18 = vmax.f32 %v2971_v4, 0.0 }
 0xa12   :  { %6244 = vmatmul.mubr.msk.f32.vlgmr.msra.gmra.mxu0 %vm576_vm3, %v2974_v18 }
 0xa13   :  { %6258 = vmatpush3.msra.mxu0 %v6752_v20  ;;  %6265 = vmatprep.mubr.msk.f32.mxu0 %vm6761_vm0, %v8726_v51 }
 0xa14   :  { %6259 = vmatprep.subr.mxu0 %v8726_v51 }
 0xa15   :  { %6260 = vmatpush3.msra.mxu0 %v6753_v30  ;;  %v8166_v55 = vpop.f32.mrf.mxu1 }
 0xa16   :  { %6261 = vmatprep.subr.mxu0 %v8726_v51 }
 0xa17   :  { %6262 = vmatpush3.msra.mxu0 %v6754_v34  ;;  %v6256_v5 = vpop.f32.mrf.mxu1 }
 0xa18   :  { %6263 = vmatprep.subr.mxu0 %v8726_v51 }
 0xa19   :  { %6264 = vmatpush3.msra.mxu0 %v6755_v53 }
 0xa1a   :  { %6266 = vmatmul.mubr.msk.f32.vlgmr.msra.gmra.mxu0 %vm576_vm3, %v2974_v18  ;;  %6279 = vmatprep.subr.mxu0 %v8726_v51 }
 0xa1b   :  { %6280 = vmatpush3.msra.mxu0 %v6756_v59  ;;  %6287 = vmatprep.mubr.msk.f32.mxu0 %vm6761_vm0, %v8726_v51 }
 0xa1c   :  { %6281 = vmatprep.subr.mxu0 %v8726_v51 }
 0xa1d   :  { %6282 = vmatpush3.msra.mxu0 %v6757_v15  ;;  %v8187_v22 = vpop.f32.mrf.mxu1 }
 0xa1e   :  { %6283 = vmatprep.subr.mxu0 %v8726_v51 }
 0xa1f   :  { %6284 = vmatpush3.msra.mxu0 %v6758_v47  ;;  %v6278_v42 = vpop.f32.mrf.mxu1 }
 0xa20   :  { %6285 = vmatprep.subr.mxu0 %v8726_v51 }
 0xa21   :  { %6286 = vmatpush3.msra.mxu0 %v6759_v36 }
 0xa22   :  { %6288 = vmatmul.mubr.msk.f32.vlgmr.msra.gmra.mxu0 %vm576_vm3, %v2974_v18  ;;  %6301 = vmatprep.subr.mxu0 %v8726_v51 }
 0xa23   :  { %6302 = vmatpush3.msra.mxu0 %v8197_v24  ;;  %6309 = vmatprep.mubr.msk.f32.mxu0 %vm6761_vm0, %v8726_v51 }
 0xa24   :  { %6303 = vmatprep.subr.mxu0 %v8726_v51 }
 0xa25   :  { %6304 = vmatpush3.msra.mxu0 %v8207_v19  ;;  %v8219_v8 = vpop.f32.mrf.mxu1 }
 0xa26   :  { %6305 = vmatprep.subr.mxu0 %v8726_v51 }
 0xa27   :  { %6306 = vmatpush3.msra.mxu0 %v8216_v9  ;;  %v6300_v39 = vpop.f32.mrf.mxu1 }
 0xa28   :  { %6307 = vmatprep.subr.mxu0 %v8726_v51 }
 0xa29   :  { %6308 = vmatpush3.msra.mxu0 %v8225_v2 }
 0xa2a   :  { %6323 = vmatprep.subr.mxu0 %v8726_v51  ;;  %6310 = vmatmul.mubr.f32.vlgmr.msra.gmra.mxu0 %v8726_v51 }
 0xa2b   :  { %6324 = vmatpush3.msra.mxu0 %v8232_v13  ;;  %6331 = vmatprep.mubr.msk.f32.mxu0 %vm6761_vm0, %v8726_v51 }
 0xa2c   :  { %6325 = vmatprep.subr.mxu0 %v8726_v51 }
 0xa2d   :  { %6326 = vmatpush3.msra.mxu0 %v8240_v29  ;;  %v3599_v21 = vpop.f32.mrf.mxu1 }
 0xa2e   :  { %6327 = vmatprep.subr.mxu0 %v8726_v51 }
 0xa2f   :  { %6328 = vmatpush3.msra.mxu0 %v8249_v28  ;;  %v6322_v60 = vpop.f32.mrf.mxu1 }
 0xa30   :  { %6329 = vmatprep.subr.mxu0 %v8726_v51 }
 0xa31   :  { %6330 = vmatpush3.msra.mxu0 %v8256_v37 }
 0xa32   :  { %6332 = vmatmul.mubr.f32.vlgmr.msra.gmra.mxu0 %v8726_v51  ;;  %6345 = vmatprep.subr.mxu0 %v8726_v51 }
 0xa33   :  { %6346 = vmatpush3.msra.mxu0 %v8263_v48  ;;  %6353 = vmatprep.mubr.msk.f32.mxu0 %vm6761_vm0, %v8726_v51 }
 0xa34   :  { %6347 = vmatprep.subr.mxu0 %v8726_v51 }
 0xa35   :  { %6348 = vmatpush3.msra.mxu0 %v8271_v49  ;;  %v3750_v3 = vpop.f32.mrf.mxu1 }
 0xa36   :  { %6349 = vmatprep.subr.mxu0 %v8726_v51 }
 0xa37   :  { %6350 = vmatpush3.msra.mxu0 %v8280_v40  ;;  %v6344_v4 = vpop.f32.mrf.mxu1 }
 0xa38   :  { %6351 = vmatprep.subr.mxu0 %v8726_v51 }
 0xa39   :  { %6352 = vmatpush3.msra.mxu0 %v8287_v17 }
 0xa3a   :  { %6367 = vmatprep.subr.mxu0 %v8726_v51  ;;  %6354 = vmatmul.mubr.f32.vlgmr.msra.gmra.mxu0 %v8726_v51 }
 0xa3b   :  { %6368 = vmatpush3.msra.mxu0 %v8294_v31  ;;  %6375 = vmatprep.mubr.msk.f32.mxu0 %vm6761_vm0, %v8726_v51 }
 0xa3c   :  { %6369 = vmatprep.subr.mxu0 %v8726_v51 }
 0xa3d   :  { %6370 = vmatpush3.msra.mxu0 %v8302_v26  ;;  %v3901_v35 = vpop.f32.mrf.mxu1 }
 0xa3e   :  { %6371 = vmatprep.subr.mxu0 %v8726_v51 }
 0xa3f   :  { %6372 = vmatpush3.msra.mxu0 %v8311_v41  ;;  %v6366_v18 = vpop.f32.mrf.mxu1 }
 0xa40   :  { %6373 = vmatprep.subr.mxu0 %v8726_v51 }
 0xa41   :  { %6374 = vmatpush3.msra.mxu0 %v8318_v61 }
 0xa42   :  { %6376 = vmatmul.mubr.f32.vlgmr.msra.gmra.mxu0 %v8726_v51  ;;  %6389 = vmatprep.subr.mxu0 %v8726_v51 }
 0xa43   :  { %6391 = vmatprep.mubr.msk.f32.mxu0 %vm6761_vm0, %v8726_v51 }
 0xa45   :  { %v4047_v20 = vpop.f32.mrf.mxu1 }
 0xa47   :  { %v6388_v30 = vpop.f32.mrf.mxu1 }
 0xad2   :  { %v3044_v34 = vpop.f32.mrf.mxu0 }
 0xad3   :  { %v3045_v5 = vadd.f32 %v3044_v34, %v8785_v16  ;;  %v3459_v16 = vld [vmem:[%s8637_s14] sm:$0xf] }
 0xad4   :  { %v6245_v53 = vpop.f32.mrf.mxu0  ;;  %v8337_v34 = vrot.slane %v3459_v16, %v8792_v25  ;;  %v3414_v25 = vadd.f32 %v8219_v8, %v8789_v46 }
 0xad5   :  { %v3121_v59 = vadd.f32 %v8166_v55, %v3045_v5 }
 0xad7   :  { %v3122_v15 = vadd.f32 %v3121_v59, %v8786_v52 }
 0xad9   :  { %v5777_v47 = vmul.f32 -1.442695, %v3122_v15  ;;  %v8341_v15 = vrot.slane %v3459_v16, %v8793_v44 }
 0xada   :  { %v3195_v42 = vpop.f32.mrf.mxu0 }
 0xadb   :  { %6617 = vpow2.f32 %v5777_v47  ;;  %v3196_v36 = vadd.f32 %v3195_v42, %v8787_v56 }
 0xadc   :  { %v6267_v39 = vpop.f32.mrf.mxu0 }
 0xadd   :  { %v3269_v60 = vadd.f32 %v8187_v22, %v3196_v36 }
 0xadf   :  { %v3270_v4 = vadd.f32 %v3269_v60, %v8788_v14 }
 0xae1   :  { %v5780_v18 = vmul.f32 -1.442695, %v3270_v4 }
 0xae2   :  { %v3343_v30 = vpop.f32.mrf.mxu0 }
 0xae3   :  { %6619 = vpow2.f32 %v5780_v18  ;;  %v3344_v4 = vadd.f32 %v3343_v30, %v8790_v6 }
 0xae4   :  { %v6289_v61 = vpop.f32.mrf.mxu0 }
 0xae8   :  { %v6618_v55 = vpop.eup %6617 }
 0xae9   :  { %v3126_v52 = vadd.f32 1.0, %v6618_v55 }
 0xaea   :  { %v3529_v5 = vpop.f32.mrf.mxu0 }
 0xaeb   :  { %6621 = vrcp.f32 %v3126_v52  ;;  %v3600_v56 = vadd.f32 %v3599_v21, %v3529_v5 }
 0xaec   :  { %v6311_v53 = vpop.f32.mrf.mxu0 }
 0xaed   :  { %v3607_v22 = vadd.f32 %v8337_v34, %v3600_v56  ;;  %v8351_v53 = vrot.slane %v3459_v16, %v8795_v1 }
 0xaef   :  { %v5783_v14 = vmul.f32 -1.442695, %v3607_v22 }
 0xaf0   :  { %v6620_v59 = vpop.eup %6619 }
 0xaf1   :  { %6623 = vpow2.f32 %v5783_v14  ;;  %v3274_v42 = vadd.f32 1.0, %v6620_v59 }
 0xaf2   :  { %v3680_v61 = vpop.f32.mrf.mxu0 }
 0xaf3   :  { %v3751_v47 = vadd.f32 %v3750_v3, %v3680_v61  ;;  %6625 = vrcp.f32 %v3274_v42  ;;  %v8348_v3 = vrot.slane %v3459_v16, %v8794_v62 }
 0xaf4   :  { %v6333_v36 = vpop.f32.mrf.mxu0 }
 0xaf5   :  { %v3758_v39 = vadd.f32 %v8341_v15, %v3751_v47 }
 0xaf7   :  { %v5784_v60 = vmul.f32 -1.442695, %v3758_v39 }
 0xaf8   :  { %v6622_v21 = vpop.eup %6621 }
 0xaf9   :  { %v3417_v18 = vmul.f32 %v6622_v21, %v3414_v25  ;;  %6627 = vpow2.f32 %v5784_v60 }
 0xafa   :  { %v3831_v55 = vpop.f32.mrf.mxu0 }
 0xafb   :  { %v3418_v44 = vadd.f32 %v3417_v18, %v3344_v4  ;;  %v3902_v5 = vadd.f32 %v3901_v35, %v3831_v55 }
 0xafc   :  { %v6355_v52 = vpop.f32.mrf.mxu0 }
 0xafd   :  { %6629 = vtanh.f32 %v3418_v44  ;;  %v3909_v46 = vadd.f32 %v8348_v3, %v3902_v5  ;;  %v3424_v5 = vld [vmem:[%s8638_s11] sm:$0x1] }
 0xafe   :  { %v6624_v56 = vpop.eup %6623 }
 0xaff   :  { %v3611_v22 = vadd.f32 1.0, %v6624_v56  ;;  %6631 = vtanh.f32 %v3909_v46  ;;  %v3425_v56 = vunpack.c.l.bf16 %v3424_v5 }
 0xb00   :  { %v6626_v30 = vpop.eup %6625 }
 0xb01   :  { %6633 = vrcp.f32 %v3611_v22  ;;  %v3420_v62 = vsub.f32 1.0, %v6626_v30  ;;  %v3422_v16 = vmul.f32 %v6626_v30, %v7785_v54  ;;  %vm8383_vm13 = vcmp.gt.f32.partialorder %v3425_v56, 0.0 }
 0xb02   :  { %v3977_v8 = vpop.f32.mrf.mxu0 }
 0xb03   :  { %v4048_v14 = vadd.f32 %v4047_v20, %v3977_v8 }
 0xb04   :  { %v6377_v6 = vpop.f32.mrf.mxu0 }
 0xb05   :  { %v4055_v59 = vadd.f32 %v8351_v53, %v4048_v14 }
 0xb06   :  { %v6628_v61 = vpop.eup %6627 }
 0xb07   :  { %v3762_v35 = vadd.f32 1.0, %v6628_v61  ;;  %v5785_v47 = vmul.f32 -1.442695, %v4055_v59 }
 0xb09   :  { %6635 = vrcp.f32 %v3762_v35 }
 0xb0a   :  { %v6630_v42 = vpop.eup %6629  ;;  %6637 = vpow2.f32 %v5785_v47 }
 0xb0b   :  { %v3421_v1 = vmul.f32 %v6630_v42, %v3420_v62 }
 0xb0c   :  { %v6632_v20 = vpop.eup %6631 }
 0xb0d   :  { %v8356_v36 = vadd.f32 %v3422_v16, %v3421_v1 }
 0xb0e   :  { %v6634_v39 = vpop.eup %6633 }
 0xb0f   :  { %6390 = vmatpush3.xpose.msk.msra.mxu0 %vm576_vm3, %v8356_v36  ;;  %6395 = vmatpush3.msra.mxu1 %v8356_v36  ;;  %v4063_v4 = vmul.f32 %v6634_v39, %v6632_v20 }
 0xb10   :  { %6410 = vmatprep.subr.mxu1 %v8726_v51  ;;  %6399 = vmatprep.subr.mxu0 %v8726_v51 }
 0xb16   :  { %v6636_v25 = vpop.eup %6635 }
 0xb17   :  { %v6638_v60 = vpop.eup %6637  ;;  %v4062_v21 = vmul.f32 0.0, %v6636_v25 }
 0xb18   :  { %v4059_v18 = vadd.f32 1.0, %v6638_v60 }
 0xb19   :  { %v8363_v55 = vadd.f32 %v4063_v4, %v4062_v21 }
 0xb1a   :  { %6639 = vrcp.f32 %v4059_v18 }
 0xb1b   :  { %6641 = vtanh.f32 %v8363_v55 }
 0xb27   :  { %v6640_v54 = vpop.eup %6639 }
 0xb28   :  { %v6642_v44 = vpop.eup %6641 }
 0xb29   :  { %v8366_v52 = vmul.f32 %v6642_v44, %v6640_v54  ;;  %v8833_v44 = vld [vmem:[#allocation12_spill] sm:$0xff] }
 0xb2b   :  { %6392 = vmatmul.mubr.msk.f32.vlgmr.msra.gmra.mxu0 %vm576_vm3, %v8366_v52 }
 0xb2c   :  { %6400 = vmatpush3.msra.mxu0 %v8197_v24  ;;  %6407 = vmatprep.mubr.msk.f32.mxu0 %vm6761_vm0, %v8726_v51 }
 0xb2d   :  { %6401 = vmatprep.subr.mxu0 %v8726_v51 }
 0xb2e   :  { %6402 = vmatpush3.msra.mxu0 %v8207_v19 }
 0xb2f   :  { %6403 = vmatprep.subr.mxu0 %v8726_v51 }
 0xb30   :  { %6404 = vmatpush3.msra.mxu0 %v8216_v9 }
 0xb31   :  { %6405 = vmatprep.subr.mxu0 %v8726_v51 }
 0xb32   :  { %6406 = vmatpush3.msra.mxu0 %v8225_v2 }
 0xb33   :  { %6421 = vmatprep.subr.mxu0 %v8726_v51 }
 0xbeb   :  { %v4139_v8 = vpop.f32.mrf.mxu0 }
 0xbec   :  { %v4143_v22 = vsel %vm8383_vm13, %v4139_v8, -1e+30 }
 0xbed   :  { %v4145_v14 = vsel %vm4144_vm14, %v4143_v22, -inf  ;;  %v6393_v6 = vpop.f32.mrf.mxu0 }
 0xbee   :  { %4146 = vmax.xlane.f32.xlu0 %v4145_v14 }
 0xc77   :  { %v4147_v30 = vpop.xlane.xlu0 %4146 }
 0xc78   :  { %v4148_v59 = vsub.f32 %v4143_v22, %v4147_v30 }
 0xc7a   :  { %v4149_v61 = vmul.f32 1.442695, %v4148_v59 }
 0xc7c   :  { %6643 = vpow2.f32 %v4149_v61 }
 0xc89   :  { %v6644_v35 = vpop.eup %6643 }
 0xc8a   :  { %v4151_v47 = vsel %vm8383_vm13, %v6644_v35, 0.0 }
 0xc8b   :  { %v4152_v62 = vsel %vm4144_vm14, %v4151_v47, 0.0 }
 0xc8c   :  { %4153 = vadd.xlane.f32.xlu1 %v4152_v62 }
 0xd15   :  { %v4154_v42 = vpop.xlane.xlu1 %4153 }
 0xd16   :  { %v4155_v1 = vmax.f32 %v4154_v42, 1e-30 }
 0xd18   :  { %6645 = vrcp.f32 %v4155_v1 }
 0xd25   :  { %v6646_v16 = vpop.eup %6645 }
 0xd26   :  { %v4157_v20 = vmul.f32 %v6646_v16, %v4151_v47 }
 0xd28   :  { %6397 = vmatmul.mubr.msk.f32.vlgmr.msra.gmra.mxu1 %vm218_vm2, %v4157_v20 }
 0xd29   :  { %6411 = vmatpush3.msra.mxu1 %v8032_v0  ;;  %6418 = vmatprep.mubr.msk.f32.mxu1 %vm6761_vm0, %v8726_v51 }
 0xd2a   :  { %6412 = vmatprep.subr.mxu1 %v8726_v51 }
 0xd2b   :  { %6413 = vmatpush3.msra.mxu1 %v8039_v11 }
 0xd2c   :  { %6414 = vmatprep.subr.mxu1 %v8726_v51 }
 0xd2d   :  { %6415 = vmatpush3.msra.mxu1 %v8046_v33 }
 0xd2e   :  { %6416 = vmatprep.subr.mxu1 %v8726_v51 }
 0xd2f   :  { %6417 = vmatpush3.msra.mxu1 %v8053_v58 }
 0xd30   :  { %6419 = vmatmul.mubr.msk.f32.vlgmr.msra.gmra.mxu1 %vm576_vm3, %v8366_v52  ;;  %6432 = vmatprep.subr.mxu1 %v8726_v51 }
 0xd31   :  { %6433 = vmatpush3.msra.mxu1 %v8061_v7  ;;  %6440 = vmatprep.mubr.msk.f32.mxu1 %vm6761_vm0, %v8726_v51 }
 0xd32   :  { %6434 = vmatprep.subr.mxu1 %v8726_v51 }
 0xd33   :  { %6435 = vmatpush3.msra.mxu1 %v8070_v12 }
 0xd34   :  { %6436 = vmatprep.subr.mxu1 %v8726_v51 }
 0xd35   :  { %6437 = vmatpush3.msra.mxu1 %v8077_v45 }
 0xd36   :  { %6438 = vmatprep.subr.mxu1 %v8726_v51 }
 0xd37   :  { %6439 = vmatpush3.msra.mxu1 %v8084_v57 }
 0xd38   :  { %6441 = vmatmul.mubr.msk.f32.vlgmr.msra.gmra.mxu1 %vm576_vm3, %v8366_v52  ;;  %6454 = vmatprep.subr.mxu1 %v8726_v51 }
 0xd39   :  { %6455 = vmatpush3.msra.mxu1 %v8094_v38  ;;  %6462 = vmatprep.mubr.msk.f32.mxu1 %vm6761_vm0, %v8726_v51 }
 0xd3a   :  { %6456 = vmatprep.subr.mxu1 %v8726_v51 }
 0xd3b   :  { %6457 = vmatpush3.msra.mxu1 %v8101_v32 }
 0xd3c   :  { %6458 = vmatprep.subr.mxu1 %v8726_v51 }
 0xd3d   :  { %6459 = vmatpush3.msra.mxu1 %v8108_v43 }
 0xd3e   :  { %6460 = vmatprep.subr.mxu1 %v8726_v51 }
 0xd3f   :  { %6461 = vmatpush3.msra.mxu1 %v8115_v50 }
 0xd40   :  { %6463 = vmatmul.mubr.msk.f32.vlgmr.msra.gmra.mxu1 %vm576_vm3, %v8366_v52  ;;  %6476 = vmatprep.subr.mxu1 %v8726_v51 }
 0xd41   :  { %6477 = vmatpush3.msra.mxu1 %v8123_v63  ;;  %6484 = vmatprep.mubr.msk.f32.mxu1 %vm6761_vm0, %v8726_v51 }
 0xd42   :  { %6478 = vmatprep.subr.mxu1 %v8726_v51 }
 0xd43   :  { %6479 = vmatpush3.msra.mxu1 %v8132_v23 }
 0xd44   :  { %6480 = vmatprep.subr.mxu1 %v8726_v51 }
 0xd45   :  { %6481 = vmatpush3.msra.mxu1 %v8139_v27 }
 0xd46   :  { %6482 = vmatprep.subr.mxu1 %v8726_v51 }
 0xd47   :  { %6483 = vmatpush3.msra.mxu1 %v8146_v10 }
 0xd48   :  { %6485 = vmatmul.mubr.msk.f32.vlgmr.msra.gmra.mxu1 %vm576_vm3, %v8366_v52  ;;  %6492 = vmatprep.subr.mxu1 %v8726_v51 }
 0xd49   :  { %6493 = vmatpush3.msra.mxu1 %v8356_v36  ;;  %6494 = vmatprep.mubr.msk.f32.mxu1 %vm6761_vm0, %v8726_v51 }
 0xd4a   :  { %6508 = vmatprep.subr.mxu1 %v8726_v51 }
 0xde8   :  { %v4227_v39 = vpop.f32.mrf.mxu1 }
 0xde9   :  { %6408 = vmatmul.mubr.msk.f32.vlgmr.msra.gmra.mxu0 %vm576_vm3, %v4227_v39 }
 0xdea   :  { %6422 = vmatpush3.msra.mxu0 %v8232_v13  ;;  %v6398_v25 = vpop.f32.mrf.mxu1  ;;  %6429 = vmatprep.mubr.msk.f32.mxu0 %vm6761_vm0, %v8726_v51 }
 0xdeb   :  { %6423 = vmatprep.subr.mxu0 %v8726_v51 }
 0xdec   :  { %6424 = vmatpush3.msra.mxu0 %v8240_v29 }
 0xded   :  { %6425 = vmatprep.subr.mxu0 %v8726_v51 }
 0xdee   :  { %6426 = vmatpush3.msra.mxu0 %v8249_v28 }
 0xdef   :  { %6427 = vmatprep.subr.mxu0 %v8726_v51 }
 0xdf0   :  { %v4370_v60 = vpop.f32.mrf.mxu1  ;;  %6428 = vmatpush3.msra.mxu0 %v8256_v37 }
 0xdf1   :  { %6430 = vmatmul.mubr.msk.f32.vlgmr.msra.gmra.mxu0 %vm576_vm3, %v4227_v39  ;;  %6443 = vmatprep.subr.mxu0 %v8726_v51 }
 0xdf2   :  { %v6420_v21 = vpop.f32.mrf.mxu1  ;;  %6444 = vmatpush3.msra.mxu0 %v8263_v48  ;;  %6451 = vmatprep.mubr.msk.f32.mxu0 %vm6761_vm0, %v8726_v51 }
 0xdf3   :  { %6445 = vmatprep.subr.mxu0 %v8726_v51 }
 0xdf4   :  { %6446 = vmatpush3.msra.mxu0 %v8271_v49 }
 0xdf5   :  { %6447 = vmatprep.subr.mxu0 %v8726_v51 }
 0xdf6   :  { %6448 = vmatpush3.msra.mxu0 %v8280_v40 }
 0xdf7   :  { %6449 = vmatprep.subr.mxu0 %v8726_v51 }
 0xdf8   :  { %v4517_v4 = vpop.f32.mrf.mxu1  ;;  %6450 = vmatpush3.msra.mxu0 %v8287_v17 }
 0xdf9   :  { %6452 = vmatmul.mubr.msk.f32.vlgmr.msra.gmra.mxu0 %vm576_vm3, %v4227_v39  ;;  %6465 = vmatprep.subr.mxu0 %v8726_v51 }
 0xdfa   :  { %v6442_v18 = vpop.f32.mrf.mxu1  ;;  %6466 = vmatpush3.msra.mxu0 %v8294_v31  ;;  %6473 = vmatprep.mubr.msk.f32.mxu0 %vm6761_vm0, %v8726_v51 }
 0xdfb   :  { %6467 = vmatprep.subr.mxu0 %v8726_v51 }
 0xdfc   :  { %6468 = vmatpush3.msra.mxu0 %v8302_v26 }
 0xdfd   :  { %6469 = vmatprep.subr.mxu0 %v8726_v51 }
 0xdfe   :  { %6470 = vmatpush3.msra.mxu0 %v8311_v41 }
 0xdff   :  { %6471 = vmatprep.subr.mxu0 %v8726_v51 }
 0xe00   :  { %v4664_v54 = vpop.f32.mrf.mxu1  ;;  %6472 = vmatpush3.msra.mxu0 %v8833_v44 }
 0xe01   :  { %6474 = vmatmul.mubr.msk.f32.vlgmr.msra.gmra.mxu0 %vm576_vm3, %v4227_v39  ;;  %6487 = vmatprep.subr.mxu0 %v8726_v51 }
 0xe02   :  { %v6464_v52 = vpop.f32.mrf.mxu1  ;;  %6488 = vmatpush3.xpose.msk.msra.mxu0 %vm576_vm3, %v8356_v36  ;;  %6489 = vmatprep.mubr.msk.f32.mxu0 %vm6761_vm0, %v8726_v51 }
 0xe03   :  { %6497 = vmatprep.subr.mxu0 %v8726_v51 }
 0xe08   :  { %v4806_v5 = vpop.f32.mrf.mxu1 }
 0xe0a   :  { %v6486_v56 = vpop.f32.mrf.mxu1 }
 0xea9   :  { %v4300_v8 = vpop.f32.mrf.mxu0 }
 0xeaa   :  { %v4371_v22 = vadd.f32 %v4370_v60, %v4300_v8 }
 0xeab   :  { %v6409_v14 = vpop.f32.mrf.mxu0 }
 0xeac   :  { %v4374_v6 = vadd.f32 %v4371_v22, %v8337_v34 }
 0xeae   :  { %v5791_v30 = vmul.f32 -1.442695, %v4374_v6 }
 0xeb0   :  { %6647 = vpow2.f32 %v5791_v30 }
 0xeb1   :  { %v4447_v59 = vpop.f32.mrf.mxu0 }
 0xeb2   :  { %v4518_v61 = vadd.f32 %v4517_v4, %v4447_v59 }
 0xeb3   :  { %v6431_v35 = vpop.f32.mrf.mxu0 }
 0xeb4   :  { %v4521_v47 = vadd.f32 %v4518_v61, %v8341_v15 }
 0xeb6   :  { %v5794_v62 = vmul.f32 -1.442695, %v4521_v47 }
 0xeb8   :  { %6649 = vpow2.f32 %v5794_v62 }
 0xeb9   :  { %v4594_v42 = vpop.f32.mrf.mxu0 }
 0xeba   :  { %v4665_v20 = vadd.f32 %v4664_v54, %v4594_v42 }
 0xebb   :  { %v6453_v1 = vpop.f32.mrf.mxu0 }
 0xebc   :  { %v4668_v60 = vadd.f32 %v4665_v20, %v8348_v3 }
 0xebd   :  { %v6648_v16 = vpop.eup %6647 }
 0xebe   :  { %v4378_v25 = vadd.f32 1.0, %v6648_v16 }
 0xec0   :  { %6651 = vrcp.f32 %v4378_v25 }
 0xec1   :  { %v4736_v39 = vpop.f32.mrf.mxu0  ;;  %6653 = vtanh.f32 %v4668_v60 }
 0xec2   :  { %v4807_v21 = vadd.f32 %v4806_v5, %v4736_v39 }
 0xec3   :  { %v6475_v18 = vpop.f32.mrf.mxu0 }
 0xec4   :  { %v4810_v52 = vadd.f32 %v4807_v21, %v8351_v53 }
 0xec5   :  { %v6650_v56 = vpop.eup %6649 }
 0xec6   :  { %v4525_v4 = vadd.f32 1.0, %v6650_v56  ;;  %v5799_v8 = vmul.f32 -1.442695, %v4810_v52 }
 0xec8   :  { %6655 = vrcp.f32 %v4525_v4 }
 0xec9   :  { %6657 = vpow2.f32 %v5799_v8 }
 0xecd   :  { %v6652_v22 = vpop.eup %6651 }
 0xece   :  { %v6654_v14 = vpop.eup %6653 }
 0xecf   :  { %v4818_v59 = vmul.f32 %v6654_v14, %v6652_v22 }
 0xed5   :  { %v6656_v6 = vpop.eup %6655 }
 0xed6   :  { %v6658_v30 = vpop.eup %6657  ;;  %v4817_v54 = vmul.f32 %v6656_v6, %v8363_v55 }
 0xed7   :  { %v4814_v5 = vadd.f32 1.0, %v6658_v30 }
 0xed8   :  { %v8490_v61 = vadd.f32 %v4818_v59, %v4817_v54 }
 0xed9   :  { %6659 = vrcp.f32 %v4814_v5 }
 0xeda   :  { %6661 = vtanh.f32 %v8490_v61 }
 0xee6   :  { %v6660_v35 = vpop.eup %6659 }
 0xee7   :  { %v6662_v47 = vpop.eup %6661 }
 0xee8   :  { %v8493_v62 = vmul.f32 %v6662_v47, %v6660_v35 }
 0xeea   :  { %6490 = vmatmul.mubr.msk.f32.vlgmr.msra.gmra.mxu0 %vm576_vm3, %v8493_v62 }
 0xeeb   :  { %6498 = vmatpush3.msra.mxu0 %v8197_v24  ;;  %6505 = vmatprep.mubr.msk.f32.mxu0 %vm6761_vm0, %v8726_v51 }
 0xeec   :  { %6499 = vmatprep.subr.mxu0 %v8726_v51 }
 0xeed   :  { %6500 = vmatpush3.msra.mxu0 %v8207_v19 }
 0xeee   :  { %6501 = vmatprep.subr.mxu0 %v8726_v51 }
 0xeef   :  { %6502 = vmatpush3.msra.mxu0 %v8216_v9 }
 0xef0   :  { %6503 = vmatprep.subr.mxu0 %v8726_v51 }
 0xef1   :  { %6504 = vmatpush3.msra.mxu0 %v8225_v2 }
 0xef2   :  { %6519 = vmatprep.subr.mxu0 %v8726_v51 }
 0xfaa   :  { %v4891_v55 = vpop.f32.mrf.mxu0 }
 0xfab   :  { %v4895_v24 = vsel %vm8383_vm13, %v4891_v55, -1e+30 }
 0xfac   :  { %v4896_v42 = vsel %vm4144_vm14, %v4895_v24, -inf  ;;  %v6491_v1 = vpop.f32.mrf.mxu0 }
 0xfad   :  { %4897 = vmax.xlane.f32.xlu0 %v4896_v42 }
0x1036   :  { %v4898_v16 = vpop.xlane.xlu0 %4897 }
0x1037   :  { %v4899_v19 = vsub.f32 %v4895_v24, %v4898_v16 }
0x1039   :  { %v4900_v20 = vmul.f32 1.442695, %v4899_v19 }
0x103b   :  { %6663 = vpow2.f32 %v4900_v20 }
0x1048   :  { %v6664_v39 = vpop.eup %6663 }
0x1049   :  { %v4902_v9 = vsel %vm8383_vm13, %v6664_v39, 0.0 }
0x104a   :  { %v4903_v2 = vsel %vm4144_vm14, %v4902_v9, 0.0 }
0x104b   :  { %4904 = vadd.xlane.f32.xlu0 %v4903_v2 }
0x10d4   :  { %v4905_v25 = vpop.xlane.xlu0 %4904 }
0x10d5   :  { %v4906_v21 = vmax.f32 %v4905_v25, 1e-30 }
0x10d7   :  { %6665 = vrcp.f32 %v4906_v21 }
0x10e4   :  { %v6666_v60 = vpop.eup %6665 }
0x10e5   :  { %v4908_v18 = vmul.f32 %v6666_v60, %v4902_v9 }
0x10e7   :  { %6495 = vmatmul.mubr.msk.f32.vlgmr.msra.gmra.mxu1 %vm218_vm2, %v4908_v18 }
0x10e8   :  { %6509 = vmatpush3.msra.mxu1 %v8032_v0  ;;  %6516 = vmatprep.mubr.msk.f32.mxu1 %vm6761_vm0, %v8726_v51 }
0x10e9   :  { %6510 = vmatprep.subr.mxu1 %v8726_v51 }
0x10ea   :  { %6511 = vmatpush3.msra.mxu1 %v8039_v11 }
0x10eb   :  { %6512 = vmatprep.subr.mxu1 %v8726_v51 }
0x10ec   :  { %6513 = vmatpush3.msra.mxu1 %v8046_v33 }
0x10ed   :  { %6514 = vmatprep.subr.mxu1 %v8726_v51 }
0x10ee   :  { %6515 = vmatpush3.msra.mxu1 %v8053_v58 }
0x10ef   :  { %6517 = vmatmul.mubr.msk.f32.vlgmr.msra.gmra.mxu1 %vm576_vm3, %v8493_v62  ;;  %6530 = vmatprep.subr.mxu1 %v8726_v51 }
0x10f0   :  { %6531 = vmatpush3.msra.mxu1 %v8061_v7  ;;  %6538 = vmatprep.mubr.msk.f32.mxu1 %vm6761_vm0, %v8726_v51 }
0x10f1   :  { %6532 = vmatprep.subr.mxu1 %v8726_v51 }
0x10f2   :  { %6533 = vmatpush3.msra.mxu1 %v8070_v12 }
0x10f3   :  { %6534 = vmatprep.subr.mxu1 %v8726_v51 }
0x10f4   :  { %6535 = vmatpush3.msra.mxu1 %v8077_v45 }
0x10f5   :  { %6536 = vmatprep.subr.mxu1 %v8726_v51 }
0x10f6   :  { %6537 = vmatpush3.msra.mxu1 %v8084_v57 }
0x10f7   :  { %6539 = vmatmul.mubr.msk.f32.vlgmr.msra.gmra.mxu1 %vm576_vm3, %v8493_v62  ;;  %6552 = vmatprep.subr.mxu1 %v8726_v51 }
0x10f8   :  { %6553 = vmatpush3.msra.mxu1 %v8094_v38  ;;  %6560 = vmatprep.mubr.msk.f32.mxu1 %vm6761_vm0, %v8726_v51 }
0x10f9   :  { %6554 = vmatprep.subr.mxu1 %v8726_v51 }
0x10fa   :  { %6555 = vmatpush3.msra.mxu1 %v8101_v32 }
0x10fb   :  { %6556 = vmatprep.subr.mxu1 %v8726_v51 }
0x10fc   :  { %6557 = vmatpush3.msra.mxu1 %v8108_v43 }
0x10fd   :  { %6558 = vmatprep.subr.mxu1 %v8726_v51 }
0x10fe   :  { %6559 = vmatpush3.msra.mxu1 %v8115_v50 }
0x10ff   :  { %6561 = vmatmul.mubr.msk.f32.vlgmr.msra.gmra.mxu1 %vm576_vm3, %v8493_v62  ;;  %6574 = vmatprep.subr.mxu1 %v8726_v51 }
0x1100   :  { %6575 = vmatpush3.msra.mxu1 %v8123_v63  ;;  %6582 = vmatprep.mubr.msk.f32.mxu1 %vm6761_vm0, %v8726_v51 }
0x1101   :  { %6576 = vmatprep.subr.mxu1 %v8726_v51 }
0x1102   :  { %6577 = vmatpush3.msra.mxu1 %v8132_v23 }
0x1103   :  { %6578 = vmatprep.subr.mxu1 %v8726_v51 }
0x1104   :  { %6579 = vmatpush3.msra.mxu1 %v8139_v27 }
0x1105   :  { %6580 = vmatprep.subr.mxu1 %v8726_v51 }
0x1106   :  { %6581 = vmatpush3.msra.mxu1 %v8146_v10 }
0x1107   :  { %6583 = vmatmul.mubr.msk.f32.vlgmr.msra.gmra.mxu1 %vm576_vm3, %v8493_v62  ;;  %6590 = vmatprep.subr.mxu1 %v8726_v51 }
0x1108   :  { %6591 = vmatpush3.msra.mxu1 %v8356_v36  ;;  %6592 = vmatprep.mubr.msk.f32.mxu1 %vm6761_vm0, %v8726_v51 }
0x11a7   :  { %v4978_v0 = vpop.f32.mrf.mxu1 }
0x11a8   :  { %6506 = vmatmul.mubr.msk.f32.vlgmr.msra.gmra.mxu0 %vm576_vm3, %v4978_v0 }
0x11a9   :  { %6520 = vmatpush3.msra.mxu0 %v8232_v13  ;;  %v6496_v11 = vpop.f32.mrf.mxu1  ;;  %6527 = vmatprep.mubr.msk.f32.mxu0 %vm6761_vm0, %v8726_v51 }
0x11aa   :  { %6521 = vmatprep.subr.mxu0 %v8726_v51 }
0x11ab   :  { %6522 = vmatpush3.msra.mxu0 %v8240_v29 }
0x11ac   :  { %6523 = vmatprep.subr.mxu0 %v8726_v51 }
0x11ad   :  { %6524 = vmatpush3.msra.mxu0 %v8249_v28 }
0x11ae   :  { %6525 = vmatprep.subr.mxu0 %v8726_v51 }
0x11af   :  { %v5121_v33 = vpop.f32.mrf.mxu1  ;;  %6526 = vmatpush3.msra.mxu0 %v8256_v37 }
0x11b0   :  { %6528 = vmatmul.mubr.msk.f32.vlgmr.msra.gmra.mxu0 %vm576_vm3, %v4978_v0  ;;  %6541 = vmatprep.subr.mxu0 %v8726_v51 }
0x11b1   :  { %v6518_v58 = vpop.f32.mrf.mxu1  ;;  %6542 = vmatpush3.msra.mxu0 %v8263_v48  ;;  %6549 = vmatprep.mubr.msk.f32.mxu0 %vm6761_vm0, %v8726_v51 }
0x11b2   :  { %6543 = vmatprep.subr.mxu0 %v8726_v51 }
0x11b3   :  { %6544 = vmatpush3.msra.mxu0 %v8271_v49 }
0x11b4   :  { %6545 = vmatprep.subr.mxu0 %v8726_v51 }
0x11b5   :  { %6546 = vmatpush3.msra.mxu0 %v8280_v40 }
0x11b6   :  { %6547 = vmatprep.subr.mxu0 %v8726_v51 }
0x11b7   :  { %v5268_v7 = vpop.f32.mrf.mxu1  ;;  %6548 = vmatpush3.msra.mxu0 %v8287_v17 }
0x11b8   :  { %6550 = vmatmul.mubr.msk.f32.vlgmr.msra.gmra.mxu0 %vm576_vm3, %v4978_v0  ;;  %6563 = vmatprep.subr.mxu0 %v8726_v51 }
0x11b9   :  { %v6540_v12 = vpop.f32.mrf.mxu1  ;;  %6564 = vmatpush3.msra.mxu0 %v8294_v31  ;;  %6571 = vmatprep.mubr.msk.f32.mxu0 %vm6761_vm0, %v8726_v51 }
0x11ba   :  { %6565 = vmatprep.subr.mxu0 %v8726_v51 }
0x11bb   :  { %6566 = vmatpush3.msra.mxu0 %v8302_v26 }
0x11bc   :  { %6567 = vmatprep.subr.mxu0 %v8726_v51 }
0x11bd   :  { %6568 = vmatpush3.msra.mxu0 %v8311_v41 }
0x11be   :  { %6569 = vmatprep.subr.mxu0 %v8726_v51 }
0x11bf   :  { %v5415_v45 = vpop.f32.mrf.mxu1  ;;  %6570 = vmatpush3.msra.mxu0 %v8833_v44 }
0x11c0   :  { %6572 = vmatmul.mubr.msk.f32.vlgmr.msra.gmra.mxu0 %vm576_vm3, %v4978_v0  ;;  %6585 = vmatprep.subr.mxu0 %v8726_v51 }
0x11c1   :  { %v6562_v57 = vpop.f32.mrf.mxu1  ;;  %6586 = vmatpush3.xpose.msk.msra.mxu0 %vm576_vm3, %v8356_v36  ;;  %6587 = vmatprep.mubr.msk.f32.mxu0 %vm6761_vm0, %v8726_v51 }
0x11c7   :  { %v5557_v38 = vpop.f32.mrf.mxu1 }
0x11c9   :  { %v6584_v32 = vpop.f32.mrf.mxu1 }
0x1268   :  { %v5051_v43 = vpop.f32.mrf.mxu0 }
0x1269   :  { %v5122_v50 = vadd.f32 %v5121_v33, %v5051_v43 }
0x126a   :  { %v6507_v63 = vpop.f32.mrf.mxu0 }
0x126b   :  { %v5125_v23 = vadd.f32 %v5122_v50, %v8337_v34 }
0x126d   :  { %v5805_v27 = vmul.f32 -1.442695, %v5125_v23 }
0x126f   :  { %6667 = vpow2.f32 %v5805_v27 }
0x1270   :  { %v5198_v10 = vpop.f32.mrf.mxu0 }
0x1271   :  { %v5269_v13 = vadd.f32 %v5268_v7, %v5198_v10 }
0x1272   :  { %v6529_v29 = vpop.f32.mrf.mxu0 }
0x1273   :  { %v5272_v28 = vadd.f32 %v5269_v13, %v8341_v15 }
0x1275   :  { %v5808_v37 = vmul.f32 -1.442695, %v5272_v28 }
0x1277   :  { %6669 = vpow2.f32 %v5808_v37 }
0x1278   :  { %v5345_v48 = vpop.f32.mrf.mxu0 }
0x1279   :  { %v5416_v51 = vadd.f32 %v5415_v45, %v5345_v48 }
0x127a   :  { %v6551_v49 = vpop.f32.mrf.mxu0 }
0x127b   :  { %v5419_v41 = vadd.f32 %v5416_v51, %v8348_v3 }
0x127c   :  { %v6668_v40 = vpop.eup %6667 }
0x127d   :  { %v5129_v31 = vadd.f32 1.0, %v6668_v40 }
0x127f   :  { %6671 = vrcp.f32 %v5129_v31 }
0x1280   :  { %v5487_v17 = vpop.f32.mrf.mxu0  ;;  %6673 = vtanh.f32 %v5419_v41 }
0x1281   :  { %v5558_v26 = vadd.f32 %v5557_v38, %v5487_v17 }
0x1282   :  { %v6573_v36 = vpop.f32.mrf.mxu0 }
0x1283   :  { %v5561_v34 = vadd.f32 %v5558_v26, %v8351_v53 }
0x1284   :  { %v6670_v44 = vpop.eup %6669 }
0x1285   :  { %v5276_v52 = vadd.f32 1.0, %v6670_v44  ;;  %v5813_v56 = vmul.f32 -1.442695, %v5561_v34 }
0x1287   :  { %6675 = vrcp.f32 %v5276_v52 }
0x1288   :  { %6677 = vpow2.f32 %v5813_v56 }
0x128c   :  { %v6672_v15 = vpop.eup %6671 }
0x128d   :  { %v6674_v4 = vpop.eup %6673 }
0x128e   :  { %v5569_v6 = vmul.f32 %v6674_v4, %v6672_v15 }
0x1294   :  { %v6676_v8 = vpop.eup %6675 }
0x1295   :  { %v6678_v22 = vpop.eup %6677  ;;  %v5568_v14 = vmul.f32 %v6676_v8, %v8490_v61 }
0x1296   :  { %v5565_v30 = vadd.f32 1.0, %v6678_v22 }
0x1297   :  { %v5570_v54 = vadd.f32 %v5569_v6, %v5568_v14 }
0x1298   :  { %6679 = vrcp.f32 %v5565_v30 }
0x1299   :  { %6681 = vtanh.f32 %v5570_v54 }
0x12a5   :  { %v6680_v3 = vpop.eup %6679 }
0x12a6   :  { %v6682_v53 = vpop.eup %6681 }
0x12a7   :  { %v5572_v59 = vmul.f32 %v6682_v53, %v6680_v3 }
0x12a9   :  { %6588 = vmatmul.mubr.msk.f32.vlgmr.msra.gmra.mxu0 %vm576_vm3, %v5572_v59  ;;  %5734 = vst.msk [vmem:[%s8639_s15] sm:$0x3] %vm5733_vm15, %v5572_v59 }
0x1369   :  { %v5642_v5 = vpop.f32.mrf.mxu0 }
0x136a   :  { %v5646_v61 = vsel %vm8383_vm13, %v5642_v5, -1e+30 }
0x136b   :  { %v5647_v35 = vsel %vm4144_vm14, %v5646_v61, -inf  ;;  %v6589_v47 = vpop.f32.mrf.mxu0 }
0x136c   :  { %5648 = vmax.xlane.f32.xlu1 %v5647_v35 }
0x13f5   :  { %v5649_v62 = vpop.xlane.xlu1 %5648 }
0x13f6   :  { %v5650_v55 = vsub.f32 %v5646_v61, %v5649_v62 }
0x13f8   :  { %v5651_v24 = vmul.f32 1.442695, %v5650_v55 }
0x13fa   :  { %6683 = vpow2.f32 %v5651_v24 }
0x1407   :  { %v6684_v42 = vpop.eup %6683 }
0x1408   :  { %v5653_v1 = vsel %vm8383_vm13, %v6684_v42, 0.0 }
0x1409   :  { %v5654_v16 = vsel %vm4144_vm14, %v5653_v1, 0.0 }
0x140a   :  { %5655 = vadd.xlane.f32.xlu0 %v5654_v16 }
0x1493   :  { %v5656_v19 = vpop.xlane.xlu0 %5655 }
0x1494   :  { %v5657_v20 = vmax.f32 %v5656_v19, 1e-30 }
0x1496   :  { %6685 = vrcp.f32 %v5657_v20 }
0x14a3   :  { %v6686_v39 = vpop.eup %6685 }
0x14a4   :  { %v5659_v9 = vmul.f32 %v6686_v39, %v5653_v1 }
0x14a6   :  { %6593 = vmatmul.mubr.msk.f32.vlgmr.msra.gmra.mxu1 %vm218_vm2, %v5659_v9 }
0x1566   :  { %v5729_v2 = vpop.f32.mrf.mxu1 }
0x1567   :  { %5735 = vst.msk [vmem:[%s8640_s16] sm:$0x3] %vm5733_vm15, %v5729_v2 }
0x1568   :  { %v6594_v25 = vpop.f32.mrf.mxu1 }

</bundles_post_ra>
